<compile_context>
chip_gen: v7x
topology: tpu7x:2x2x1
jax: 0.10.0
libtpu: 0.0.40
codegen_flags: <defaults>
</compile_context>

<pallas_src>
import functools
import math

import jax
import jax.numpy as jnp
from jax.experimental import pallas as pl
from jax.experimental.pallas import tpu as pltpu

NEG_INF = -1e9
LN_EPS = 1e-5


# ------------------------------ VMEM budgeting ------------------------------

def _vmem_cap_bytes():
    try:
        return int(pltpu.get_tpu_info().vmem_capacity_bytes)
    except Exception:                      # noqa: BLE001 - fall back to the smallest (v7x) size
        return 64 << 20


def _vmem_limit(block_arrays, scratch_bytes=0):
    """Rough per-call budget: double-buffered blocks (upper bound) + scratch + headroom."""
    total = scratch_bytes
    for a in block_arrays:
        total += 2 * int(a.size) * a.dtype.itemsize
    total = int(total * 1.5) + (2 << 20)
    return max(min(total, min(_vmem_cap_bytes(), 96 << 20)), 4 << 20)


# ------------------------------ in-kernel helpers ------------------------------

def _ln(x, g, b, eps=LN_EPS):
    """LayerNorm on (S, D) with gamma/beta of shape (1, D); f32 math."""
    mu = jnp.mean(x, axis=-1, keepdims=True)
    xc = x - mu
    var = jnp.mean(xc * xc, axis=-1, keepdims=True)
    return xc * jax.lax.rsqrt(var + eps) * g + b


def _mm(a, w, b=None):
    """MXU matmul with f32 accumulation. `w` is already bf16 in HBM; only the activation casts."""
    y = jnp.dot(a.astype(jnp.bfloat16), w, preferred_element_type=jnp.float32)
    return y if b is None else y + b


def _mha_core(q, k, v, add_mask, num_heads, scale, ctx_ref):
    """Per-head attention; each head's P@V is written straight into ctx_ref[:, head slice].

    q:(Sq,D) k,v:(Sk,D) bf16; add_mask:(Sq,Sk) or None; ctx_ref: f32 VMEM scratch (Sq, D).
    No lane-axis concatenate (review item): the context is assembled in VMEM scratch.
    """
    D = q.shape[-1]
    dh = D // num_heads
    for h in range(num_heads):                      # static unroll (num_heads is small)
        sl = slice(h * dh, (h + 1) * dh)
        s = jnp.einsum('qd,kd->qk', q[:, sl], k[:, sl],
                       preferred_element_type=jnp.float32) * scale
        if add_mask is not None:
            s = s + add_mask
        s = s - jnp.max(s, axis=-1, keepdims=True)
        p = jnp.exp(s)
        p = p * pl.reciprocal(jnp.sum(p, axis=-1, keepdims=True), approx=True)
        ctx_ref[:, sl] = jnp.dot(p.astype(jnp.bfloat16), v[:, sl],
                                 preferred_element_type=jnp.float32)


# ------------------------------ fused layer kernels ------------------------------

def _enc_layer_kernel(x_ref, mask_ref,
                      ln1_g, ln1_b, wqkv, bqkv, wo, bo,
                      ln2_g, ln2_b, w1, b1, w2, b2,
                      o_ref, ctx_ref, *, num_heads):
    """BERT-style pre-norm encoder block (self-attn + GELU FFN), one batch element per step."""
    x = x_ref[0].astype(jnp.float32)                # (S, D) bf16 -> f32 for LN/residual math
    D = x.shape[-1]
    scale = 1.0 / math.sqrt(D // num_heads)
    add_mask = mask_ref[0]                          # precomputed additive mask (S, S), bf16

    h = _ln(x, ln1_g[...], ln1_b[...])
    qkv = _mm(h, wqkv[...], bqkv[...]).astype(jnp.bfloat16)   # fused QKV: (S, 3D)
    _mha_core(qkv[:, :D], qkv[:, D:2 * D], qkv[:, 2 * D:],
              add_mask, num_heads, scale, ctx_ref)
    x = x + _mm(ctx_ref[...], wo[...], bo[...])

    h = _ln(x, ln2_g[...], ln2_b[...])
    f = jax.nn.gelu(_mm(h, w1[...], b1[...]))       # tanh-approx GELU (EUP)
    o_ref[0] = (x + _mm(f, w2[...], b2[...])).astype(o_ref.dtype)


def _dec_layer_kernel(x_ref, mem_ref,
                      s_wqkv, s_bqkv, s_wo, s_bo, ln1_g, ln1_b,
                      c_wq, c_bq, c_wkv, c_bkv, c_wo, c_bo, ln2_g, ln2_b,
                      w1, b1, w2, b2, ln3_g, ln3_b,
                      o_ref, ctx_ref, *, num_heads):
    """PyTorch nn.TransformerDecoderLayer semantics (post-norm, ReLU FFN, no masks)."""
    x = x_ref[0].astype(jnp.float32)                # (S, D)
    mem = mem_ref[0]                                # (Sm, D) bf16 -> fed straight to the MXU
    D = x.shape[-1]
    scale = 1.0 / math.sqrt(D // num_heads)

    # self-attention (no tgt_mask in the reference forward)
    qkv = _mm(x, s_wqkv[...], s_bqkv[...]).astype(jnp.bfloat16)
    _mha_core(qkv[:, :D], qkv[:, D:2 * D], qkv[:, 2 * D:], None, num_heads, scale, ctx_ref)
    x = _ln(x + _mm(ctx_ref[...], s_wo[...], s_bo[...]), ln1_g[...], ln1_b[...])

    # cross-attention over encoder memory
    q = _mm(x, c_wq[...], c_bq[...]).astype(jnp.bfloat16)
    kv = _mm(mem, c_wkv[...], c_bkv[...]).astype(jnp.bfloat16)   # fused KV: (Sm, 2D)
    _mha_core(q, kv[:, :D], kv[:, D:], None, num_heads, scale, ctx_ref)
    x = _ln(x + _mm(ctx_ref[...], c_wo[...], c_bo[...]), ln2_g[...], ln2_b[...])

    # ReLU FFN (post-norm)
    f = jnp.maximum(_mm(x, w1[...], b1[...]), 0.0)
    o_ref[0] = _ln(x + _mm(f, w2[...], b2[...]),
                   ln3_g[...], ln3_b[...]).astype(o_ref.dtype)


def encoder_layer(x, add_mask, p, num_heads):
    B, S, D = x.shape
    F = p["ff_w1"].shape[1]
    weights = [
        p["ln1_g"].reshape(1, D), p["ln1_b"].reshape(1, D),
        p["wqkv"], p["bqkv"].reshape(1, 3 * D),
        p["wo"], p["bo"].reshape(1, D),
        p["ln2_g"].reshape(1, D), p["ln2_b"].reshape(1, D),
        p["ff_w1"], p["ff_b1"].reshape(1, F),
        p["ff_w2"], p["ff_b2"].reshape(1, D),
    ]
    w_specs = [pl.BlockSpec(w.shape, lambda b: (0, 0)) for w in weights]
    vmem = _vmem_limit([x, add_mask, x] + weights, scratch_bytes=S * D * 4)
    return pl.pallas_call(
        functools.partial(_enc_layer_kernel, num_heads=num_heads),
        out_shape=jax.ShapeDtypeStruct((B, S, D), jnp.bfloat16),
        grid=(B,),
        in_specs=[pl.BlockSpec((1, S, D), lambda b: (b, 0, 0)),
                  pl.BlockSpec((1, S, S), lambda b: (b, 0, 0))] + w_specs,
        out_specs=pl.BlockSpec((1, S, D), lambda b: (b, 0, 0)),
        scratch_shapes=[pltpu.VMEM((S, D), jnp.float32)],
        compiler_params=pltpu.CompilerParams(
            dimension_semantics=("parallel",), vmem_limit_bytes=vmem),
    )(x, add_mask, *weights)


def decoder_layer(x, memory, p, num_heads):
    B, S, D = x.shape
    Sm = memory.shape[1]
    F = p["ff_w1"].shape[1]
    weights = [
        p["s_wqkv"], p["s_bqkv"].reshape(1, 3 * D), p["s_wo"], p["s_bo"].reshape(1, D),
        p["ln1_g"].reshape(1, D), p["ln1_b"].reshape(1, D),
        p["c_wq"], p["c_bq"].reshape(1, D), p["c_wkv"], p["c_bkv"].reshape(1, 2 * D),
        p["c_wo"], p["c_bo"].reshape(1, D),
        p["ln2_g"].reshape(1, D), p["ln2_b"].reshape(1, D),
        p["ff_w1"], p["ff_b1"].reshape(1, F), p["ff_w2"], p["ff_b2"].reshape(1, D),
        p["ln3_g"].reshape(1, D), p["ln3_b"].reshape(1, D),
    ]
    w_specs = [pl.BlockSpec(w.shape, lambda b: (0, 0)) for w in weights]
    vmem = _vmem_limit([x, memory, x] + weights, scratch_bytes=S * D * 4)
    return pl.pallas_call(
        functools.partial(_dec_layer_kernel, num_heads=num_heads),
        out_shape=jax.ShapeDtypeStruct((B, S, D), jnp.bfloat16),
        grid=(B,),
        in_specs=[pl.BlockSpec((1, S, D), lambda b: (b, 0, 0)),
                  pl.BlockSpec((1, Sm, D), lambda b: (b, 0, 0))] + w_specs,
        out_specs=pl.BlockSpec((1, S, D), lambda b: (b, 0, 0)),
        scratch_shapes=[pltpu.VMEM((S, D), jnp.float32)],
        compiler_params=pltpu.CompilerParams(
            dimension_semantics=("parallel",), vmem_limit_bytes=vmem),
    )(x, memory, *weights)


# ------------------------------ tiled vocab projection ------------------------------

def _matmul_kernel(x_ref, w_ref, b_ref, o_ref, acc_ref):
    @pl.when(pl.program_id(2) == 0)
    def _():
        acc_ref[...] = jnp.zeros_like(acc_ref)

    acc_ref[...] += jnp.dot(x_ref[...].astype(jnp.bfloat16), w_ref[...],
                            preferred_element_type=jnp.float32)

    @pl.when(pl.program_id(2) == pl.num_programs(2) - 1)
    def _():
        o_ref[...] = acc_ref[...] + b_ref[...]       # bias applied once, at finalize


def _fit(dim, pref, align):
    """Largest align-multiple divisor of dim that is <= pref (or the full dim)."""
    if dim <= pref:
        return dim
    start = pref - (pref % align)
    for b in range(start, 0, -align):
        if dim % b == 0:
            return b
    return dim   # TODO(synk): pad non-divisible dims instead of falling back to full width


def linear_tiled(x2d, w, b):
    """Tiled [M,K]@[K,N]+b: bf16 MXU operands (w stored bf16), f32 VMEM accumulator."""
    M, K = x2d.shape
    N = w.shape[1]
    big_vmem = _vmem_cap_bytes() >= (100 << 20)      # v5e/v6e (128 MiB) vs v7x (64 MiB)
    bm = _fit(M, 512 if big_vmem else 256, 8)
    bn = _fit(N, 1024 if big_vmem else 512, 128)
    bk = _fit(K, 1024 if big_vmem else 512, 128)
    grid = (M // bm, N // bn, K // bk)
    blk_bytes = (2 * (bm * bk * x2d.dtype.itemsize + bk * bn * w.dtype.itemsize
                      + bn * 4 + bm * bn * 4) + bm * bn * 4)
    vmem = max(min(int(blk_bytes * 1.5) + (2 << 20), min(_vmem_cap_bytes(), 96 << 20)), 4 << 20)
    return pl.pallas_call(
        _matmul_kernel,
        out_shape=jax.ShapeDtypeStruct((M, N), jnp.float32),
        grid=grid,
        in_specs=[pl.BlockSpec((bm, bk), lambda i, j, k: (i, k)),
                  pl.BlockSpec((bk, bn), lambda i, j, k: (k, j)),
                  pl.BlockSpec((1, bn), lambda i, j, k: (0, j))],
        out_specs=pl.BlockSpec((bm, bn), lambda i, j, k: (i, j)),
        scratch_shapes=[pltpu.VMEM((bm, bn), jnp.float32)],
        compiler_params=pltpu.CompilerParams(
            dimension_semantics=("parallel", "parallel", "arbitrary"),
            vmem_limit_bytes=vmem),
    )(x2d, w, b.reshape(1, N))


# ------------------------------ model forward ------------------------------

def seq2seq_forward(params, x, dec_input, segment_label, seq_mask, enc_heads, dec_heads):
    B, S = x.shape
    D = params["tok_emb"].shape[1]

    # Additive attention mask precomputed ONCE (bf16) instead of per layer / per batch element.
    add_mask = ((1.0 - seq_mask.astype(jnp.float32)) * NEG_INF).astype(jnp.bfloat16)

    # --- UNILM encoder embeddings (gathers kept in plain JAX glue) ---
    # TODO(synk): embedding gathers as Pallas DMA-gather kernels.
    h = (params["tok_emb"][x]
         + params["pos_emb"][:S][None, :, :]
         + params["seg_emb"][segment_label]).astype(jnp.bfloat16)
    for lp in params["enc_layers"]:
        h = encoder_layer(h, add_mask, lp, enc_heads)
    memory = h                                        # dropout (eval) = identity

    # --- decoder-side embedding (segment_label=None -> no segment embedding) ---
    Sd = dec_input.shape[1]
    y = (params["tok_emb_dec"][dec_input]
         + params["pos_emb"][:Sd][None, :, :]).astype(jnp.bfloat16)

    # --- transformer decoder stack ---
    # TODO(synk): cross-pallas_call prefetch of layer i+1 weights behind layer i compute.
    for lp in params["dec_layers"]:
        y = decoder_layer(y, memory, lp, dec_heads)

    # --- vocab projection (tiled) ---
    logits = linear_tiled(y.reshape(B * Sd, D), params["proj_w"], params["proj_b"])
    return logits.reshape(B, Sd, -1)


# ------------------------------ parameter init ------------------------------

def sinusoidal_pe(max_len, d_model):
    pos = jnp.arange(max_len, dtype=jnp.float32)[:, None]
    i = jnp.arange(0, d_model, 2, dtype=jnp.float32)
    div = jnp.exp(-jnp.log(10000.0) * i / d_model)
    pe = jnp.zeros((max_len, d_model), jnp.float32)
    pe = pe.at[:, 0::2].set(jnp.sin(pos * div))
    pe = pe.at[:, 1::2].set(jnp.cos(pos * div))
    return pe


def init_params(key, vocab, d_model, enc_layers, dec_layers, ff_enc, ff_dec, max_len=64):
    keys = iter(jax.random.split(key, 4096))

    def dense(shape, scale=0.02, dtype=jnp.bfloat16):
        # Matrix weights live in HBM as bf16 (MXU operand dtype); biases / LN params stay f32.
        return (scale * jax.random.normal(next(keys), shape)).astype(dtype)

    ones = lambda n: jnp.ones((n,), jnp.float32)
    zeros = lambda n: jnp.zeros((n,), jnp.float32)

    def enc_layer_p():
        return dict(
            ln1_g=ones(d_model), ln1_b=zeros(d_model),
            wqkv=dense((d_model, 3 * d_model)), bqkv=zeros(3 * d_model),
            wo=dense((d_model, d_model)), bo=zeros(d_model),
            ln2_g=ones(d_model), ln2_b=zeros(d_model),
            ff_w1=dense((d_model, ff_enc)), ff_b1=zeros(ff_enc),
            ff_w2=dense((ff_enc, d_model)), ff_b2=zeros(d_model),
        )

    def dec_layer_p():
        return dict(
            s_wqkv=dense((d_model, 3 * d_model)), s_bqkv=zeros(3 * d_model),
            s_wo=dense((d_model, d_model)), s_bo=zeros(d_model),
            ln1_g=ones(d_model), ln1_b=zeros(d_model),
            c_wq=dense((d_model, d_model)), c_bq=zeros(d_model),
            c_wkv=dense((d_model, 2 * d_model)), c_bkv=zeros(2 * d_model),
            c_wo=dense((d_model, d_model)), c_bo=zeros(d_model),
            ln2_g=ones(d_model), ln2_b=zeros(d_model),
            ff_w1=dense((d_model, ff_dec)), ff_b1=zeros(ff_dec),
            ff_w2=dense((ff_dec, d_model)), ff_b2=zeros(d_model),
            ln3_g=ones(d_model), ln3_b=zeros(d_model),
        )

    return dict(
        tok_emb=dense((vocab, d_model), dtype=jnp.float32),     # UNILM-internal embedding table
        seg_emb=dense((3, d_model), dtype=jnp.float32),
        tok_emb_dec=dense((vocab, d_model), dtype=jnp.float32),  # Sequence2Sequence.embedding
        pos_emb=sinusoidal_pe(max_len, d_model),
        enc_layers=[enc_layer_p() for _ in range(enc_layers)],
        dec_layers=[dec_layer_p() for _ in range(dec_layers)],
        proj_w=dense((d_model, vocab)),
        proj_b=zeros(vocab),
    )


# --------------------------------- main ------------------------------------

if __name__ == "__main__":
    B, S_ENC, S_DEC = 2, 8, 8
    VOCAB, D_MODEL = 128, 32
    ENC_LAYERS, ENC_HEADS = 2, 4
    DEC_LAYERS, DEC_HEADS = 2, 4
    FF_ENC = 4 * D_MODEL            # BERT-style feed-forward
    FF_DEC = 2048                   # nn.TransformerDecoderLayer default dim_feedforward

    root = jax.random.PRNGKey(0)
    kp, kx, kd, ks = jax.random.split(root, 4)

    params = init_params(kp, VOCAB, D_MODEL, ENC_LAYERS, DEC_LAYERS, FF_ENC, FF_DEC)

    x = jax.random.randint(kx, (B, S_ENC), 0, VOCAB)                 # encoder token ids
    dec_input = jax.random.randint(kd, (B, S_DEC), 0, VOCAB)         # decoder token ids
    segment_label = jax.random.randint(ks, (B, S_ENC), 0, 2)         # segment ids {0,1}
    seq_mask = jnp.broadcast_to(                                     # UNILM seq2seq attention mask
        jnp.tril(jnp.ones((S_ENC, S_ENC), jnp.float32))[None], (B, S_ENC, S_ENC))

    fwd = jax.jit(functools.partial(seq2seq_forward,
                                    enc_heads=ENC_HEADS, dec_heads=DEC_HEADS))
    logits = jax.block_until_ready(fwd(params, x, dec_input, segment_label, seq_mask))

    assert logits.shape == (B, S_DEC, VOCAB), logits.shape
    assert logits.dtype == jnp.float32
    assert bool(jnp.all(jnp.isfinite(logits)))
    print("KERNEL_OK")
</pallas_src>

<mosaic_0001>
module attributes {stable_mosaic.version = 11 : i64} {
  func.func @_enc_layer_kernel(%arg0: i32, %arg1: memref<1x8x32xbf16, #tpu.memory_space<vmem>>, %arg2: memref<1x8x8xbf16, #tpu.memory_space<vmem>>, %arg3: memref<1x32xf32, #tpu.memory_space<vmem>>, %arg4: memref<1x32xf32, #tpu.memory_space<vmem>>, %arg5: memref<32x96xbf16, #tpu.memory_space<vmem>>, %arg6: memref<1x96xf32, #tpu.memory_space<vmem>>, %arg7: memref<32x32xbf16, #tpu.memory_space<vmem>>, %arg8: memref<1x32xf32, #tpu.memory_space<vmem>>, %arg9: memref<1x32xf32, #tpu.memory_space<vmem>>, %arg10: memref<1x32xf32, #tpu.memory_space<vmem>>, %arg11: memref<32x128xbf16, #tpu.memory_space<vmem>>, %arg12: memref<1x128xf32, #tpu.memory_space<vmem>>, %arg13: memref<128x32xbf16, #tpu.memory_space<vmem>>, %arg14: memref<1x32xf32, #tpu.memory_space<vmem>>, %arg15: memref<1x8x32xbf16, #tpu.memory_space<vmem>>, %arg16: memref<8x32xf32, #tpu.memory_space<vmem>>) attributes {dimension_semantics = [#tpu.dimension_semantics<parallel>], iteration_bounds = array<i64: 2>, scalar_prefetch = 0 : i64, scratch_operands = 1 : i64, tpu.core_type = #tpu.core_type<tc>, window_params = [{transform_indices = @transform_0, window_bounds = array<i64: 1, 8, 32>}, {transform_indices = @transform_1, window_bounds = array<i64: 1, 8, 8>}, {pipeline_mode = #tpu.pipeline_mode<synchronous>, transform_indices = @transform_2, window_bounds = array<i64: 1, 32>}, {pipeline_mode = #tpu.pipeline_mode<synchronous>, transform_indices = @transform_3, window_bounds = array<i64: 1, 32>}, {pipeline_mode = #tpu.pipeline_mode<synchronous>, transform_indices = @transform_4, window_bounds = array<i64: 32, 96>}, {pipeline_mode = #tpu.pipeline_mode<synchronous>, transform_indices = @transform_5, window_bounds = array<i64: 1, 96>}, {pipeline_mode = #tpu.pipeline_mode<synchronous>, transform_indices = @transform_6, window_bounds = array<i64: 32, 32>}, {pipeline_mode = #tpu.pipeline_mode<synchronous>, transform_indices = @transform_7, window_bounds = array<i64: 1, 32>}, {pipeline_mode = #tpu.pipeline_mode<synchronous>, transform_indices = @transform_8, window_bounds = array<i64: 1, 32>}, {pipeline_mode = #tpu.pipeline_mode<synchronous>, transform_indices = @transform_9, window_bounds = array<i64: 1, 32>}, {pipeline_mode = #tpu.pipeline_mode<synchronous>, transform_indices = @transform_10, window_bounds = array<i64: 32, 128>}, {pipeline_mode = #tpu.pipeline_mode<synchronous>, transform_indices = @transform_11, window_bounds = array<i64: 1, 128>}, {pipeline_mode = #tpu.pipeline_mode<synchronous>, transform_indices = @transform_12, window_bounds = array<i64: 128, 32>}, {pipeline_mode = #tpu.pipeline_mode<synchronous>, transform_indices = @transform_13, window_bounds = array<i64: 1, 32>}, {transform_indices = @transform_14, window_bounds = array<i64: 1, 8, 32>}]} {
    %c0 = arith.constant 0 : index
    %c0_0 = arith.constant 0 : index
    %c0_1 = arith.constant 0 : index
    %0 = vector.load %arg1[%c0, %c0_0, %c0_1] : memref<1x8x32xbf16, #tpu.memory_space<vmem>>, vector<1x8x32xbf16>
    %1 = vector.shape_cast %0 : vector<1x8x32xbf16> to vector<8x32xbf16>
    %2 = arith.extf %1 : vector<8x32xbf16> to vector<8x32xf32>
    %c0_2 = arith.constant 0 : index
    %c0_3 = arith.constant 0 : index
    %c0_4 = arith.constant 0 : index
    %3 = vector.load %arg2[%c0_2, %c0_3, %c0_4] : memref<1x8x8xbf16, #tpu.memory_space<vmem>>, vector<1x8x8xbf16>
    %4 = vector.shape_cast %3 : vector<1x8x8xbf16> to vector<8x8xbf16>
    %c0_5 = arith.constant 0 : index
    %c0_6 = arith.constant 0 : index
    %5 = vector.load %arg3[%c0_5, %c0_6] : memref<1x32xf32, #tpu.memory_space<vmem>>, vector<1x32xf32>
    %c0_7 = arith.constant 0 : index
    %c0_8 = arith.constant 0 : index
    %6 = vector.load %arg4[%c0_7, %c0_8] : memref<1x32xf32, #tpu.memory_space<vmem>>, vector<1x32xf32>
    %cst = arith.constant dense<0.000000e+00> : vector<8xf32>
    %7 = vector.multi_reduction <add>, %2, %cst [1] : vector<8x32xf32> to vector<8xf32>
    %8 = vector.shape_cast %7 : vector<8xf32> to vector<8x1xf32>
    %cst_9 = arith.constant 3.200000e+01 : f32
    %9 = vector.broadcast %cst_9 : f32 to vector<8x1xf32>
    %10 = arith.divf %8, %9 : vector<8x1xf32>
    %11 = vector.broadcast %10 : vector<8x1xf32> to vector<8x32xf32>
    %12 = arith.subf %2, %11 : vector<8x32xf32>
    %13 = arith.mulf %12, %12 : vector<8x32xf32>
    %cst_10 = arith.constant dense<0.000000e+00> : vector<8xf32>
    %14 = vector.multi_reduction <add>, %13, %cst_10 [1] : vector<8x32xf32> to vector<8xf32>
    %15 = vector.shape_cast %14 : vector<8xf32> to vector<8x1xf32>
    %cst_11 = arith.constant 3.200000e+01 : f32
    %16 = vector.broadcast %cst_11 : f32 to vector<8x1xf32>
    %17 = arith.divf %15, %16 : vector<8x1xf32>
    %cst_12 = arith.constant 9.99999974E-6 : f32
    %18 = vector.broadcast %cst_12 : f32 to vector<8x1xf32>
    %19 = arith.addf %17, %18 : vector<8x1xf32>
    %20 = math.rsqrt %19 : vector<8x1xf32>
    %21 = vector.broadcast %20 : vector<8x1xf32> to vector<8x32xf32>
    %22 = arith.mulf %12, %21 : vector<8x32xf32>
    %23 = vector.broadcast %5 : vector<1x32xf32> to vector<8x32xf32>
    %24 = arith.mulf %22, %23 : vector<8x32xf32>
    %25 = vector.broadcast %6 : vector<1x32xf32> to vector<8x32xf32>
    %26 = arith.addf %24, %25 : vector<8x32xf32>
    %c0_13 = arith.constant 0 : index
    %c0_14 = arith.constant 0 : index
    %27 = vector.load %arg5[%c0_13, %c0_14] : memref<32x96xbf16, #tpu.memory_space<vmem>>, vector<32x96xbf16>
    %c0_15 = arith.constant 0 : index
    %c0_16 = arith.constant 0 : index
    %28 = vector.load %arg6[%c0_15, %c0_16] : memref<1x96xf32, #tpu.memory_space<vmem>>, vector<1x96xf32>
    %29 = arith.truncf %26 : vector<8x32xf32> to vector<8x32xbf16>
    %cst_17 = arith.constant dense<0.000000e+00> : vector<8x96xf32>
    %30 = tpu.matmul %29, %27, %cst_17 {dimension_numbers = #tpu.dot_dimension_numbers<[1], [0], [0], [1], [0, 0, 1, 1], [], []>} : vector<8x32xbf16>, vector<32x96xbf16>, vector<8x96xf32> -> vector<8x96xf32>
    %31 = vector.broadcast %28 : vector<1x96xf32> to vector<8x96xf32>
    %32 = arith.addf %30, %31 : vector<8x96xf32>
    %33 = arith.truncf %32 : vector<8x96xf32> to vector<8x96xbf16>
    %34 = vector.extract_strided_slice %33 {offsets = [0, 0], sizes = [8, 32], strides = [1, 1]} : vector<8x96xbf16> to vector<8x32xbf16>
    %35 = vector.extract_strided_slice %33 {offsets = [0, 32], sizes = [8, 32], strides = [1, 1]} : vector<8x96xbf16> to vector<8x32xbf16>
    %36 = vector.extract_strided_slice %33 {offsets = [0, 64], sizes = [8, 32], strides = [1, 1]} : vector<8x96xbf16> to vector<8x32xbf16>
    %37 = vector.extract_strided_slice %34 {offsets = [0, 0], sizes = [8, 8], strides = [1, 1]} : vector<8x32xbf16> to vector<8x8xbf16>
    %38 = vector.extract_strided_slice %35 {offsets = [0, 0], sizes = [8, 8], strides = [1, 1]} : vector<8x32xbf16> to vector<8x8xbf16>
    "tpu.trace_start"() <{level = 10 : i32, message = "qd,kd->qk"}> : () -> ()
    %cst_18 = arith.constant dense<0.000000e+00> : vector<8x8xf32>
    %39 = tpu.matmul %37, %38, %cst_18 {dimension_numbers = #tpu.dot_dimension_numbers<[1], [1], [0], [0], [0, 0, 1, 0], [], []>} : vector<8x8xbf16>, vector<8x8xbf16>, vector<8x8xf32> -> vector<8x8xf32>
    "tpu.trace_stop"() : () -> ()
    %cst_19 = arith.constant 0.353553385 : f32
    %40 = vector.broadcast %cst_19 : f32 to vector<8x8xf32>
    %41 = arith.mulf %39, %40 : vector<8x8xf32>
    %42 = arith.extf %4 : vector<8x8xbf16> to vector<8x8xf32>
    %43 = arith.addf %41, %42 : vector<8x8xf32>
    %cst_20 = arith.constant dense<0xFF800000> : vector<8xf32>
    %44 = vector.multi_reduction <maximumf>, %43, %cst_20 [1] : vector<8x8xf32> to vector<8xf32>
    %45 = vector.shape_cast %44 : vector<8xf32> to vector<8x1xf32>
    %46 = vector.broadcast %45 : vector<8x1xf32> to vector<8x8xf32>
    %47 = arith.subf %43, %46 : vector<8x8xf32>
    %48 = math.exp %47 : vector<8x8xf32>
    %cst_21 = arith.constant dense<0.000000e+00> : vector<8xf32>
    %49 = vector.multi_reduction <add>, %48, %cst_21 [1] : vector<8x8xf32> to vector<8xf32>
    %50 = vector.shape_cast %49 : vector<8xf32> to vector<8x1xf32>
    %51 = tpu.reciprocal %50 {approx = true} : vector<8x1xf32> -> vector<8x1xf32>
    %52 = vector.broadcast %51 : vector<8x1xf32> to vector<8x8xf32>
    %53 = arith.mulf %48, %52 : vector<8x8xf32>
    %54 = arith.truncf %53 : vector<8x8xf32> to vector<8x8xbf16>
    %55 = vector.extract_strided_slice %36 {offsets = [0, 0], sizes = [8, 8], strides = [1, 1]} : vector<8x32xbf16> to vector<8x8xbf16>
    %cst_22 = arith.constant dense<0.000000e+00> : vector<8x8xf32>
    %56 = tpu.matmul %54, %55, %cst_22 {dimension_numbers = #tpu.dot_dimension_numbers<[1], [0], [0], [1], [0, 0, 1, 1], [], []>} : vector<8x8xbf16>, vector<8x8xbf16>, vector<8x8xf32> -> vector<8x8xf32>
    %c0_23 = arith.constant 0 : index
    %c0_24 = arith.constant 0 : index
    %57 = vector.load %arg16[%c0_23, %c0_24] : memref<8x32xf32, #tpu.memory_space<vmem>>, vector<8x8xf32>
    tpu.vector_store %arg16[%c0_23, %c0_24], %56 {strides = array<i32>} : memref<8x32xf32, #tpu.memory_space<vmem>>, vector<8x8xf32>,
    %58 = vector.extract_strided_slice %34 {offsets = [0, 8], sizes = [8, 8], strides = [1, 1]} : vector<8x32xbf16> to vector<8x8xbf16>
    %59 = vector.extract_strided_slice %35 {offsets = [0, 8], sizes = [8, 8], strides = [1, 1]} : vector<8x32xbf16> to vector<8x8xbf16>
    "tpu.trace_start"() <{level = 10 : i32, message = "qd,kd->qk"}> : () -> ()
    %cst_25 = arith.constant dense<0.000000e+00> : vector<8x8xf32>
    %60 = tpu.matmul %58, %59, %cst_25 {dimension_numbers = #tpu.dot_dimension_numbers<[1], [1], [0], [0], [0, 0, 1, 0], [], []>} : vector<8x8xbf16>, vector<8x8xbf16>, vector<8x8xf32> -> vector<8x8xf32>
    "tpu.trace_stop"() : () -> ()
    %cst_26 = arith.constant 0.353553385 : f32
    %61 = vector.broadcast %cst_26 : f32 to vector<8x8xf32>
    %62 = arith.mulf %60, %61 : vector<8x8xf32>
    %63 = arith.extf %4 : vector<8x8xbf16> to vector<8x8xf32>
    %64 = arith.addf %62, %63 : vector<8x8xf32>
    %cst_27 = arith.constant dense<0xFF800000> : vector<8xf32>
    %65 = vector.multi_reduction <maximumf>, %64, %cst_27 [1] : vector<8x8xf32> to vector<8xf32>
    %66 = vector.shape_cast %65 : vector<8xf32> to vector<8x1xf32>
    %67 = vector.broadcast %66 : vector<8x1xf32> to vector<8x8xf32>
    %68 = arith.subf %64, %67 : vector<8x8xf32>
    %69 = math.exp %68 : vector<8x8xf32>
    %cst_28 = arith.constant dense<0.000000e+00> : vector<8xf32>
    %70 = vector.multi_reduction <add>, %69, %cst_28 [1] : vector<8x8xf32> to vector<8xf32>
    %71 = vector.shape_cast %70 : vector<8xf32> to vector<8x1xf32>
    %72 = tpu.reciprocal %71 {approx = true} : vector<8x1xf32> -> vector<8x1xf32>
    %73 = vector.broadcast %72 : vector<8x1xf32> to vector<8x8xf32>
    %74 = arith.mulf %69, %73 : vector<8x8xf32>
    %75 = arith.truncf %74 : vector<8x8xf32> to vector<8x8xbf16>
    %76 = vector.extract_strided_slice %36 {offsets = [0, 8], sizes = [8, 8], strides = [1, 1]} : vector<8x32xbf16> to vector<8x8xbf16>
    %cst_29 = arith.constant dense<0.000000e+00> : vector<8x8xf32>
    %77 = tpu.matmul %75, %76, %cst_29 {dimension_numbers = #tpu.dot_dimension_numbers<[1], [0], [0], [1], [0, 0, 1, 1], [], []>} : vector<8x8xbf16>, vector<8x8xbf16>, vector<8x8xf32> -> vector<8x8xf32>
    %c0_30 = arith.constant 0 : index
    %c8 = arith.constant 8 : index
    %78 = vector.load %arg16[%c0_30, %c8] : memref<8x32xf32, #tpu.memory_space<vmem>>, vector<8x8xf32>
    tpu.vector_store %arg16[%c0_30, %c8], %77 {strides = array<i32>} : memref<8x32xf32, #tpu.memory_space<vmem>>, vector<8x8xf32>,
    %79 = vector.extract_strided_slice %34 {offsets = [0, 16], sizes = [8, 8], strides = [1, 1]} : vector<8x32xbf16> to vector<8x8xbf16>
    %80 = vector.extract_strided_slice %35 {offsets = [0, 16], sizes = [8, 8], strides = [1, 1]} : vector<8x32xbf16> to vector<8x8xbf16>
    "tpu.trace_start"() <{level = 10 : i32, message = "qd,kd->qk"}> : () -> ()
    %cst_31 = arith.constant dense<0.000000e+00> : vector<8x8xf32>
    %81 = tpu.matmul %79, %80, %cst_31 {dimension_numbers = #tpu.dot_dimension_numbers<[1], [1], [0], [0], [0, 0, 1, 0], [], []>} : vector<8x8xbf16>, vector<8x8xbf16>, vector<8x8xf32> -> vector<8x8xf32>
    "tpu.trace_stop"() : () -> ()
    %cst_32 = arith.constant 0.353553385 : f32
    %82 = vector.broadcast %cst_32 : f32 to vector<8x8xf32>
    %83 = arith.mulf %81, %82 : vector<8x8xf32>
    %84 = arith.extf %4 : vector<8x8xbf16> to vector<8x8xf32>
    %85 = arith.addf %83, %84 : vector<8x8xf32>
    %cst_33 = arith.constant dense<0xFF800000> : vector<8xf32>
    %86 = vector.multi_reduction <maximumf>, %85, %cst_33 [1] : vector<8x8xf32> to vector<8xf32>
    %87 = vector.shape_cast %86 : vector<8xf32> to vector<8x1xf32>
    %88 = vector.broadcast %87 : vector<8x1xf32> to vector<8x8xf32>
    %89 = arith.subf %85, %88 : vector<8x8xf32>
    %90 = math.exp %89 : vector<8x8xf32>
    %cst_34 = arith.constant dense<0.000000e+00> : vector<8xf32>
    %91 = vector.multi_reduction <add>, %90, %cst_34 [1] : vector<8x8xf32> to vector<8xf32>
    %92 = vector.shape_cast %91 : vector<8xf32> to vector<8x1xf32>
    %93 = tpu.reciprocal %92 {approx = true} : vector<8x1xf32> -> vector<8x1xf32>
    %94 = vector.broadcast %93 : vector<8x1xf32> to vector<8x8xf32>
    %95 = arith.mulf %90, %94 : vector<8x8xf32>
    %96 = arith.truncf %95 : vector<8x8xf32> to vector<8x8xbf16>
    %97 = vector.extract_strided_slice %36 {offsets = [0, 16], sizes = [8, 8], strides = [1, 1]} : vector<8x32xbf16> to vector<8x8xbf16>
    %cst_35 = arith.constant dense<0.000000e+00> : vector<8x8xf32>
    %98 = tpu.matmul %96, %97, %cst_35 {dimension_numbers = #tpu.dot_dimension_numbers<[1], [0], [0], [1], [0, 0, 1, 1], [], []>} : vector<8x8xbf16>, vector<8x8xbf16>, vector<8x8xf32> -> vector<8x8xf32>
    %c0_36 = arith.constant 0 : index
    %c16 = arith.constant 16 : index
    %99 = vector.load %arg16[%c0_36, %c16] : memref<8x32xf32, #tpu.memory_space<vmem>>, vector<8x8xf32>
    tpu.vector_store %arg16[%c0_36, %c16], %98 {strides = array<i32>} : memref<8x32xf32, #tpu.memory_space<vmem>>, vector<8x8xf32>,
    %100 = vector.extract_strided_slice %34 {offsets = [0, 24], sizes = [8, 8], strides = [1, 1]} : vector<8x32xbf16> to vector<8x8xbf16>
    %101 = vector.extract_strided_slice %35 {offsets = [0, 24], sizes = [8, 8], strides = [1, 1]} : vector<8x32xbf16> to vector<8x8xbf16>
    "tpu.trace_start"() <{level = 10 : i32, message = "qd,kd->qk"}> : () -> ()
    %cst_37 = arith.constant dense<0.000000e+00> : vector<8x8xf32>
    %102 = tpu.matmul %100, %101, %cst_37 {dimension_numbers = #tpu.dot_dimension_numbers<[1], [1], [0], [0], [0, 0, 1, 0], [], []>} : vector<8x8xbf16>, vector<8x8xbf16>, vector<8x8xf32> -> vector<8x8xf32>
    "tpu.trace_stop"() : () -> ()
    %cst_38 = arith.constant 0.353553385 : f32
    %103 = vector.broadcast %cst_38 : f32 to vector<8x8xf32>
    %104 = arith.mulf %102, %103 : vector<8x8xf32>
    %105 = arith.extf %4 : vector<8x8xbf16> to vector<8x8xf32>
    %106 = arith.addf %104, %105 : vector<8x8xf32>
    %cst_39 = arith.constant dense<0xFF800000> : vector<8xf32>
    %107 = vector.multi_reduction <maximumf>, %106, %cst_39 [1] : vector<8x8xf32> to vector<8xf32>
    %108 = vector.shape_cast %107 : vector<8xf32> to vector<8x1xf32>
    %109 = vector.broadcast %108 : vector<8x1xf32> to vector<8x8xf32>
    %110 = arith.subf %106, %109 : vector<8x8xf32>
    %111 = math.exp %110 : vector<8x8xf32>
    %cst_40 = arith.constant dense<0.000000e+00> : vector<8xf32>
    %112 = vector.multi_reduction <add>, %111, %cst_40 [1] : vector<8x8xf32> to vector<8xf32>
    %113 = vector.shape_cast %112 : vector<8xf32> to vector<8x1xf32>
    %114 = tpu.reciprocal %113 {approx = true} : vector<8x1xf32> -> vector<8x1xf32>
    %115 = vector.broadcast %114 : vector<8x1xf32> to vector<8x8xf32>
    %116 = arith.mulf %111, %115 : vector<8x8xf32>
    %117 = arith.truncf %116 : vector<8x8xf32> to vector<8x8xbf16>
    %118 = vector.extract_strided_slice %36 {offsets = [0, 24], sizes = [8, 8], strides = [1, 1]} : vector<8x32xbf16> to vector<8x8xbf16>
    %cst_41 = arith.constant dense<0.000000e+00> : vector<8x8xf32>
    %119 = tpu.matmul %117, %118, %cst_41 {dimension_numbers = #tpu.dot_dimension_numbers<[1], [0], [0], [1], [0, 0, 1, 1], [], []>} : vector<8x8xbf16>, vector<8x8xbf16>, vector<8x8xf32> -> vector<8x8xf32>
    %c0_42 = arith.constant 0 : index
    %c24 = arith.constant 24 : index
    %120 = vector.load %arg16[%c0_42, %c24] : memref<8x32xf32, #tpu.memory_space<vmem>>, vector<8x8xf32>
    tpu.vector_store %arg16[%c0_42, %c24], %119 {strides = array<i32>} : memref<8x32xf32, #tpu.memory_space<vmem>>, vector<8x8xf32>,
    %c0_43 = arith.constant 0 : index
    %c0_44 = arith.constant 0 : index
    %121 = vector.load %arg16[%c0_43, %c0_44] : memref<8x32xf32, #tpu.memory_space<vmem>>, vector<8x32xf32>
    %c0_45 = arith.constant 0 : index
    %c0_46 = arith.constant 0 : index
    %122 = vector.load %arg7[%c0_45, %c0_46] : memref<32x32xbf16, #tpu.memory_space<vmem>>, vector<32x32xbf16>
    %c0_47 = arith.constant 0 : index
    %c0_48 = arith.constant 0 : index
    %123 = vector.load %arg8[%c0_47, %c0_48] : memref<1x32xf32, #tpu.memory_space<vmem>>, vector<1x32xf32>
    %124 = arith.truncf %121 : vector<8x32xf32> to vector<8x32xbf16>
    %cst_49 = arith.constant dense<0.000000e+00> : vector<8x32xf32>
    %125 = tpu.matmul %124, %122, %cst_49 {dimension_numbers = #tpu.dot_dimension_numbers<[1], [0], [0], [1], [0, 0, 1, 1], [], []>} : vector<8x32xbf16>, vector<32x32xbf16>, vector<8x32xf32> -> vector<8x32xf32>
    %126 = vector.broadcast %123 : vector<1x32xf32> to vector<8x32xf32>
    %127 = arith.addf %125, %126 : vector<8x32xf32>
    %128 = arith.addf %2, %127 : vector<8x32xf32>
    %c0_50 = arith.constant 0 : index
    %c0_51 = arith.constant 0 : index
    %129 = vector.load %arg9[%c0_50, %c0_51] : memref<1x32xf32, #tpu.memory_space<vmem>>, vector<1x32xf32>
    %c0_52 = arith.constant 0 : index
    %c0_53 = arith.constant 0 : index
    %130 = vector.load %arg10[%c0_52, %c0_53] : memref<1x32xf32, #tpu.memory_space<vmem>>, vector<1x32xf32>
    %cst_54 = arith.constant dense<0.000000e+00> : vector<8xf32>
    %131 = vector.multi_reduction <add>, %128, %cst_54 [1] : vector<8x32xf32> to vector<8xf32>
    %132 = vector.shape_cast %131 : vector<8xf32> to vector<8x1xf32>
    %cst_55 = arith.constant 3.200000e+01 : f32
    %133 = vector.broadcast %cst_55 : f32 to vector<8x1xf32>
    %134 = arith.divf %132, %133 : vector<8x1xf32>
    %135 = vector.broadcast %134 : vector<8x1xf32> to vector<8x32xf32>
    %136 = arith.subf %128, %135 : vector<8x32xf32>
    %137 = arith.mulf %136, %136 : vector<8x32xf32>
    %cst_56 = arith.constant dense<0.000000e+00> : vector<8xf32>
    %138 = vector.multi_reduction <add>, %137, %cst_56 [1] : vector<8x32xf32> to vector<8xf32>
    %139 = vector.shape_cast %138 : vector<8xf32> to vector<8x1xf32>
    %cst_57 = arith.constant 3.200000e+01 : f32
    %140 = vector.broadcast %cst_57 : f32 to vector<8x1xf32>
    %141 = arith.divf %139, %140 : vector<8x1xf32>
    %cst_58 = arith.constant 9.99999974E-6 : f32
    %142 = vector.broadcast %cst_58 : f32 to vector<8x1xf32>
    %143 = arith.addf %141, %142 : vector<8x1xf32>
    %144 = math.rsqrt %143 : vector<8x1xf32>
    %145 = vector.broadcast %144 : vector<8x1xf32> to vector<8x32xf32>
    %146 = arith.mulf %136, %145 : vector<8x32xf32>
    %147 = vector.broadcast %129 : vector<1x32xf32> to vector<8x32xf32>
    %148 = arith.mulf %146, %147 : vector<8x32xf32>
    %149 = vector.broadcast %130 : vector<1x32xf32> to vector<8x32xf32>
    %150 = arith.addf %148, %149 : vector<8x32xf32>
    %c0_59 = arith.constant 0 : index
    %c0_60 = arith.constant 0 : index
    %151 = vector.load %arg11[%c0_59, %c0_60] : memref<32x128xbf16, #tpu.memory_space<vmem>>, vector<32x128xbf16>
    %c0_61 = arith.constant 0 : index
    %c0_62 = arith.constant 0 : index
    %152 = vector.load %arg12[%c0_61, %c0_62] : memref<1x128xf32, #tpu.memory_space<vmem>>, vector<1x128xf32>
    %153 = arith.truncf %150 : vector<8x32xf32> to vector<8x32xbf16>
    %cst_63 = arith.constant dense<0.000000e+00> : vector<8x128xf32>
    %154 = tpu.matmul %153, %151, %cst_63 {dimension_numbers = #tpu.dot_dimension_numbers<[1], [0], [0], [1], [0, 0, 1, 1], [], []>} : vector<8x32xbf16>, vector<32x128xbf16>, vector<8x128xf32> -> vector<8x128xf32>
    %155 = vector.broadcast %152 : vector<1x128xf32> to vector<8x128xf32>
    %156 = arith.addf %154, %155 : vector<8x128xf32>
    %157 = arith.mulf %156, %156 : vector<8x128xf32>
    %158 = arith.mulf %156, %157 : vector<8x128xf32>
    %cst_64 = arith.constant 4.471500e-02 : f32
    %159 = vector.broadcast %cst_64 : f32 to vector<8x128xf32>
    %160 = arith.mulf %159, %158 : vector<8x128xf32>
    %161 = arith.addf %156, %160 : vector<8x128xf32>
    %cst_65 = arith.constant 0.797884583 : f32
    %162 = vector.broadcast %cst_65 : f32 to vector<8x128xf32>
    %163 = arith.mulf %162, %161 : vector<8x128xf32>
    %164 = math.tanh %163 : vector<8x128xf32>
    %cst_66 = arith.constant 1.000000e+00 : f32
    %165 = vector.broadcast %cst_66 : f32 to vector<8x128xf32>
    %166 = arith.addf %165, %164 : vector<8x128xf32>
    %cst_67 = arith.constant 5.000000e-01 : f32
    %167 = vector.broadcast %cst_67 : f32 to vector<8x128xf32>
    %168 = arith.mulf %167, %166 : vector<8x128xf32>
    %169 = arith.mulf %156, %168 : vector<8x128xf32>
    %c0_68 = arith.constant 0 : index
    %c0_69 = arith.constant 0 : index
    %170 = vector.load %arg13[%c0_68, %c0_69] : memref<128x32xbf16, #tpu.memory_space<vmem>>, vector<128x32xbf16>
    %c0_70 = arith.constant 0 : index
    %c0_71 = arith.constant 0 : index
    %171 = vector.load %arg14[%c0_70, %c0_71] : memref<1x32xf32, #tpu.memory_space<vmem>>, vector<1x32xf32>
    %172 = arith.truncf %169 : vector<8x128xf32> to vector<8x128xbf16>
    %cst_72 = arith.constant dense<0.000000e+00> : vector<8x32xf32>
    %173 = tpu.matmul %172, %170, %cst_72 {dimension_numbers = #tpu.dot_dimension_numbers<[1], [0], [0], [1], [0, 0, 1, 1], [], []>} : vector<8x128xbf16>, vector<128x32xbf16>, vector<8x32xf32> -> vector<8x32xf32>
    %174 = vector.broadcast %171 : vector<1x32xf32> to vector<8x32xf32>
    %175 = arith.addf %173, %174 : vector<8x32xf32>
    %176 = arith.addf %128, %175 : vector<8x32xf32>
    %177 = arith.truncf %176 : vector<8x32xf32> to vector<8x32xbf16>
    %c0_73 = arith.constant 0 : index
    %c0_74 = arith.constant 0 : index
    %c0_75 = arith.constant 0 : index
    %178 = vector.load %arg15[%c0_73, %c0_74, %c0_75] : memref<1x8x32xbf16, #tpu.memory_space<vmem>>, vector<1x8x32xbf16>
    %179 = vector.shape_cast %178 : vector<1x8x32xbf16> to vector<8x32xbf16>
    %180 = vector.shape_cast %177 : vector<8x32xbf16> to vector<1x8x32xbf16>
    tpu.vector_store %arg15[%c0_73, %c0_74, %c0_75], %180 {strides = array<i32>} : memref<1x8x32xbf16, #tpu.memory_space<vmem>>, vector<1x8x32xbf16>,
    return
  }
  func.func @transform_0(%arg0: i32) -> (i32, i32, i32) {
    %c0_i32 = arith.constant 0 : i32
    %c0_i32_0 = arith.constant 0 : i32
    %c0_i32_1 = arith.constant 0 : i32
    return %arg0, %c0_i32, %c0_i32_0 : i32, i32, i32
  }
  func.func @transform_1(%arg0: i32) -> (i32, i32, i32) {
    %c0_i32 = arith.constant 0 : i32
    %c0_i32_0 = arith.constant 0 : i32
    %c0_i32_1 = arith.constant 0 : i32
    return %arg0, %c0_i32, %c0_i32_0 : i32, i32, i32
  }
  func.func @transform_2(%arg0: i32) -> (i32, i32) {
    %c0_i32 = arith.constant 0 : i32
    %c0_i32_0 = arith.constant 0 : i32
    %c0_i32_1 = arith.constant 0 : i32
    return %c0_i32, %c0_i32_0 : i32, i32
  }
  func.func @transform_3(%arg0: i32) -> (i32, i32) {
    %c0_i32 = arith.constant 0 : i32
    %c0_i32_0 = arith.constant 0 : i32
    %c0_i32_1 = arith.constant 0 : i32
    return %c0_i32, %c0_i32_0 : i32, i32
  }
  func.func @transform_4(%arg0: i32) -> (i32, i32) {
    %c0_i32 = arith.constant 0 : i32
    %c0_i32_0 = arith.constant 0 : i32
    %c0_i32_1 = arith.constant 0 : i32
    return %c0_i32, %c0_i32_0 : i32, i32
  }
  func.func @transform_5(%arg0: i32) -> (i32, i32) {
    %c0_i32 = arith.constant 0 : i32
    %c0_i32_0 = arith.constant 0 : i32
    %c0_i32_1 = arith.constant 0 : i32
    return %c0_i32, %c0_i32_0 : i32, i32
  }
  func.func @transform_6(%arg0: i32) -> (i32, i32) {
    %c0_i32 = arith.constant 0 : i32
    %c0_i32_0 = arith.constant 0 : i32
    %c0_i32_1 = arith.constant 0 : i32
    return %c0_i32, %c0_i32_0 : i32, i32
  }
  func.func @transform_7(%arg0: i32) -> (i32, i32) {
    %c0_i32 = arith.constant 0 : i32
    %c0_i32_0 = arith.constant 0 : i32
    %c0_i32_1 = arith.constant 0 : i32
    return %c0_i32, %c0_i32_0 : i32, i32
  }
  func.func @transform_8(%arg0: i32) -> (i32, i32) {
    %c0_i32 = arith.constant 0 : i32
    %c0_i32_0 = arith.constant 0 : i32
    %c0_i32_1 = arith.constant 0 : i32
    return %c0_i32, %c0_i32_0 : i32, i32
  }
  func.func @transform_9(%arg0: i32) -> (i32, i32) {
    %c0_i32 = arith.constant 0 : i32
    %c0_i32_0 = arith.constant 0 : i32
    %c0_i32_1 = arith.constant 0 : i32
    return %c0_i32, %c0_i32_0 : i32, i32
  }
  func.func @transform_10(%arg0: i32) -> (i32, i32) {
    %c0_i32 = arith.constant 0 : i32
    %c0_i32_0 = arith.constant 0 : i32
    %c0_i32_1 = arith.constant 0 : i32
    return %c0_i32, %c0_i32_0 : i32, i32
  }
  func.func @transform_11(%arg0: i32) -> (i32, i32) {
    %c0_i32 = arith.constant 0 : i32
    %c0_i32_0 = arith.constant 0 : i32
    %c0_i32_1 = arith.constant 0 : i32
    return %c0_i32, %c0_i32_0 : i32, i32
  }
  func.func @transform_12(%arg0: i32) -> (i32, i32) {
    %c0_i32 = arith.constant 0 : i32
    %c0_i32_0 = arith.constant 0 : i32
    %c0_i32_1 = arith.constant 0 : i32
    return %c0_i32, %c0_i32_0 : i32, i32
  }
  func.func @transform_13(%arg0: i32) -> (i32, i32) {
    %c0_i32 = arith.constant 0 : i32
    %c0_i32_0 = arith.constant 0 : i32
    %c0_i32_1 = arith.constant 0 : i32
    return %c0_i32, %c0_i32_0 : i32, i32
  }
  func.func @transform_14(%arg0: i32) -> (i32, i32, i32) {
    %c0_i32 = arith.constant 0 : i32
    %c0_i32_0 = arith.constant 0 : i32
    %c0_i32_1 = arith.constant 0 : i32
    return %arg0, %c0_i32, %c0_i32_0 : i32, i32, i32
  }
}

module attributes {stable_mosaic.version = 11 : i64} {
  func.func @_dec_layer_kernel(%arg0: i32, %arg1: memref<1x8x32xbf16, #tpu.memory_space<vmem>>, %arg2: memref<1x8x32xbf16, #tpu.memory_space<vmem>>, %arg3: memref<32x96xbf16, #tpu.memory_space<vmem>>, %arg4: memref<1x96xf32, #tpu.memory_space<vmem>>, %arg5: memref<32x32xbf16, #tpu.memory_space<vmem>>, %arg6: memref<1x32xf32, #tpu.memory_space<vmem>>, %arg7: memref<1x32xf32, #tpu.memory_space<vmem>>, %arg8: memref<1x32xf32, #tpu.memory_space<vmem>>, %arg9: memref<32x32xbf16, #tpu.memory_space<vmem>>, %arg10: memref<1x32xf32, #tpu.memory_space<vmem>>, %arg11: memref<32x64xbf16, #tpu.memory_space<vmem>>, %arg12: memref<1x64xf32, #tpu.memory_space<vmem>>, %arg13: memref<32x32xbf16, #tpu.memory_space<vmem>>, %arg14: memref<1x32xf32, #tpu.memory_space<vmem>>, %arg15: memref<1x32xf32, #tpu.memory_space<vmem>>, %arg16: memref<1x32xf32, #tpu.memory_space<vmem>>, %arg17: memref<32x2048xbf16, #tpu.memory_space<vmem>>, %arg18: memref<1x2048xf32, #tpu.memory_space<vmem>>, %arg19: memref<2048x32xbf16, #tpu.memory_space<vmem>>, %arg20: memref<1x32xf32, #tpu.memory_space<vmem>>, %arg21: memref<1x32xf32, #tpu.memory_space<vmem>>, %arg22: memref<1x32xf32, #tpu.memory_space<vmem>>, %arg23: memref<1x8x32xbf16, #tpu.memory_space<vmem>>, %arg24: memref<8x32xf32, #tpu.memory_space<vmem>>) attributes {dimension_semantics = [#tpu.dimension_semantics<parallel>], iteration_bounds = array<i64: 2>, scalar_prefetch = 0 : i64, scratch_operands = 1 : i64, tpu.core_type = #tpu.core_type<tc>, window_params = [{transform_indices = @transform_0, window_bounds = array<i64: 1, 8, 32>}, {transform_indices = @transform_1, window_bounds = array<i64: 1, 8, 32>}, {pipeline_mode = #tpu.pipeline_mode<synchronous>, transform_indices = @transform_2, window_bounds = array<i64: 32, 96>}, {pipeline_mode = #tpu.pipeline_mode<synchronous>, transform_indices = @transform_3, window_bounds = array<i64: 1, 96>}, {pipeline_mode = #tpu.pipeline_mode<synchronous>, transform_indices = @transform_4, window_bounds = array<i64: 32, 32>}, {pipeline_mode = #tpu.pipeline_mode<synchronous>, transform_indices = @transform_5, window_bounds = array<i64: 1, 32>}, {pipeline_mode = #tpu.pipeline_mode<synchronous>, transform_indices = @transform_6, window_bounds = array<i64: 1, 32>}, {pipeline_mode = #tpu.pipeline_mode<synchronous>, transform_indices = @transform_7, window_bounds = array<i64: 1, 32>}, {pipeline_mode = #tpu.pipeline_mode<synchronous>, transform_indices = @transform_8, window_bounds = array<i64: 32, 32>}, {pipeline_mode = #tpu.pipeline_mode<synchronous>, transform_indices = @transform_9, window_bounds = array<i64: 1, 32>}, {pipeline_mode = #tpu.pipeline_mode<synchronous>, transform_indices = @transform_10, window_bounds = array<i64: 32, 64>}, {pipeline_mode = #tpu.pipeline_mode<synchronous>, transform_indices = @transform_11, window_bounds = array<i64: 1, 64>}, {pipeline_mode = #tpu.pipeline_mode<synchronous>, transform_indices = @transform_12, window_bounds = array<i64: 32, 32>}, {pipeline_mode = #tpu.pipeline_mode<synchronous>, transform_indices = @transform_13, window_bounds = array<i64: 1, 32>}, {pipeline_mode = #tpu.pipeline_mode<synchronous>, transform_indices = @transform_14, window_bounds = array<i64: 1, 32>}, {pipeline_mode = #tpu.pipeline_mode<synchronous>, transform_indices = @transform_15, window_bounds = array<i64: 1, 32>}, {pipeline_mode = #tpu.pipeline_mode<synchronous>, transform_indices = @transform_16, window_bounds = array<i64: 32, 2048>}, {pipeline_mode = #tpu.pipeline_mode<synchronous>, transform_indices = @transform_17, window_bounds = array<i64: 1, 2048>}, {pipeline_mode = #tpu.pipeline_mode<synchronous>, transform_indices = @transform_18, window_bounds = array<i64: 2048, 32>}, {pipeline_mode = #tpu.pipeline_mode<synchronous>, transform_indices = @transform_19, window_bounds = array<i64: 1, 32>}, {pipeline_mode = #tpu.pipeline_mode<synchronous>, transform_indices = @transform_20, window_bounds = array<i64: 1, 32>}, {pipeline_mode = #tpu.pipeline_mode<synchronous>, transform_indices = @transform_21, window_bounds = array<i64: 1, 32>}, {transform_indices = @transform_22, window_bounds = array<i64: 1, 8, 32>}]} {
    %c0 = arith.constant 0 : index
    %c0_0 = arith.constant 0 : index
    %c0_1 = arith.constant 0 : index
    %0 = vector.load %arg1[%c0, %c0_0, %c0_1] : memref<1x8x32xbf16, #tpu.memory_space<vmem>>, vector<1x8x32xbf16>
    %1 = vector.shape_cast %0 : vector<1x8x32xbf16> to vector<8x32xbf16>
    %2 = arith.extf %1 : vector<8x32xbf16> to vector<8x32xf32>
    %c0_2 = arith.constant 0 : index
    %c0_3 = arith.constant 0 : index
    %c0_4 = arith.constant 0 : index
    %3 = vector.load %arg2[%c0_2, %c0_3, %c0_4] : memref<1x8x32xbf16, #tpu.memory_space<vmem>>, vector<1x8x32xbf16>
    %4 = vector.shape_cast %3 : vector<1x8x32xbf16> to vector<8x32xbf16>
    %c0_5 = arith.constant 0 : index
    %c0_6 = arith.constant 0 : index
    %5 = vector.load %arg3[%c0_5, %c0_6] : memref<32x96xbf16, #tpu.memory_space<vmem>>, vector<32x96xbf16>
    %c0_7 = arith.constant 0 : index
    %c0_8 = arith.constant 0 : index
    %6 = vector.load %arg4[%c0_7, %c0_8] : memref<1x96xf32, #tpu.memory_space<vmem>>, vector<1x96xf32>
    %7 = arith.truncf %2 : vector<8x32xf32> to vector<8x32xbf16>
    %cst = arith.constant dense<0.000000e+00> : vector<8x96xf32>
    %8 = tpu.matmul %7, %5, %cst {dimension_numbers = #tpu.dot_dimension_numbers<[1], [0], [0], [1], [0, 0, 1, 1], [], []>} : vector<8x32xbf16>, vector<32x96xbf16>, vector<8x96xf32> -> vector<8x96xf32>
    %9 = vector.broadcast %6 : vector<1x96xf32> to vector<8x96xf32>
    %10 = arith.addf %8, %9 : vector<8x96xf32>
    %11 = arith.truncf %10 : vector<8x96xf32> to vector<8x96xbf16>
    %12 = vector.extract_strided_slice %11 {offsets = [0, 0], sizes = [8, 32], strides = [1, 1]} : vector<8x96xbf16> to vector<8x32xbf16>
    %13 = vector.extract_strided_slice %11 {offsets = [0, 32], sizes = [8, 32], strides = [1, 1]} : vector<8x96xbf16> to vector<8x32xbf16>
    %14 = vector.extract_strided_slice %11 {offsets = [0, 64], sizes = [8, 32], strides = [1, 1]} : vector<8x96xbf16> to vector<8x32xbf16>
    %15 = vector.extract_strided_slice %12 {offsets = [0, 0], sizes = [8, 8], strides = [1, 1]} : vector<8x32xbf16> to vector<8x8xbf16>
    %16 = vector.extract_strided_slice %13 {offsets = [0, 0], sizes = [8, 8], strides = [1, 1]} : vector<8x32xbf16> to vector<8x8xbf16>
    "tpu.trace_start"() <{level = 10 : i32, message = "qd,kd->qk"}> : () -> ()
    %cst_9 = arith.constant dense<0.000000e+00> : vector<8x8xf32>
    %17 = tpu.matmul %15, %16, %cst_9 {dimension_numbers = #tpu.dot_dimension_numbers<[1], [1], [0], [0], [0, 0, 1, 0], [], []>} : vector<8x8xbf16>, vector<8x8xbf16>, vector<8x8xf32> -> vector<8x8xf32>
    "tpu.trace_stop"() : () -> ()
    %cst_10 = arith.constant 0.353553385 : f32
    %18 = vector.broadcast %cst_10 : f32 to vector<8x8xf32>
    %19 = arith.mulf %17, %18 : vector<8x8xf32>
    %cst_11 = arith.constant dense<0xFF800000> : vector<8xf32>
    %20 = vector.multi_reduction <maximumf>, %19, %cst_11 [1] : vector<8x8xf32> to vector<8xf32>
    %21 = vector.shape_cast %20 : vector<8xf32> to vector<8x1xf32>
    %22 = vector.broadcast %21 : vector<8x1xf32> to vector<8x8xf32>
    %23 = arith.subf %19, %22 : vector<8x8xf32>
    %24 = math.exp %23 : vector<8x8xf32>
    %cst_12 = arith.constant dense<0.000000e+00> : vector<8xf32>
    %25 = vector.multi_reduction <add>, %24, %cst_12 [1] : vector<8x8xf32> to vector<8xf32>
    %26 = vector.shape_cast %25 : vector<8xf32> to vector<8x1xf32>
    %27 = tpu.reciprocal %26 {approx = true} : vector<8x1xf32> -> vector<8x1xf32>
    %28 = vector.broadcast %27 : vector<8x1xf32> to vector<8x8xf32>
    %29 = arith.mulf %24, %28 : vector<8x8xf32>
    %30 = arith.truncf %29 : vector<8x8xf32> to vector<8x8xbf16>
    %31 = vector.extract_strided_slice %14 {offsets = [0, 0], sizes = [8, 8], strides = [1, 1]} : vector<8x32xbf16> to vector<8x8xbf16>
    %cst_13 = arith.constant dense<0.000000e+00> : vector<8x8xf32>
    %32 = tpu.matmul %30, %31, %cst_13 {dimension_numbers = #tpu.dot_dimension_numbers<[1], [0], [0], [1], [0, 0, 1, 1], [], []>} : vector<8x8xbf16>, vector<8x8xbf16>, vector<8x8xf32> -> vector<8x8xf32>
    %c0_14 = arith.constant 0 : index
    %c0_15 = arith.constant 0 : index
    %33 = vector.load %arg24[%c0_14, %c0_15] : memref<8x32xf32, #tpu.memory_space<vmem>>, vector<8x8xf32>
    tpu.vector_store %arg24[%c0_14, %c0_15], %32 {strides = array<i32>} : memref<8x32xf32, #tpu.memory_space<vmem>>, vector<8x8xf32>,
    %34 = vector.extract_strided_slice %12 {offsets = [0, 8], sizes = [8, 8], strides = [1, 1]} : vector<8x32xbf16> to vector<8x8xbf16>
    %35 = vector.extract_strided_slice %13 {offsets = [0, 8], sizes = [8, 8], strides = [1, 1]} : vector<8x32xbf16> to vector<8x8xbf16>
    "tpu.trace_start"() <{level = 10 : i32, message = "qd,kd->qk"}> : () -> ()
    %cst_16 = arith.constant dense<0.000000e+00> : vector<8x8xf32>
    %36 = tpu.matmul %34, %35, %cst_16 {dimension_numbers = #tpu.dot_dimension_numbers<[1], [1], [0], [0], [0, 0, 1, 0], [], []>} : vector<8x8xbf16>, vector<8x8xbf16>, vector<8x8xf32> -> vector<8x8xf32>
    "tpu.trace_stop"() : () -> ()
    %cst_17 = arith.constant 0.353553385 : f32
    %37 = vector.broadcast %cst_17 : f32 to vector<8x8xf32>
    %38 = arith.mulf %36, %37 : vector<8x8xf32>
    %cst_18 = arith.constant dense<0xFF800000> : vector<8xf32>
    %39 = vector.multi_reduction <maximumf>, %38, %cst_18 [1] : vector<8x8xf32> to vector<8xf32>
    %40 = vector.shape_cast %39 : vector<8xf32> to vector<8x1xf32>
    %41 = vector.broadcast %40 : vector<8x1xf32> to vector<8x8xf32>
    %42 = arith.subf %38, %41 : vector<8x8xf32>
    %43 = math.exp %42 : vector<8x8xf32>
    %cst_19 = arith.constant dense<0.000000e+00> : vector<8xf32>
    %44 = vector.multi_reduction <add>, %43, %cst_19 [1] : vector<8x8xf32> to vector<8xf32>
    %45 = vector.shape_cast %44 : vector<8xf32> to vector<8x1xf32>
    %46 = tpu.reciprocal %45 {approx = true} : vector<8x1xf32> -> vector<8x1xf32>
    %47 = vector.broadcast %46 : vector<8x1xf32> to vector<8x8xf32>
    %48 = arith.mulf %43, %47 : vector<8x8xf32>
    %49 = arith.truncf %48 : vector<8x8xf32> to vector<8x8xbf16>
    %50 = vector.extract_strided_slice %14 {offsets = [0, 8], sizes = [8, 8], strides = [1, 1]} : vector<8x32xbf16> to vector<8x8xbf16>
    %cst_20 = arith.constant dense<0.000000e+00> : vector<8x8xf32>
    %51 = tpu.matmul %49, %50, %cst_20 {dimension_numbers = #tpu.dot_dimension_numbers<[1], [0], [0], [1], [0, 0, 1, 1], [], []>} : vector<8x8xbf16>, vector<8x8xbf16>, vector<8x8xf32> -> vector<8x8xf32>
    %c0_21 = arith.constant 0 : index
    %c8 = arith.constant 8 : index
    %52 = vector.load %arg24[%c0_21, %c8] : memref<8x32xf32, #tpu.memory_space<vmem>>, vector<8x8xf32>
    tpu.vector_store %arg24[%c0_21, %c8], %51 {strides = array<i32>} : memref<8x32xf32, #tpu.memory_space<vmem>>, vector<8x8xf32>,
    %53 = vector.extract_strided_slice %12 {offsets = [0, 16], sizes = [8, 8], strides = [1, 1]} : vector<8x32xbf16> to vector<8x8xbf16>
    %54 = vector.extract_strided_slice %13 {offsets = [0, 16], sizes = [8, 8], strides = [1, 1]} : vector<8x32xbf16> to vector<8x8xbf16>
    "tpu.trace_start"() <{level = 10 : i32, message = "qd,kd->qk"}> : () -> ()
    %cst_22 = arith.constant dense<0.000000e+00> : vector<8x8xf32>
    %55 = tpu.matmul %53, %54, %cst_22 {dimension_numbers = #tpu.dot_dimension_numbers<[1], [1], [0], [0], [0, 0, 1, 0], [], []>} : vector<8x8xbf16>, vector<8x8xbf16>, vector<8x8xf32> -> vector<8x8xf32>
    "tpu.trace_stop"() : () -> ()
    %cst_23 = arith.constant 0.353553385 : f32
    %56 = vector.broadcast %cst_23 : f32 to vector<8x8xf32>
    %57 = arith.mulf %55, %56 : vector<8x8xf32>
    %cst_24 = arith.constant dense<0xFF800000> : vector<8xf32>
    %58 = vector.multi_reduction <maximumf>, %57, %cst_24 [1] : vector<8x8xf32> to vector<8xf32>
    %59 = vector.shape_cast %58 : vector<8xf32> to vector<8x1xf32>
    %60 = vector.broadcast %59 : vector<8x1xf32> to vector<8x8xf32>
    %61 = arith.subf %57, %60 : vector<8x8xf32>
    %62 = math.exp %61 : vector<8x8xf32>
    %cst_25 = arith.constant dense<0.000000e+00> : vector<8xf32>
    %63 = vector.multi_reduction <add>, %62, %cst_25 [1] : vector<8x8xf32> to vector<8xf32>
    %64 = vector.shape_cast %63 : vector<8xf32> to vector<8x1xf32>
    %65 = tpu.reciprocal %64 {approx = true} : vector<8x1xf32> -> vector<8x1xf32>
    %66 = vector.broadcast %65 : vector<8x1xf32> to vector<8x8xf32>
    %67 = arith.mulf %62, %66 : vector<8x8xf32>
    %68 = arith.truncf %67 : vector<8x8xf32> to vector<8x8xbf16>
    %69 = vector.extract_strided_slice %14 {offsets = [0, 16], sizes = [8, 8], strides = [1, 1]} : vector<8x32xbf16> to vector<8x8xbf16>
    %cst_26 = arith.constant dense<0.000000e+00> : vector<8x8xf32>
    %70 = tpu.matmul %68, %69, %cst_26 {dimension_numbers = #tpu.dot_dimension_numbers<[1], [0], [0], [1], [0, 0, 1, 1], [], []>} : vector<8x8xbf16>, vector<8x8xbf16>, vector<8x8xf32> -> vector<8x8xf32>
    %c0_27 = arith.constant 0 : index
    %c16 = arith.constant 16 : index
    %71 = vector.load %arg24[%c0_27, %c16] : memref<8x32xf32, #tpu.memory_space<vmem>>, vector<8x8xf32>
    tpu.vector_store %arg24[%c0_27, %c16], %70 {strides = array<i32>} : memref<8x32xf32, #tpu.memory_space<vmem>>, vector<8x8xf32>,
    %72 = vector.extract_strided_slice %12 {offsets = [0, 24], sizes = [8, 8], strides = [1, 1]} : vector<8x32xbf16> to vector<8x8xbf16>
    %73 = vector.extract_strided_slice %13 {offsets = [0, 24], sizes = [8, 8], strides = [1, 1]} : vector<8x32xbf16> to vector<8x8xbf16>
    "tpu.trace_start"() <{level = 10 : i32, message = "qd,kd->qk"}> : () -> ()
    %cst_28 = arith.constant dense<0.000000e+00> : vector<8x8xf32>
    %74 = tpu.matmul %72, %73, %cst_28 {dimension_numbers = #tpu.dot_dimension_numbers<[1], [1], [0], [0], [0, 0, 1, 0], [], []>} : vector<8x8xbf16>, vector<8x8xbf16>, vector<8x8xf32> -> vector<8x8xf32>
    "tpu.trace_stop"() : () -> ()
    %cst_29 = arith.constant 0.353553385 : f32
    %75 = vector.broadcast %cst_29 : f32 to vector<8x8xf32>
    %76 = arith.mulf %74, %75 : vector<8x8xf32>
    %cst_30 = arith.constant dense<0xFF800000> : vector<8xf32>
    %77 = vector.multi_reduction <maximumf>, %76, %cst_30 [1] : vector<8x8xf32> to vector<8xf32>
    %78 = vector.shape_cast %77 : vector<8xf32> to vector<8x1xf32>
    %79 = vector.broadcast %78 : vector<8x1xf32> to vector<8x8xf32>
    %80 = arith.subf %76, %79 : vector<8x8xf32>
    %81 = math.exp %80 : vector<8x8xf32>
    %cst_31 = arith.constant dense<0.000000e+00> : vector<8xf32>
    %82 = vector.multi_reduction <add>, %81, %cst_31 [1] : vector<8x8xf32> to vector<8xf32>
    %83 = vector.shape_cast %82 : vector<8xf32> to vector<8x1xf32>
    %84 = tpu.reciprocal %83 {approx = true} : vector<8x1xf32> -> vector<8x1xf32>
    %85 = vector.broadcast %84 : vector<8x1xf32> to vector<8x8xf32>
    %86 = arith.mulf %81, %85 : vector<8x8xf32>
    %87 = arith.truncf %86 : vector<8x8xf32> to vector<8x8xbf16>
    %88 = vector.extract_strided_slice %14 {offsets = [0, 24], sizes = [8, 8], strides = [1, 1]} : vector<8x32xbf16> to vector<8x8xbf16>
    %cst_32 = arith.constant dense<0.000000e+00> : vector<8x8xf32>
    %89 = tpu.matmul %87, %88, %cst_32 {dimension_numbers = #tpu.dot_dimension_numbers<[1], [0], [0], [1], [0, 0, 1, 1], [], []>} : vector<8x8xbf16>, vector<8x8xbf16>, vector<8x8xf32> -> vector<8x8xf32>
    %c0_33 = arith.constant 0 : index
    %c24 = arith.constant 24 : index
    %90 = vector.load %arg24[%c0_33, %c24] : memref<8x32xf32, #tpu.memory_space<vmem>>, vector<8x8xf32>
    tpu.vector_store %arg24[%c0_33, %c24], %89 {strides = array<i32>} : memref<8x32xf32, #tpu.memory_space<vmem>>, vector<8x8xf32>,
    %c0_34 = arith.constant 0 : index
    %c0_35 = arith.constant 0 : index
    %91 = vector.load %arg24[%c0_34, %c0_35] : memref<8x32xf32, #tpu.memory_space<vmem>>, vector<8x32xf32>
    %c0_36 = arith.constant 0 : index
    %c0_37 = arith.constant 0 : index
    %92 = vector.load %arg5[%c0_36, %c0_37] : memref<32x32xbf16, #tpu.memory_space<vmem>>, vector<32x32xbf16>
    %c0_38 = arith.constant 0 : index
    %c0_39 = arith.constant 0 : index
    %93 = vector.load %arg6[%c0_38, %c0_39] : memref<1x32xf32, #tpu.memory_space<vmem>>, vector<1x32xf32>
    %94 = arith.truncf %91 : vector<8x32xf32> to vector<8x32xbf16>
    %cst_40 = arith.constant dense<0.000000e+00> : vector<8x32xf32>
    %95 = tpu.matmul %94, %92, %cst_40 {dimension_numbers = #tpu.dot_dimension_numbers<[1], [0], [0], [1], [0, 0, 1, 1], [], []>} : vector<8x32xbf16>, vector<32x32xbf16>, vector<8x32xf32> -> vector<8x32xf32>
    %96 = vector.broadcast %93 : vector<1x32xf32> to vector<8x32xf32>
    %97 = arith.addf %95, %96 : vector<8x32xf32>
    %98 = arith.addf %2, %97 : vector<8x32xf32>
    %c0_41 = arith.constant 0 : index
    %c0_42 = arith.constant 0 : index
    %99 = vector.load %arg7[%c0_41, %c0_42] : memref<1x32xf32, #tpu.memory_space<vmem>>, vector<1x32xf32>
    %c0_43 = arith.constant 0 : index
    %c0_44 = arith.constant 0 : index
    %100 = vector.load %arg8[%c0_43, %c0_44] : memref<1x32xf32, #tpu.memory_space<vmem>>, vector<1x32xf32>
    %cst_45 = arith.constant dense<0.000000e+00> : vector<8xf32>
    %101 = vector.multi_reduction <add>, %98, %cst_45 [1] : vector<8x32xf32> to vector<8xf32>
    %102 = vector.shape_cast %101 : vector<8xf32> to vector<8x1xf32>
    %cst_46 = arith.constant 3.200000e+01 : f32
    %103 = vector.broadcast %cst_46 : f32 to vector<8x1xf32>
    %104 = arith.divf %102, %103 : vector<8x1xf32>
    %105 = vector.broadcast %104 : vector<8x1xf32> to vector<8x32xf32>
    %106 = arith.subf %98, %105 : vector<8x32xf32>
    %107 = arith.mulf %106, %106 : vector<8x32xf32>
    %cst_47 = arith.constant dense<0.000000e+00> : vector<8xf32>
    %108 = vector.multi_reduction <add>, %107, %cst_47 [1] : vector<8x32xf32> to vector<8xf32>
    %109 = vector.shape_cast %108 : vector<8xf32> to vector<8x1xf32>
    %cst_48 = arith.constant 3.200000e+01 : f32
    %110 = vector.broadcast %cst_48 : f32 to vector<8x1xf32>
    %111 = arith.divf %109, %110 : vector<8x1xf32>
    %cst_49 = arith.constant 9.99999974E-6 : f32
    %112 = vector.broadcast %cst_49 : f32 to vector<8x1xf32>
    %113 = arith.addf %111, %112 : vector<8x1xf32>
    %114 = math.rsqrt %113 : vector<8x1xf32>
    %115 = vector.broadcast %114 : vector<8x1xf32> to vector<8x32xf32>
    %116 = arith.mulf %106, %115 : vector<8x32xf32>
    %117 = vector.broadcast %99 : vector<1x32xf32> to vector<8x32xf32>
    %118 = arith.mulf %116, %117 : vector<8x32xf32>
    %119 = vector.broadcast %100 : vector<1x32xf32> to vector<8x32xf32>
    %120 = arith.addf %118, %119 : vector<8x32xf32>
    %c0_50 = arith.constant 0 : index
    %c0_51 = arith.constant 0 : index
    %121 = vector.load %arg9[%c0_50, %c0_51] : memref<32x32xbf16, #tpu.memory_space<vmem>>, vector<32x32xbf16>
    %c0_52 = arith.constant 0 : index
    %c0_53 = arith.constant 0 : index
    %122 = vector.load %arg10[%c0_52, %c0_53] : memref<1x32xf32, #tpu.memory_space<vmem>>, vector<1x32xf32>
    %123 = arith.truncf %120 : vector<8x32xf32> to vector<8x32xbf16>
    %cst_54 = arith.constant dense<0.000000e+00> : vector<8x32xf32>
    %124 = tpu.matmul %123, %121, %cst_54 {dimension_numbers = #tpu.dot_dimension_numbers<[1], [0], [0], [1], [0, 0, 1, 1], [], []>} : vector<8x32xbf16>, vector<32x32xbf16>, vector<8x32xf32> -> vector<8x32xf32>
    %125 = vector.broadcast %122 : vector<1x32xf32> to vector<8x32xf32>
    %126 = arith.addf %124, %125 : vector<8x32xf32>
    %127 = arith.truncf %126 : vector<8x32xf32> to vector<8x32xbf16>
    %c0_55 = arith.constant 0 : index
    %c0_56 = arith.constant 0 : index
    %128 = vector.load %arg11[%c0_55, %c0_56] : memref<32x64xbf16, #tpu.memory_space<vmem>>, vector<32x64xbf16>
    %c0_57 = arith.constant 0 : index
    %c0_58 = arith.constant 0 : index
    %129 = vector.load %arg12[%c0_57, %c0_58] : memref<1x64xf32, #tpu.memory_space<vmem>>, vector<1x64xf32>
    %cst_59 = arith.constant dense<0.000000e+00> : vector<8x64xf32>
    %130 = tpu.matmul %4, %128, %cst_59 {dimension_numbers = #tpu.dot_dimension_numbers<[1], [0], [0], [1], [0, 0, 1, 1], [], []>} : vector<8x32xbf16>, vector<32x64xbf16>, vector<8x64xf32> -> vector<8x64xf32>
    %131 = vector.broadcast %129 : vector<1x64xf32> to vector<8x64xf32>
    %132 = arith.addf %130, %131 : vector<8x64xf32>
    %133 = arith.truncf %132 : vector<8x64xf32> to vector<8x64xbf16>
    %134 = vector.extract_strided_slice %133 {offsets = [0, 0], sizes = [8, 32], strides = [1, 1]} : vector<8x64xbf16> to vector<8x32xbf16>
    %135 = vector.extract_strided_slice %133 {offsets = [0, 32], sizes = [8, 32], strides = [1, 1]} : vector<8x64xbf16> to vector<8x32xbf16>
    %136 = vector.extract_strided_slice %127 {offsets = [0, 0], sizes = [8, 8], strides = [1, 1]} : vector<8x32xbf16> to vector<8x8xbf16>
    %137 = vector.extract_strided_slice %134 {offsets = [0, 0], sizes = [8, 8], strides = [1, 1]} : vector<8x32xbf16> to vector<8x8xbf16>
    "tpu.trace_start"() <{level = 10 : i32, message = "qd,kd->qk"}> : () -> ()
    %cst_60 = arith.constant dense<0.000000e+00> : vector<8x8xf32>
    %138 = tpu.matmul %136, %137, %cst_60 {dimension_numbers = #tpu.dot_dimension_numbers<[1], [1], [0], [0], [0, 0, 1, 0], [], []>} : vector<8x8xbf16>, vector<8x8xbf16>, vector<8x8xf32> -> vector<8x8xf32>
    "tpu.trace_stop"() : () -> ()
    %cst_61 = arith.constant 0.353553385 : f32
    %139 = vector.broadcast %cst_61 : f32 to vector<8x8xf32>
    %140 = arith.mulf %138, %139 : vector<8x8xf32>
    %cst_62 = arith.constant dense<0xFF800000> : vector<8xf32>
    %141 = vector.multi_reduction <maximumf>, %140, %cst_62 [1] : vector<8x8xf32> to vector<8xf32>
    %142 = vector.shape_cast %141 : vector<8xf32> to vector<8x1xf32>
    %143 = vector.broadcast %142 : vector<8x1xf32> to vector<8x8xf32>
    %144 = arith.subf %140, %143 : vector<8x8xf32>
    %145 = math.exp %144 : vector<8x8xf32>
    %cst_63 = arith.constant dense<0.000000e+00> : vector<8xf32>
    %146 = vector.multi_reduction <add>, %145, %cst_63 [1] : vector<8x8xf32> to vector<8xf32>
    %147 = vector.shape_cast %146 : vector<8xf32> to vector<8x1xf32>
    %148 = tpu.reciprocal %147 {approx = true} : vector<8x1xf32> -> vector<8x1xf32>
    %149 = vector.broadcast %148 : vector<8x1xf32> to vector<8x8xf32>
    %150 = arith.mulf %145, %149 : vector<8x8xf32>
    %151 = arith.truncf %150 : vector<8x8xf32> to vector<8x8xbf16>
    %152 = vector.extract_strided_slice %135 {offsets = [0, 0], sizes = [8, 8], strides = [1, 1]} : vector<8x32xbf16> to vector<8x8xbf16>
    %cst_64 = arith.constant dense<0.000000e+00> : vector<8x8xf32>
    %153 = tpu.matmul %151, %152, %cst_64 {dimension_numbers = #tpu.dot_dimension_numbers<[1], [0], [0], [1], [0, 0, 1, 1], [], []>} : vector<8x8xbf16>, vector<8x8xbf16>, vector<8x8xf32> -> vector<8x8xf32>
    %c0_65 = arith.constant 0 : index
    %c0_66 = arith.constant 0 : index
    %154 = vector.load %arg24[%c0_65, %c0_66] : memref<8x32xf32, #tpu.memory_space<vmem>>, vector<8x8xf32>
    tpu.vector_store %arg24[%c0_65, %c0_66], %153 {strides = array<i32>} : memref<8x32xf32, #tpu.memory_space<vmem>>, vector<8x8xf32>,
    %155 = vector.extract_strided_slice %127 {offsets = [0, 8], sizes = [8, 8], strides = [1, 1]} : vector<8x32xbf16> to vector<8x8xbf16>
    %156 = vector.extract_strided_slice %134 {offsets = [0, 8], sizes = [8, 8], strides = [1, 1]} : vector<8x32xbf16> to vector<8x8xbf16>
    "tpu.trace_start"() <{level = 10 : i32, message = "qd,kd->qk"}> : () -> ()
    %cst_67 = arith.constant dense<0.000000e+00> : vector<8x8xf32>
    %157 = tpu.matmul %155, %156, %cst_67 {dimension_numbers = #tpu.dot_dimension_numbers<[1], [1], [0], [0], [0, 0, 1, 0], [], []>} : vector<8x8xbf16>, vector<8x8xbf16>, vector<8x8xf32> -> vector<8x8xf32>
    "tpu.trace_stop"() : () -> ()
    %cst_68 = arith.constant 0.353553385 : f32
    %158 = vector.broadcast %cst_68 : f32 to vector<8x8xf32>
    %159 = arith.mulf %157, %158 : vector<8x8xf32>
    %cst_69 = arith.constant dense<0xFF800000> : vector<8xf32>
    %160 = vector.multi_reduction <maximumf>, %159, %cst_69 [1] : vector<8x8xf32> to vector<8xf32>
    %161 = vector.shape_cast %160 : vector<8xf32> to vector<8x1xf32>
    %162 = vector.broadcast %161 : vector<8x1xf32> to vector<8x8xf32>
    %163 = arith.subf %159, %162 : vector<8x8xf32>
    %164 = math.exp %163 : vector<8x8xf32>
    %cst_70 = arith.constant dense<0.000000e+00> : vector<8xf32>
    %165 = vector.multi_reduction <add>, %164, %cst_70 [1] : vector<8x8xf32> to vector<8xf32>
    %166 = vector.shape_cast %165 : vector<8xf32> to vector<8x1xf32>
    %167 = tpu.reciprocal %166 {approx = true} : vector<8x1xf32> -> vector<8x1xf32>
    %168 = vector.broadcast %167 : vector<8x1xf32> to vector<8x8xf32>
    %169 = arith.mulf %164, %168 : vector<8x8xf32>
    %170 = arith.truncf %169 : vector<8x8xf32> to vector<8x8xbf16>
    %171 = vector.extract_strided_slice %135 {offsets = [0, 8], sizes = [8, 8], strides = [1, 1]} : vector<8x32xbf16> to vector<8x8xbf16>
    %cst_71 = arith.constant dense<0.000000e+00> : vector<8x8xf32>
    %172 = tpu.matmul %170, %171, %cst_71 {dimension_numbers = #tpu.dot_dimension_numbers<[1], [0], [0], [1], [0, 0, 1, 1], [], []>} : vector<8x8xbf16>, vector<8x8xbf16>, vector<8x8xf32> -> vector<8x8xf32>
    %c0_72 = arith.constant 0 : index
    %c8_73 = arith.constant 8 : index
    %173 = vector.load %arg24[%c0_72, %c8_73] : memref<8x32xf32, #tpu.memory_space<vmem>>, vector<8x8xf32>
    tpu.vector_store %arg24[%c0_72, %c8_73], %172 {strides = array<i32>} : memref<8x32xf32, #tpu.memory_space<vmem>>, vector<8x8xf32>,
    %174 = vector.extract_strided_slice %127 {offsets = [0, 16], sizes = [8, 8], strides = [1, 1]} : vector<8x32xbf16> to vector<8x8xbf16>
    %175 = vector.extract_strided_slice %134 {offsets = [0, 16], sizes = [8, 8], strides = [1, 1]} : vector<8x32xbf16> to vector<8x8xbf16>
    "tpu.trace_start"() <{level = 10 : i32, message = "qd,kd->qk"}> : () -> ()
    %cst_74 = arith.constant dense<0.000000e+00> : vector<8x8xf32>
    %176 = tpu.matmul %174, %175, %cst_74 {dimension_numbers = #tpu.dot_dimension_numbers<[1], [1], [0], [0], [0, 0, 1, 0], [], []>} : vector<8x8xbf16>, vector<8x8xbf16>, vector<8x8xf32> -> vector<8x8xf32>
    "tpu.trace_stop"() : () -> ()
    %cst_75 = arith.constant 0.353553385 : f32
    %177 = vector.broadcast %cst_75 : f32 to vector<8x8xf32>
    %178 = arith.mulf %176, %177 : vector<8x8xf32>
    %cst_76 = arith.constant dense<0xFF800000> : vector<8xf32>
    %179 = vector.multi_reduction <maximumf>, %178, %cst_76 [1] : vector<8x8xf32> to vector<8xf32>
    %180 = vector.shape_cast %179 : vector<8xf32> to vector<8x1xf32>
    %181 = vector.broadcast %180 : vector<8x1xf32> to vector<8x8xf32>
    %182 = arith.subf %178, %181 : vector<8x8xf32>
    %183 = math.exp %182 : vector<8x8xf32>
    %cst_77 = arith.constant dense<0.000000e+00> : vector<8xf32>
    %184 = vector.multi_reduction <add>, %183, %cst_77 [1] : vector<8x8xf32> to vector<8xf32>
    %185 = vector.shape_cast %184 : vector<8xf32> to vector<8x1xf32>
    %186 = tpu.reciprocal %185 {approx = true} : vector<8x1xf32> -> vector<8x1xf32>
    %187 = vector.broadcast %186 : vector<8x1xf32> to vector<8x8xf32>
    %188 = arith.mulf %183, %187 : vector<8x8xf32>
    %189 = arith.truncf %188 : vector<8x8xf32> to vector<8x8xbf16>
    %190 = vector.extract_strided_slice %135 {offsets = [0, 16], sizes = [8, 8], strides = [1, 1]} : vector<8x32xbf16> to vector<8x8xbf16>
    %cst_78 = arith.constant dense<0.000000e+00> : vector<8x8xf32>
    %191 = tpu.matmul %189, %190, %cst_78 {dimension_numbers = #tpu.dot_dimension_numbers<[1], [0], [0], [1], [0, 0, 1, 1], [], []>} : vector<8x8xbf16>, vector<8x8xbf16>, vector<8x8xf32> -> vector<8x8xf32>
    %c0_79 = arith.constant 0 : index
    %c16_80 = arith.constant 16 : index
    %192 = vector.load %arg24[%c0_79, %c16_80] : memref<8x32xf32, #tpu.memory_space<vmem>>, vector<8x8xf32>
    tpu.vector_store %arg24[%c0_79, %c16_80], %191 {strides = array<i32>} : memref<8x32xf32, #tpu.memory_space<vmem>>, vector<8x8xf32>,
    %193 = vector.extract_strided_slice %127 {offsets = [0, 24], sizes = [8, 8], strides = [1, 1]} : vector<8x32xbf16> to vector<8x8xbf16>
    %194 = vector.extract_strided_slice %134 {offsets = [0, 24], sizes = [8, 8], strides = [1, 1]} : vector<8x32xbf16> to vector<8x8xbf16>
    "tpu.trace_start"() <{level = 10 : i32, message = "qd,kd->qk"}> : () -> ()
    %cst_81 = arith.constant dense<0.000000e+00> : vector<8x8xf32>
    %195 = tpu.matmul %193, %194, %cst_81 {dimension_numbers = #tpu.dot_dimension_numbers<[1], [1], [0], [0], [0, 0, 1, 0], [], []>} : vector<8x8xbf16>, vector<8x8xbf16>, vector<8x8xf32> -> vector<8x8xf32>
    "tpu.trace_stop"() : () -> ()
    %cst_82 = arith.constant 0.353553385 : f32
    %196 = vector.broadcast %cst_82 : f32 to vector<8x8xf32>
    %197 = arith.mulf %195, %196 : vector<8x8xf32>
    %cst_83 = arith.constant dense<0xFF800000> : vector<8xf32>
    %198 = vector.multi_reduction <maximumf>, %197, %cst_83 [1] : vector<8x8xf32> to vector<8xf32>
    %199 = vector.shape_cast %198 : vector<8xf32> to vector<8x1xf32>
    %200 = vector.broadcast %199 : vector<8x1xf32> to vector<8x8xf32>
    %201 = arith.subf %197, %200 : vector<8x8xf32>
    %202 = math.exp %201 : vector<8x8xf32>
    %cst_84 = arith.constant dense<0.000000e+00> : vector<8xf32>
    %203 = vector.multi_reduction <add>, %202, %cst_84 [1] : vector<8x8xf32> to vector<8xf32>
    %204 = vector.shape_cast %203 : vector<8xf32> to vector<8x1xf32>
    %205 = tpu.reciprocal %204 {approx = true} : vector<8x1xf32> -> vector<8x1xf32>
    %206 = vector.broadcast %205 : vector<8x1xf32> to vector<8x8xf32>
    %207 = arith.mulf %202, %206 : vector<8x8xf32>
    %208 = arith.truncf %207 : vector<8x8xf32> to vector<8x8xbf16>
    %209 = vector.extract_strided_slice %135 {offsets = [0, 24], sizes = [8, 8], strides = [1, 1]} : vector<8x32xbf16> to vector<8x8xbf16>
    %cst_85 = arith.constant dense<0.000000e+00> : vector<8x8xf32>
    %210 = tpu.matmul %208, %209, %cst_85 {dimension_numbers = #tpu.dot_dimension_numbers<[1], [0], [0], [1], [0, 0, 1, 1], [], []>} : vector<8x8xbf16>, vector<8x8xbf16>, vector<8x8xf32> -> vector<8x8xf32>
    %c0_86 = arith.constant 0 : index
    %c24_87 = arith.constant 24 : index
    %211 = vector.load %arg24[%c0_86, %c24_87] : memref<8x32xf32, #tpu.memory_space<vmem>>, vector<8x8xf32>
    tpu.vector_store %arg24[%c0_86, %c24_87], %210 {strides = array<i32>} : memref<8x32xf32, #tpu.memory_space<vmem>>, vector<8x8xf32>,
    %c0_88 = arith.constant 0 : index
    %c0_89 = arith.constant 0 : index
    %212 = vector.load %arg24[%c0_88, %c0_89] : memref<8x32xf32, #tpu.memory_space<vmem>>, vector<8x32xf32>
    %c0_90 = arith.constant 0 : index
    %c0_91 = arith.constant 0 : index
    %213 = vector.load %arg13[%c0_90, %c0_91] : memref<32x32xbf16, #tpu.memory_space<vmem>>, vector<32x32xbf16>
    %c0_92 = arith.constant 0 : index
    %c0_93 = arith.constant 0 : index
    %214 = vector.load %arg14[%c0_92, %c0_93] : memref<1x32xf32, #tpu.memory_space<vmem>>, vector<1x32xf32>
    %215 = arith.truncf %212 : vector<8x32xf32> to vector<8x32xbf16>
    %cst_94 = arith.constant dense<0.000000e+00> : vector<8x32xf32>
    %216 = tpu.matmul %215, %213, %cst_94 {dimension_numbers = #tpu.dot_dimension_numbers<[1], [0], [0], [1], [0, 0, 1, 1], [], []>} : vector<8x32xbf16>, vector<32x32xbf16>, vector<8x32xf32> -> vector<8x32xf32>
    %217 = vector.broadcast %214 : vector<1x32xf32> to vector<8x32xf32>
    %218 = arith.addf %216, %217 : vector<8x32xf32>
    %219 = arith.addf %120, %218 : vector<8x32xf32>
    %c0_95 = arith.constant 0 : index
    %c0_96 = arith.constant 0 : index
    %220 = vector.load %arg15[%c0_95, %c0_96] : memref<1x32xf32, #tpu.memory_space<vmem>>, vector<1x32xf32>
    %c0_97 = arith.constant 0 : index
    %c0_98 = arith.constant 0 : index
    %221 = vector.load %arg16[%c0_97, %c0_98] : memref<1x32xf32, #tpu.memory_space<vmem>>, vector<1x32xf32>
    %cst_99 = arith.constant dense<0.000000e+00> : vector<8xf32>
    %222 = vector.multi_reduction <add>, %219, %cst_99 [1] : vector<8x32xf32> to vector<8xf32>
    %223 = vector.shape_cast %222 : vector<8xf32> to vector<8x1xf32>
    %cst_100 = arith.constant 3.200000e+01 : f32
    %224 = vector.broadcast %cst_100 : f32 to vector<8x1xf32>
    %225 = arith.divf %223, %224 : vector<8x1xf32>
    %226 = vector.broadcast %225 : vector<8x1xf32> to vector<8x32xf32>
    %227 = arith.subf %219, %226 : vector<8x32xf32>
    %228 = arith.mulf %227, %227 : vector<8x32xf32>
    %cst_101 = arith.constant dense<0.000000e+00> : vector<8xf32>
    %229 = vector.multi_reduction <add>, %228, %cst_101 [1] : vector<8x32xf32> to vector<8xf32>
    %230 = vector.shape_cast %229 : vector<8xf32> to vector<8x1xf32>
    %cst_102 = arith.constant 3.200000e+01 : f32
    %231 = vector.broadcast %cst_102 : f32 to vector<8x1xf32>
    %232 = arith.divf %230, %231 : vector<8x1xf32>
    %cst_103 = arith.constant 9.99999974E-6 : f32
    %233 = vector.broadcast %cst_103 : f32 to vector<8x1xf32>
    %234 = arith.addf %232, %233 : vector<8x1xf32>
    %235 = math.rsqrt %234 : vector<8x1xf32>
    %236 = vector.broadcast %235 : vector<8x1xf32> to vector<8x32xf32>
    %237 = arith.mulf %227, %236 : vector<8x32xf32>
    %238 = vector.broadcast %220 : vector<1x32xf32> to vector<8x32xf32>
    %239 = arith.mulf %237, %238 : vector<8x32xf32>
    %240 = vector.broadcast %221 : vector<1x32xf32> to vector<8x32xf32>
    %241 = arith.addf %239, %240 : vector<8x32xf32>
    %c0_104 = arith.constant 0 : index
    %c0_105 = arith.constant 0 : index
    %242 = vector.load %arg17[%c0_104, %c0_105] : memref<32x2048xbf16, #tpu.memory_space<vmem>>, vector<32x2048xbf16>
    %c0_106 = arith.constant 0 : index
    %c0_107 = arith.constant 0 : index
    %243 = vector.load %arg18[%c0_106, %c0_107] : memref<1x2048xf32, #tpu.memory_space<vmem>>, vector<1x2048xf32>
    %244 = arith.truncf %241 : vector<8x32xf32> to vector<8x32xbf16>
    %cst_108 = arith.constant dense<0.000000e+00> : vector<8x2048xf32>
    %245 = tpu.matmul %244, %242, %cst_108 {dimension_numbers = #tpu.dot_dimension_numbers<[1], [0], [0], [1], [0, 0, 1, 1], [], []>} : vector<8x32xbf16>, vector<32x2048xbf16>, vector<8x2048xf32> -> vector<8x2048xf32>
    %246 = vector.broadcast %243 : vector<1x2048xf32> to vector<8x2048xf32>
    %247 = arith.addf %245, %246 : vector<8x2048xf32>
    %cst_109 = arith.constant 0.000000e+00 : f32
    %248 = vector.broadcast %cst_109 : f32 to vector<8x2048xf32>
    %249 = arith.maximumf %247, %248 : vector<8x2048xf32>
    %c0_110 = arith.constant 0 : index
    %c0_111 = arith.constant 0 : index
    %250 = vector.load %arg19[%c0_110, %c0_111] : memref<2048x32xbf16, #tpu.memory_space<vmem>>, vector<2048x32xbf16>
    %c0_112 = arith.constant 0 : index
    %c0_113 = arith.constant 0 : index
    %251 = vector.load %arg20[%c0_112, %c0_113] : memref<1x32xf32, #tpu.memory_space<vmem>>, vector<1x32xf32>
    %252 = arith.truncf %249 : vector<8x2048xf32> to vector<8x2048xbf16>
    %cst_114 = arith.constant dense<0.000000e+00> : vector<8x32xf32>
    %253 = tpu.matmul %252, %250, %cst_114 {dimension_numbers = #tpu.dot_dimension_numbers<[1], [0], [0], [1], [0, 0, 1, 1], [], []>} : vector<8x2048xbf16>, vector<2048x32xbf16>, vector<8x32xf32> -> vector<8x32xf32>
    %254 = vector.broadcast %251 : vector<1x32xf32> to vector<8x32xf32>
    %255 = arith.addf %253, %254 : vector<8x32xf32>
    %256 = arith.addf %241, %255 : vector<8x32xf32>
    %c0_115 = arith.constant 0 : index
    %c0_116 = arith.constant 0 : index
    %257 = vector.load %arg21[%c0_115, %c0_116] : memref<1x32xf32, #tpu.memory_space<vmem>>, vector<1x32xf32>
    %c0_117 = arith.constant 0 : index
    %c0_118 = arith.constant 0 : index
    %258 = vector.load %arg22[%c0_117, %c0_118] : memref<1x32xf32, #tpu.memory_space<vmem>>, vector<1x32xf32>
    %cst_119 = arith.constant dense<0.000000e+00> : vector<8xf32>
    %259 = vector.multi_reduction <add>, %256, %cst_119 [1] : vector<8x32xf32> to vector<8xf32>
    %260 = vector.shape_cast %259 : vector<8xf32> to vector<8x1xf32>
    %cst_120 = arith.constant 3.200000e+01 : f32
    %261 = vector.broadcast %cst_120 : f32 to vector<8x1xf32>
    %262 = arith.divf %260, %261 : vector<8x1xf32>
    %263 = vector.broadcast %262 : vector<8x1xf32> to vector<8x32xf32>
    %264 = arith.subf %256, %263 : vector<8x32xf32>
    %265 = arith.mulf %264, %264 : vector<8x32xf32>
    %cst_121 = arith.constant dense<0.000000e+00> : vector<8xf32>
    %266 = vector.multi_reduction <add>, %265, %cst_121 [1] : vector<8x32xf32> to vector<8xf32>
    %267 = vector.shape_cast %266 : vector<8xf32> to vector<8x1xf32>
    %cst_122 = arith.constant 3.200000e+01 : f32
    %268 = vector.broadcast %cst_122 : f32 to vector<8x1xf32>
    %269 = arith.divf %267, %268 : vector<8x1xf32>
    %cst_123 = arith.constant 9.99999974E-6 : f32
    %270 = vector.broadcast %cst_123 : f32 to vector<8x1xf32>
    %271 = arith.addf %269, %270 : vector<8x1xf32>
    %272 = math.rsqrt %271 : vector<8x1xf32>
    %273 = vector.broadcast %272 : vector<8x1xf32> to vector<8x32xf32>
    %274 = arith.mulf %264, %273 : vector<8x32xf32>
    %275 = vector.broadcast %257 : vector<1x32xf32> to vector<8x32xf32>
    %276 = arith.mulf %274, %275 : vector<8x32xf32>
    %277 = vector.broadcast %258 : vector<1x32xf32> to vector<8x32xf32>
    %278 = arith.addf %276, %277 : vector<8x32xf32>
    %279 = arith.truncf %278 : vector<8x32xf32> to vector<8x32xbf16>
    %c0_124 = arith.constant 0 : index
    %c0_125 = arith.constant 0 : index
    %c0_126 = arith.constant 0 : index
    %280 = vector.load %arg23[%c0_124, %c0_125, %c0_126] : memref<1x8x32xbf16, #tpu.memory_space<vmem>>, vector<1x8x32xbf16>
    %281 = vector.shape_cast %280 : vector<1x8x32xbf16> to vector<8x32xbf16>
    %282 = vector.shape_cast %279 : vector<8x32xbf16> to vector<1x8x32xbf16>
    tpu.vector_store %arg23[%c0_124, %c0_125, %c0_126], %282 {strides = array<i32>} : memref<1x8x32xbf16, #tpu.memory_space<vmem>>, vector<1x8x32xbf16>,
    return
  }
  func.func @transform_0(%arg0: i32) -> (i32, i32, i32) {
    %c0_i32 = arith.constant 0 : i32
    %c0_i32_0 = arith.constant 0 : i32
    %c0_i32_1 = arith.constant 0 : i32
    return %arg0, %c0_i32, %c0_i32_0 : i32, i32, i32
  }
  func.func @transform_1(%arg0: i32) -> (i32, i32, i32) {
    %c0_i32 = arith.constant 0 : i32
    %c0_i32_0 = arith.constant 0 : i32
    %c0_i32_1 = arith.constant 0 : i32
    return %arg0, %c0_i32, %c0_i32_0 : i32, i32, i32
  }
  func.func @transform_2(%arg0: i32) -> (i32, i32) {
    %c0_i32 = arith.constant 0 : i32
    %c0_i32_0 = arith.constant 0 : i32
    %c0_i32_1 = arith.constant 0 : i32
    return %c0_i32, %c0_i32_0 : i32, i32
  }
  func.func @transform_3(%arg0: i32) -> (i32, i32) {
    %c0_i32 = arith.constant 0 : i32
    %c0_i32_0 = arith.constant 0 : i32
    %c0_i32_1 = arith.constant 0 : i32
    return %c0_i32, %c0_i32_0 : i32, i32
  }
  func.func @transform_4(%arg0: i32) -> (i32, i32) {
    %c0_i32 = arith.constant 0 : i32
    %c0_i32_0 = arith.constant 0 : i32
    %c0_i32_1 = arith.constant 0 : i32
    return %c0_i32, %c0_i32_0 : i32, i32
  }
  func.func @transform_5(%arg0: i32) -> (i32, i32) {
    %c0_i32 = arith.constant 0 : i32
    %c0_i32_0 = arith.constant 0 : i32
    %c0_i32_1 = arith.constant 0 : i32
    return %c0_i32, %c0_i32_0 : i32, i32
  }
  func.func @transform_6(%arg0: i32) -> (i32, i32) {
    %c0_i32 = arith.constant 0 : i32
    %c0_i32_0 = arith.constant 0 : i32
    %c0_i32_1 = arith.constant 0 : i32
    return %c0_i32, %c0_i32_0 : i32, i32
  }
  func.func @transform_7(%arg0: i32) -> (i32, i32) {
    %c0_i32 = arith.constant 0 : i32
    %c0_i32_0 = arith.constant 0 : i32
    %c0_i32_1 = arith.constant 0 : i32
    return %c0_i32, %c0_i32_0 : i32, i32
  }
  func.func @transform_8(%arg0: i32) -> (i32, i32) {
    %c0_i32 = arith.constant 0 : i32
    %c0_i32_0 = arith.constant 0 : i32
    %c0_i32_1 = arith.constant 0 : i32
    return %c0_i32, %c0_i32_0 : i32, i32
  }
  func.func @transform_9(%arg0: i32) -> (i32, i32) {
    %c0_i32 = arith.constant 0 : i32
    %c0_i32_0 = arith.constant 0 : i32
    %c0_i32_1 = arith.constant 0 : i32
    return %c0_i32, %c0_i32_0 : i32, i32
  }
  func.func @transform_10(%arg0: i32) -> (i32, i32) {
    %c0_i32 = arith.constant 0 : i32
    %c0_i32_0 = arith.constant 0 : i32
    %c0_i32_1 = arith.constant 0 : i32
    return %c0_i32, %c0_i32_0 : i32, i32
  }
  func.func @transform_11(%arg0: i32) -> (i32, i32) {
    %c0_i32 = arith.constant 0 : i32
    %c0_i32_0 = arith.constant 0 : i32
    %c0_i32_1 = arith.constant 0 : i32
    return %c0_i32, %c0_i32_0 : i32, i32
  }
  func.func @transform_12(%arg0: i32) -> (i32, i32) {
    %c0_i32 = arith.constant 0 : i32
    %c0_i32_0 = arith.constant 0 : i32
    %c0_i32_1 = arith.constant 0 : i32
    return %c0_i32, %c0_i32_0 : i32, i32
  }
  func.func @transform_13(%arg0: i32) -> (i32, i32) {
    %c0_i32 = arith.constant 0 : i32
    %c0_i32_0 = arith.constant 0 : i32
    %c0_i32_1 = arith.constant 0 : i32
    return %c0_i32, %c0_i32_0 : i32, i32
  }
  func.func @transform_14(%arg0: i32) -> (i32, i32) {
    %c0_i32 = arith.constant 0 : i32
    %c0_i32_0 = arith.constant 0 : i32
    %c0_i32_1 = arith.constant 0 : i32
    return %c0_i32, %c0_i32_0 : i32, i32
  }
  func.func @transform_15(%arg0: i32) -> (i32, i32) {
    %c0_i32 = arith.constant 0 : i32
    %c0_i32_0 = arith.constant 0 : i32
    %c0_i32_1 = arith.constant 0 : i32
    return %c0_i32, %c0_i32_0 : i32, i32
  }
  func.func @transform_16(%arg0: i32) -> (i32, i32) {
    %c0_i32 = arith.constant 0 : i32
    %c0_i32_0 = arith.constant 0 : i32
    %c0_i32_1 = arith.constant 0 : i32
    return %c0_i32, %c0_i32_0 : i32, i32
  }
  func.func @transform_17(%arg0: i32) -> (i32, i32) {
    %c0_i32 = arith.constant 0 : i32
    %c0_i32_0 = arith.constant 0 : i32
    %c0_i32_1 = arith.constant 0 : i32
    return %c0_i32, %c0_i32_0 : i32, i32
  }
  func.func @transform_18(%arg0: i32) -> (i32, i32) {
    %c0_i32 = arith.constant 0 : i32
    %c0_i32_0 = arith.constant 0 : i32
    %c0_i32_1 = arith.constant 0 : i32
    return %c0_i32, %c0_i32_0 : i32, i32
  }
  func.func @transform_19(%arg0: i32) -> (i32, i32) {
    %c0_i32 = arith.constant 0 : i32
    %c0_i32_0 = arith.constant 0 : i32
    %c0_i32_1 = arith.constant 0 : i32
    return %c0_i32, %c0_i32_0 : i32, i32
  }
  func.func @transform_20(%arg0: i32) -> (i32, i32) {
    %c0_i32 = arith.constant 0 : i32
    %c0_i32_0 = arith.constant 0 : i32
    %c0_i32_1 = arith.constant 0 : i32
    return %c0_i32, %c0_i32_0 : i32, i32
  }
  func.func @transform_21(%arg0: i32) -> (i32, i32) {
    %c0_i32 = arith.constant 0 : i32
    %c0_i32_0 = arith.constant 0 : i32
    %c0_i32_1 = arith.constant 0 : i32
    return %c0_i32, %c0_i32_0 : i32, i32
  }
  func.func @transform_22(%arg0: i32) -> (i32, i32, i32) {
    %c0_i32 = arith.constant 0 : i32
    %c0_i32_0 = arith.constant 0 : i32
    %c0_i32_1 = arith.constant 0 : i32
    return %arg0, %c0_i32, %c0_i32_0 : i32, i32, i32
  }
}

module attributes {stable_mosaic.version = 11 : i64} {
  func.func @_matmul_kernel(%arg0: i32, %arg1: i32, %arg2: i32, %arg3: memref<16x32xbf16, #tpu.memory_space<vmem>>, %arg4: memref<32x128xbf16, #tpu.memory_space<vmem>>, %arg5: memref<1x128xf32, #tpu.memory_space<vmem>>, %arg6: memref<16x128xf32, #tpu.memory_space<vmem>>, %arg7: memref<16x128xf32, #tpu.memory_space<vmem>>) attributes {dimension_semantics = [#tpu.dimension_semantics<parallel>, #tpu.dimension_semantics<parallel>, #tpu.dimension_semantics<arbitrary>], iteration_bounds = array<i64: 1, 1, 1>, scalar_prefetch = 0 : i64, scratch_operands = 1 : i64, tpu.core_type = #tpu.core_type<tc>, window_params = [{transform_indices = @transform_0, window_bounds = array<i64: 16, 32>}, {transform_indices = @transform_1, window_bounds = array<i64: 32, 128>}, {transform_indices = @transform_2, window_bounds = array<i64: 1, 128>}, {transform_indices = @transform_3, window_bounds = array<i64: 16, 128>}]} {
    %c0_i32 = arith.constant 0 : i32
    %0 = arith.cmpi eq, %arg2, %c0_i32 : i32
    %1 = arith.extui %0 : i1 to i32
    %c0_i32_0 = arith.constant 0 : i32
    %2 = arith.cmpi ne, %1, %c0_i32_0 : i32
    scf.if %2 {
      %cst_10 = arith.constant 0.000000e+00 : f32
      %12 = vector.broadcast %cst_10 : f32 to vector<16x128xf32>
      %c0_11 = arith.constant 0 : index
      %c0_12 = arith.constant 0 : index
      %13 = vector.load %arg7[%c0_11, %c0_12] : memref<16x128xf32, #tpu.memory_space<vmem>>, vector<16x128xf32>
      tpu.vector_store %arg7[%c0_11, %c0_12], %12 {strides = array<i32>} : memref<16x128xf32, #tpu.memory_space<vmem>>, vector<16x128xf32>,
    } else {
    }
    %c0 = arith.constant 0 : index
    %c0_1 = arith.constant 0 : index
    %3 = vector.load %arg7[%c0, %c0_1] : memref<16x128xf32, #tpu.memory_space<vmem>>, vector<16x128xf32>
    %c0_2 = arith.constant 0 : index
    %c0_3 = arith.constant 0 : index
    %4 = vector.load %arg3[%c0_2, %c0_3] : memref<16x32xbf16, #tpu.memory_space<vmem>>, vector<16x32xbf16>
    %c0_4 = arith.constant 0 : index
    %c0_5 = arith.constant 0 : index
    %5 = vector.load %arg4[%c0_4, %c0_5] : memref<32x128xbf16, #tpu.memory_space<vmem>>, vector<32x128xbf16>
    %cst = arith.constant dense<0.000000e+00> : vector<16x128xf32>
    %6 = tpu.matmul %4, %5, %cst {dimension_numbers = #tpu.dot_dimension_numbers<[1], [0], [0], [1], [0, 0, 1, 1], [], []>} : vector<16x32xbf16>, vector<32x128xbf16>, vector<16x128xf32> -> vector<16x128xf32>
    %7 = arith.addf %3, %6 : vector<16x128xf32>
    %c0_6 = arith.constant 0 : index
    %c0_7 = arith.constant 0 : index
    %8 = vector.load %arg7[%c0_6, %c0_7] : memref<16x128xf32, #tpu.memory_space<vmem>>, vector<16x128xf32>
    tpu.vector_store %arg7[%c0_6, %c0_7], %7 {strides = array<i32>} : memref<16x128xf32, #tpu.memory_space<vmem>>, vector<16x128xf32>,
    %c0_i32_8 = arith.constant 0 : i32
    %9 = arith.cmpi eq, %arg2, %c0_i32_8 : i32
    %10 = arith.extui %9 : i1 to i32
    %c0_i32_9 = arith.constant 0 : i32
    %11 = arith.cmpi ne, %10, %c0_i32_9 : i32
    scf.if %11 {
      %c0_10 = arith.constant 0 : index
      %c0_11 = arith.constant 0 : index
      %12 = vector.load %arg7[%c0_10, %c0_11] : memref<16x128xf32, #tpu.memory_space<vmem>>, vector<16x128xf32>
      %c0_12 = arith.constant 0 : index
      %c0_13 = arith.constant 0 : index
      %13 = vector.load %arg5[%c0_12, %c0_13] : memref<1x128xf32, #tpu.memory_space<vmem>>, vector<1x128xf32>
      %14 = vector.broadcast %13 : vector<1x128xf32> to vector<16x128xf32>
      %15 = arith.addf %12, %14 : vector<16x128xf32>
      %c0_14 = arith.constant 0 : index
      %c0_15 = arith.constant 0 : index
      %16 = vector.load %arg6[%c0_14, %c0_15] : memref<16x128xf32, #tpu.memory_space<vmem>>, vector<16x128xf32>
      tpu.vector_store %arg6[%c0_14, %c0_15], %15 {strides = array<i32>} : memref<16x128xf32, #tpu.memory_space<vmem>>, vector<16x128xf32>,
    } else {
    }
    return
  }
  func.func @transform_0(%arg0: i32, %arg1: i32, %arg2: i32) -> (i32, i32) {
    %c0_i32 = arith.constant 0 : i32
    return %arg0, %arg2 : i32, i32
  }
  func.func @transform_1(%arg0: i32, %arg1: i32, %arg2: i32) -> (i32, i32) {
    %c0_i32 = arith.constant 0 : i32
    return %arg2, %arg1 : i32, i32
  }
  func.func @transform_2(%arg0: i32, %arg1: i32, %arg2: i32) -> (i32, i32) {
    %c0_i32 = arith.constant 0 : i32
    %c0_i32_0 = arith.constant 0 : i32
    return %c0_i32, %arg1 : i32, i32
  }
  func.func @transform_3(%arg0: i32, %arg1: i32, %arg2: i32) -> (i32, i32) {
    %c0_i32 = arith.constant 0 : i32
    return %arg0, %arg1 : i32, i32
  }
}

</mosaic_0001>

<bundles_post_ra>
// kernel: seq2seq_forward.9
= control target key start
LH: loop header
LB: loop body
LE: loop exit
PB: predicated region body
PF: predicated region fallthrough
CT: control target
= control target key end

     0   :  { %v176_v1 = vmov 0.0   ;;  %vm177_vm0 = vmmov 0   ;;  %s225_s0 = inlined_call_operand.vmem [shape: bf16[16,32], index: 0, kind: input, shape index: {}]   ;;  %s226_s1 = inlined_call_operand.vmem [shape: bf16[32,128], index: 1, kind: input, shape index: {}]   ;;  %s227_s2 = inlined_call_operand.vmem [shape: f32[1,128], index: 2, kind: input, shape index: {}]   ;;  %s228_s3 = inlined_call_operand.hbm [shape: f32[16,128], index: 3, kind: output, shape index: {}]  }
   0x1   :  { %v149_v0 = vld [vmem:[%s226_s1] sm:$0xff]   ;;  %136 = vmatprep.subr.bf16.mxu0 %v176_v1  ;;  %v150_v2 = vld [vmem:[%s226_s1 + $0x8] sm:$0xff]   ;;  %140 = vmatprep.mubr.msk.bf16.mxu0 %vm177_vm0, %v176_v1 }
   0x2   :  { %137 = vmatpush3.bf16.msra.mxu0 %v149_v0 }
   0x3   :  { %138 = vmatprep.subr.bf16.mxu0 %v176_v1 }
   0x4   :  { %8 = vsyncpa [#allocation4], 0  ;;  %v151_v3 = vld [vmem:[%s225_s0] sm:$0xff]   ;;  %vm47_vm1 = vcmask 261120   ;;  %s178_s20 = smov [#allocation3]  }
   0x5   :  { %v132_v4 = vld [vmem:[%s227_s2] ss:$0 sm:$0xff]  ;;  %s117_s21 = sshll.u32 %s178_s20, 4  ;;  %s118_s21 = int_to_ptr.vmem [resolvable:$true] %s117_s21 }
   0x6   :  { %139 = vmatpush3.bf16.msra.mxu0 %v150_v2  ;;  %s152_s1 = scalar_lea.vmem %s118_s21, 256  ;;  %p157_p1 = scmp.lt.s32.totalorder %s118_s21, %s118_s21 }
   0x7   :  { %p153_p0 = scmp.ne.s32.totalorder %s118_s21, %s152_s1  ;;  %p158_p2 = scmp.lt.s32.totalorder %s152_s1, %s152_s1 }
   0x9   :  { %141 = vmatmul.mubr.msk.bf16.vlgmr.msra.gmra.mrb[0].mxu0 %vm47_vm1, %v151_v3  ;;  %p159_p3 = por %p158_p2, %p157_p1 }
   0xb   :  { %p160_p4 = pnand %p159_p3, %p153_p0 }
  0xdc   :  { %v85_v5 = vpop.f32.mrb[0].mxu0 }
  0xdd   :  { %v108_v6 = vadd.f32 %v132_v4, %v85_v5  ;;  %v142_v7 = vpop.f32.mrb[1].mxu0 }
  0xde   :  { %v88_v8 = vpop.f32.mrb[2].mxu0 }
  0xdf   :  { %110 = vst [vmem:[#allocation3] sm:$0xff] %v108_v6  ;;  %v109_v9 = vadd.f32 %v132_v4, %v88_v8  ;;  %v143_v10 = vpop.f32.mrb[3].mxu0 }
  0xe1   :  { %111 = vst [vmem:[#allocation3 + $0x8] sm:$0xff] %v109_v9 }
  0xe2   :  { %163 = shalt.err (!%p160_p4)
}
  0xe3   :  { %s164_s22 = scalar_lea.hbm %s228_s3, 256 }
  0xe4   :  { %p165_p5 = scmp.ne.s32.totalorder %s228_s3, %s164_s22  ;;  %p168_p6 = scmp.lt.u32.totalorder %s164_s22, %s228_s3 }
  0xe6   :  { %p170_p7 = pnand %p168_p6, %p165_p5 }
  0xe8   :  { %173 = shalt.err (!%p170_p7)
}
  0xe9   :  { %s179_s27 = smov 128   ;;  %s180_s28 = smov 8  }
  0xea   :  { %123 = dma.vmem_to_hbm [thread:$0]  %s118_s21, 256, %s228_s3, [#allocation4], %s179_s27, %s179_s27, %s180_s28  }
  0xeb   :  { %174 = dma.done.wait [#allocation4], 256  }
  0xec   :  { %175 = vsyncadd [#allocation4], 4294967040 }
  0xed   :  { %127 = vsyncpa [#allocation4], 1 }

// kernel: seq2seq_forward.5
= control target key start
LH: loop header
LB: loop body
LE: loop exit
PB: predicated region body
PF: predicated region fallthrough
CT: control target
= control target key end

     0   :  { %s1735_s29 = smov 0   ;;  %s1928_s0 = inlined_call_operand.vmem [shape: bf16[2,8,32], index: 0, kind: input, shape index: {}]   ;;  %s1929_s1 = inlined_call_operand.vmem [shape: bf16[2,8,8], index: 1, kind: input, shape index: {}]   ;;  %s1930_s2 = inlined_call_operand.vmem [shape: f32[1,32], index: 2, kind: input, shape index: {}]   ;;  %s1931_s3 = inlined_call_operand.vmem [shape: f32[1,32], index: 3, kind: input, shape index: {}]   ;;  %s1932_s4 = inlined_call_operand.vmem [shape: bf16[32,96], index: 4, kind: input, shape index: {}]   ;;  %s1933_s5 = inlined_call_operand.vmem [shape: f32[1,96], index: 5, kind: input, shape index: {}]   ;;  %s1934_s6 = inlined_call_operand.vmem [shape: bf16[32,32], index: 6, kind: input, shape index: {}]   ;;  %s1935_s7 = inlined_call_operand.vmem [shape: f32[1,32], index: 7, kind: input, shape index: {}]   ;;  %s1936_s8 = inlined_call_operand.vmem [shape: f32[1,32], index: 8, kind: input, shape index: {}]   ;;  %s1937_s9 = inlined_call_operand.vmem [shape: f32[1,32], index: 9, kind: input, shape index: {}]   ;;  %s1938_s10 = inlined_call_operand.vmem [shape: bf16[32,128], index: 10, kind: input, shape index: {}]   ;;  %s1939_s11 = inlined_call_operand.vmem [shape: f32[1,128], index: 11, kind: input, shape index: {}]   ;;  %s1940_s12 = inlined_call_operand.vmem [shape: bf16[128,32], index: 12, kind: input, shape index: {}]   ;;  %s1941_s13 = inlined_call_operand.vmem [shape: f32[1,32], index: 13, kind: input, shape index: {}]   ;;  %s1942_s14 = inlined_call_operand.vmem [shape: bf16[2,8,32], index: 14, kind: output, shape index: {}]  }
   0x1 LB: > { %s1407_s30 = sadd.s32 4294967295, %s1642_s29   ;;  %p1411_p0 = scmp.ge.s32.totalorder %s1642_s29, 1  ;;  %s1642_s29 = sphi %s1735_s29, %s24_s29  }
   0x2   : > { %p420_p1 = scmp.lt.s32.totalorder %s1642_s29, 3 }
   0x4   : > { %p421_p2 = pnand %p1411_p0, %p420_p1 }
   0x5   : > { %p468_p3 = scmp.lt.s32.totalorder (!%p421_p2), %s1407_s30, 1  ;;  %vm486_vm0 = vcmask (!%p421_p2), 261120   ;;  %v1600_v8 = vld [vmem:[%s1932_s4] sm:$0xff] (!%p421_p2)   ;;  %v1644_v9 = vmov (!%p421_p2), 0.0   ;;  %vm1645_vm1 = vmmov (!%p421_p2), 0   ;;  %v1601_v10 = vld [vmem:[%s1932_s4 + $0x8] sm:$0xff] (!%p421_p2)  }
   0x6   : > { %424 = sbr.rel (%p421_p2) target bundleno = 2596 (0xa24), region = 76  ;;  %1484 = vmatprep.subr.bf16.mxu0 (!%p421_p2), %v1644_v9  ;;  %1488 = vmatprep.mubr.msk.bf16.mxu0 (!%p421_p2), %vm1645_vm1, %v1644_v9  ;;  %v1415_v15 = vld [vmem:[%s1930_s2] ss:$0 sm:$0xff] (!%p421_p2)  ;;  %s1647_s16 = smov (!%p421_p2), 96   ;;  %vm586_vm2 = vcmask (!%p421_p2), 64512   ;;  %vm653_vm3 = vcmask (!%p421_p2), 1043456  }
   0x7   : > { %1485 = vmatpush3.bf16.msra.mxu0 (!%p421_p2), %v1600_v8  ;;  %1504 = vmatprep.subr.bf16.mxu1 (!%p421_p2), %v1644_v9  ;;  %v1416_v17 = vld [vmem:[%s1931_s3] ss:$0 sm:$0xff] (!%p421_p2)  ;;  %s1648_s17 = smov (!%p421_p2), 88   ;;  %s1650_s19 = smov (!%p421_p2), 112   ;;  %vm814_vm4 = vcmask (!%p421_p2), 130112   ;;  %vm932_vm5 = vcmask (!%p421_p2), 195712  }
   0x8   : > { %1486 = vmatprep.subr.bf16.mxu0 (!%p421_p2), %v1644_v9  ;;  %1506 = vmatprep.mubr.msk.bf16.mxu1 (!%p421_p2), %vm1645_vm1, %v1644_v9  ;;  %v1417_v21 = vld [vmem:[%s1933_s5] ss:$0 sm:$0xff] (!%p421_p2)  ;;  %s1651_s20 = smov (!%p421_p2), 72   ;;  %s1652_s21 = smov (!%p421_p2), 104   ;;  %vm1050_vm6 = vcmask (!%p421_p2), 261312   ;;  %vm1340_vm7 = vcmask (!%p421_p2), 257024  }
   0x9   : > { %s1653_s25 = smov (!%p421_p2), 64   ;;  %s1654_s26 = smov (!%p421_p2), 56  }
   0xa   : > { %s1655_s27 = smov (!%p421_p2), 48   ;;  %s1656_s28 = smov (!%p421_p2), 40  }
   0xb   : > { %1487 = vmatpush3.bf16.msra.mxu0 (!%p421_p2), %v1601_v10 }
   0xc   : > { %1492 = vmatprep.subr.bf16.mxu0 (!%p421_p2), %v1644_v9 }
   0xd   : > { %s1944_s30 = smov (!%p468_p3, %s1407_s30), 1 }
   0xe   : > { %s1743_s15 = sshll.u32 %s1944_s30, 2  ;;  %s1646_s30 = smov 120  }
   0xf   : > { %s471_s18 = scalar_lea.vmem %s1928_s0, %s1743_s15  ;;  %s475_s24 = scalar_lea.vmem %s1929_s1, %s1743_s15 }
  0x10   : > { %v481_v0 = vld [vmem:[%s471_s18] sm:$0xf]  ;;  %s1649_s18 = smov 80  }
  0x11   : > { %v1749_v1 = vunpack.c.l.bf16 %v481_v0  ;;  %v483_v39 = vld [vmem:[%s475_s24] sm:$0xf] }
  0x12   : > { %v634_v40 = vunpack.c.l.bf16 %v483_v39 }
  0x13   : > { %v487_v2 = vsel %vm486_vm0, %v1749_v1, 0.0 }
  0x14   : > { %488 = vadd.xlane.f32.xlu0 %v487_v2 }
  0xa1   : > { %v489_v3 = vpop.xlane.xlu0 %488 }
  0xa2   : > { %v491_v4 = vmul.f32 0.03125, %v489_v3 }
  0xa4   : > { %v492_v5 = vsub.f32 %v1749_v1, %v491_v4 }
  0xa6   : > { %v493_v6 = vmul.f32 %v492_v5, %v492_v5 }
  0xa8   : > { %v494_v7 = vsel %vm486_vm0, %v493_v6, 0.0 }
  0xa9   : > { %495 = vadd.xlane.f32.xlu0 %v494_v7 }
 0x136   : > { %v496_v11 = vpop.xlane.xlu0 %495 }
 0x137   : > { %v497_v12 = vmul.f32 0.03125, %v496_v11 }
 0x139   : > { %v498_v13 = vadd.f32 1e-05, %v497_v12 }
 0x13b   : > { %1614 = vrsqrt.f32 %v498_v13 }
 0x145   : > { %v1615_v14 = vpop.eup %1614 }
 0x146   : > { %v500_v16 = vmul.f32 %v1615_v14, %v492_v5 }
 0x148   : > { %v507_v18 = vmul.f32 %v1415_v15, %v500_v16 }
 0x14a   : > { %v514_v19 = vadd.f32 %v1416_v17, %v507_v18 }
 0x14c   : > { %v520_v20 = vpack.c.bf16 %v514_v19, %v514_v19 }
 0x14e   : > { %1489 = vmatmul.mubr.msk.bf16.vlgmr.msra.gmra.mrb[0].mxu0 %vm486_vm0, %v520_v20 }
 0x14f   : > { %1494 = vmatprep.mubr.msk.bf16.mxu0 %vm1645_vm1, %v1644_v9 }
 0x221   : > { %v576_v22 = vpop.f32.mrb[0].mxu0 }
 0x222   : > { %v577_v23 = vadd.f32 %v1417_v21, %v576_v22  ;;  %v1490_v24 = vpop.f32.mrb[1].mxu0 }
 0x223   : > { %v579_v25 = vpop.f32.mrb[2].mxu0 }
 0x224   : > { %v1781_v26 = vpack.c.bf16 %v577_v23, %v577_v23  ;;  %v1491_v27 = vpop.f32.mrb[3].mxu0 }
 0x226   : > { %698 = vrot.lane.b32.xlu0 %v1781_v26, %s1646_s30  ;;  %584 = vrot.lane.b32.xlu1 %v1781_v26, %s1647_s16  ;;  %s1657_s30 = smov 8  }
 0x22a   : > { %700 = vrot.lane.b32.xlu1 %v1781_v26, %s1648_s17 }
 0x22e   : > { %818 = vrot.lane.b32.xlu1 %v1781_v26, %s1649_s18 }
 0x232   : > { %816 = vrot.lane.b32.xlu1 %v1781_v26, %s1650_s19 }
 0x236   : > { %936 = vrot.lane.b32.xlu1 %v1781_v26, %s1651_s20  ;;  %s1658_s20 = smov 16  }
 0x23a   : > { %934 = vrot.lane.b32.xlu1 %v1781_v26, %s1652_s21  ;;  %s1659_s21 = smov 24  }
 0x298   : > { %v585_v28 = vpop.permute.xlu1 %584  ;;  %v699_v33 = vpop.permute.xlu0 %698 }
 0x299   : > { %v591_v29 = vsel %vm586_vm2, %v585_v28, 0 }
 0x29a   : > { %1493 = vmatpush3.bf16.xpose.msra.mxu0 %v591_v29 }
 0x29b   : > { %1498 = vmatprep.subr.bf16.mxu0 %v1644_v9 }
 0x29c   : > { %v701_v30 = vpop.permute.xlu1 %700 }
 0x29d   : > { %v706_v31 = vsel %vm586_vm2, %v701_v30, 0 }
 0x29e   : > { %1505 = vmatpush3.bf16.xpose.msra.mxu1 %v706_v31 }
 0x29f   : > { %1516 = vmatprep.subr.bf16.mxu1 %v1644_v9 }
 0x2a0   : > { %v819_v32 = vpop.permute.xlu1 %818 }
 0x2a1   : > { %1495 = vmatmul.mubr.msk.bf16.vlgmr.msra.gmra.mrb[4].mxu0 %vm586_vm2, %v1781_v26  ;;  %v824_v35 = vsel %vm586_vm2, %v819_v32, 0 }
 0x2a2   : > { %1500 = vmatprep.mubr.msk.bf16.mxu0 %vm1645_vm1, %v1644_v9 }
 0x2a4   : > { %v817_v34 = vpop.permute.xlu1 %816 }
 0x2a5   : > { %1507 = vmatmul.mubr.msk.bf16.vlgmr.msra.gmra.mrb[0].mxu1 %vm586_vm2, %v699_v33 }
 0x2a6   : > { %1517 = vmatpush3.bf16.xpose.msra.mxu1 %v824_v35  ;;  %1518 = vmatprep.mubr.msk.bf16.mxu1 %vm1645_vm1, %v1644_v9 }
 0x2a7   : > { %1528 = vmatprep.subr.bf16.mxu1 %v1644_v9 }
 0x2a8   : > { %v937_v36 = vpop.permute.xlu1 %936 }
 0x2a9   : > { %v942_v37 = vsel %vm586_vm2, %v937_v36, 0 }
 0x2ac   : > { %v935_v38 = vpop.permute.xlu1 %934 }
 0x2ad   : > { %1519 = vmatmul.mubr.msk.bf16.vlgmr.msra.gmra.mrb[4].mxu1 %vm586_vm2, %v817_v34 }
 0x2ae   : > { %1529 = vmatpush3.bf16.xpose.msra.mxu1 %v942_v37  ;;  %1530 = vmatprep.mubr.msk.bf16.mxu1 %vm1645_vm1, %v1644_v9 }
 0x2af   : > { %1540 = vmatprep.subr.bf16.mxu1 %v1644_v9 }
 0x2b5   : > { %1531 = vmatmul.mubr.msk.bf16.vlgmr.msra.gmra.mrb[8].mxu1 %vm586_vm2, %v935_v38 }
 0x2b6   : > { %1544 = vmatprep.mubr.msk.bf16.mxu1 %vm1645_vm1, %v1644_v9 }
 0x374   : > { %v627_v41 = vpop.f32.mrb[4].mxu0 }
 0x375   : > { %v633_v42 = vmul.f32 0.35355338, %v627_v41  ;;  %v1496_v43 = vpop.f32.mrb[5].mxu0 }
 0x376   : > { %v630_v44 = vpop.f32.mrb[6].mxu0 }
 0x377   : > { %v1497_v45 = vpop.f32.mrb[7].mxu0  ;;  %v635_v46 = vadd.f32 %v634_v40, %v633_v42 }
 0x378   : > { %v742_v47 = vpop.f32.mrb[0].mxu1 }
 0x379   : > { %v748_v48 = vmul.f32 0.35355338, %v742_v47  ;;  %v1508_v49 = vpop.f32.mrb[1].mxu1  ;;  %v636_v50 = vsel %vm586_vm2, %v635_v46, -inf }
 0x37a   : > { %v745_v51 = vpop.f32.mrb[2].mxu1  ;;  %637 = vmax.xlane.f32.xlu1 %v636_v50 }
 0x37b   : > { %v1509_v52 = vpop.f32.mrb[3].mxu1  ;;  %v749_v53 = vadd.f32 %v748_v48, %v634_v40 }
 0x37d   : > { %v750_v54 = vsel %vm586_vm2, %v749_v53, -inf }
 0x37e   : > { %751 = vmax.xlane.f32.xlu0 %v750_v54 }
 0x380   : > { %v860_v55 = vpop.f32.mrb[4].mxu1 }
 0x381   : > { %v866_v56 = vmul.f32 0.35355338, %v860_v55  ;;  %v1520_v57 = vpop.f32.mrb[5].mxu1 }
 0x382   : > { %v863_v58 = vpop.f32.mrb[6].mxu1 }
 0x383   : > { %v1521_v59 = vpop.f32.mrb[7].mxu1  ;;  %v867_v60 = vadd.f32 %v866_v56, %v634_v40 }
 0x384   : > { %v1602_v59 = vld [vmem:[%s1934_s6] sm:$0xff]  }
 0x385   : > { %v868_v61 = vsel %vm586_vm2, %v867_v60, -inf  ;;  %1541 = vmatpush3.bf16.msra.mxu1 %v1602_v59  ;;  %v1439_v59 = vld [vmem:[%s1941_s13] ss:$0 sm:$0xff] }
 0x386   : > { %869 = vmax.xlane.f32.xlu1 %v868_v61  ;;  %1542 = vmatprep.subr.bf16.mxu1 %v1644_v9 }
 0x388   : > { %v978_v62 = vpop.f32.mrb[8].mxu1 }
 0x389   : > { %v984_v63 = vmul.f32 0.35355338, %v978_v62  ;;  %v1532_v0 = vpop.f32.mrb[9].mxu1 }
 0x38a   : > { %v981_v2 = vpop.f32.mrb[10].mxu1 }
 0x38b   : > { %v1533_v3 = vpop.f32.mrb[11].mxu1  ;;  %v985_v4 = vadd.f32 %v984_v63, %v634_v40 }
 0x38d   : > { %v986_v5 = vsel %vm586_vm2, %v985_v4, -inf }
 0x38e   : > { %987 = vmax.xlane.f32.xlu0 %v986_v5 }
 0x407   : > { %v638_v6 = vpop.xlane.xlu1 %637 }
 0x408   : > { %v639_v7 = vsub.f32 %v635_v46, %v638_v6 }
 0x40a   : > { %v640_v8 = vmul.f32 1.442695, %v639_v7 }
 0x40b   : > { %v752_v10 = vpop.xlane.xlu0 %751 }
 0x40c   : > { %1616 = vpow2.f32 %v640_v8  ;;  %v753_v11 = vsub.f32 %v749_v53, %v752_v10 }
 0x40e   : > { %v754_v12 = vmul.f32 1.442695, %v753_v11 }
 0x410   : > { %1618 = vpow2.f32 %v754_v12  ;;  %v1429_v12 = vld [vmem:[%s1935_s7] ss:$0 sm:$0xff] }
 0x413   : > { %v870_v22 = vpop.xlane.xlu1 %869 }
 0x414   : > { %v871_v23 = vsub.f32 %v867_v60, %v870_v22  ;;  %v1603_v60 = vld [vmem:[%s1934_s6 + $0x8] sm:$0xff]  }
 0x415   : > { %1543 = vmatpush3.bf16.msra.mxu1 %v1603_v60 }
 0x416   : > { %v1617_v13 = vpop.eup %1616  ;;  %v872_v24 = vmul.f32 1.442695, %v871_v23  ;;  %1556 = vmatprep.subr.bf16.mxu1 %v1644_v9 }
 0x417   : > { %v642_v14 = vsel %vm586_vm2, %v1617_v13, 0.0 }
 0x418   : > { %643 = vadd.xlane.f32.xlu1 %v642_v14 }
 0x41a   : > { %v1619_v15 = vpop.eup %1618 }
 0x41b   : > { %v988_v16 = vpop.xlane.xlu0 %987  ;;  %v756_v17 = vsel %vm586_vm2, %v1619_v15, 0.0 }
 0x41c   : > { %v989_v18 = vsub.f32 %v985_v4, %v988_v16  ;;  %757 = vadd.xlane.f32.xlu0 %v756_v17 }
 0x41e   : > { %v990_v19 = vmul.f32 1.442695, %v989_v18 }
 0x420   : > { %1620 = vpow2.f32 %v990_v19 }
 0x421   : > { %1622 = vpow2.f32 %v872_v24 }
 0x429   : > { %648 = vrot.lane.b32.xlu1 %v1781_v26, %s1653_s25 }
 0x42a   : > { %v1621_v20 = vpop.eup %1620 }
 0x42b   : > { %v992_v21 = vsel %vm586_vm2, %v1621_v20, 0.0  ;;  %v1623_v25 = vpop.eup %1622 }
 0x42c   : > { %993 = vadd.xlane.f32.xlu0 %v992_v21  ;;  %v874_v27 = vsel %vm586_vm2, %v1623_v25, 0.0 }
 0x442   : > { %762 = vrot.lane.b32.xlu0 %v1781_v26, %s1654_s26  ;;  %s479_s26 = scalar_lea.vmem %s1942_s14, %s1743_s15 }
 0x44d   : > { %875 = vadd.xlane.f32.xlu1 %v874_v27 }
 0x45e   : > { %880 = vrot.lane.b32.xlu1 %v1781_v26, %s1655_s27 }
 0x462   : > { %998 = vrot.lane.b32.xlu1 %v1781_v26, %s1656_s28 }
 0x4a5   : > { %v644_v28 = vpop.xlane.xlu1 %643 }
 0x4a6   : > { %1624 = vrcp.f32 %v644_v28 }
 0x4a9   : > { %v649_v29 = vpop.permute.xlu1 %648  ;;  %v758_v31 = vpop.xlane.xlu0 %757 }
 0x4aa   : > { %v655_v30 = vsel %vm653_vm3, %v649_v29, 0  ;;  %1626 = vrcp.f32 %v758_v31  ;;  %v1433_v31 = vld [vmem:[%s1936_s8] ss:$0 sm:$0xff] }
 0x4ab   : > { %1499 = vmatpush3.bf16.msra.mxu0 %v655_v30 }
 0x4ac   : > { %1510 = vmatprep.subr.bf16.mxu0 %v1644_v9 }
 0x4b0   : > { %v1625_v32 = vpop.eup %1624 }
 0x4b1   : > { %v646_v33 = vmul.f32 %v1625_v32, %v1617_v13 }
 0x4b3   : > { %v647_v34 = vpack.c.bf16 %v646_v33, %v646_v33  ;;  %v1434_v33 = vld [vmem:[%s1937_s9] ss:$0 sm:$0xff] }
 0x4b4   : > { %v1627_v26 = vpop.eup %1626 }
 0x4b5   : > { %1501 = vmatmul.mubr.msk.bf16.vlgmr.msra.gmra.mrb[8].mxu0 %vm586_vm2, %v647_v34  ;;  %v760_v36 = vmul.f32 %v1627_v26, %v1619_v15 }
 0x4b6   : > { %1512 = vmatprep.mubr.msk.bf16.mxu0 %vm1645_vm1, %v1644_v9 }
 0x4b7   : > { %v761_v39 = vpack.c.bf16 %v760_v36, %v760_v36  ;;  %v1606_v36 = vld [vmem:[%s1940_s12] sm:$0xff]  }
 0x4b9   : > { %v994_v35 = vpop.xlane.xlu0 %993 }
 0x4bd   : > { %v763_v37 = vpop.permute.xlu0 %762 }
 0x4be   : > { %v768_v38 = vsel %vm653_vm3, %v763_v37, 0  ;;  %v1607_v37 = vld [vmem:[%s1940_s12 + $0x8] sm:$0xff]  }
 0x4bf   : > { %1511 = vmatpush3.bf16.msra.mxu0 %v768_v38  ;;  %v1608_v38 = vld [vmem:[%s1940_s12 + $0x10] sm:$0xff]  }
 0x4c0   : > { %1522 = vmatprep.subr.bf16.mxu0 %v1644_v9 }
 0x4c2   : > { %1513 = vmatmul.mubr.msk.bf16.vlgmr.msra.gmra.mrb[12].mxu0 %vm586_vm2, %v761_v39  ;;  %v1609_v39 = vld [vmem:[%s1940_s12 + $0x18] sm:$0xff]  }
 0x4c3   : > { %1524 = vmatprep.mubr.msk.bf16.mxu0 %vm1645_vm1, %v1644_v9 }
 0x4da   : > { %v876_v40 = vpop.xlane.xlu1 %875 }
 0x4db   : > { %1628 = vrcp.f32 %v876_v40  ;;  %v1610_v40 = vld [vmem:[%s1940_s12 + $0x20] sm:$0xff]  }
 0x4dc   : > { %1630 = vrcp.f32 %v994_v35 }
 0x4de   : > { %v881_v41 = vpop.permute.xlu1 %880 }
 0x4df   : > { %v886_v42 = vsel %vm653_vm3, %v881_v41, 0  ;;  %v1611_v41 = vld [vmem:[%s1940_s12 + $0x28] sm:$0xff]  }
 0x4e0   : > { %1523 = vmatpush3.bf16.msra.mxu0 %v886_v42  ;;  %v1612_v42 = vld [vmem:[%s1940_s12 + $0x30] sm:$0xff]  }
 0x4e1   : > { %1534 = vmatprep.subr.bf16.mxu0 %v1644_v9 }
 0x4e2   : > { %v999_v45 = vpop.permute.xlu1 %998 }
 0x4e3   : > { %v1004_v48 = vsel %vm653_vm3, %v999_v45, 0 }
 0x4e5   : > { %v1629_v43 = vpop.eup %1628 }
 0x4e6   : > { %v878_v44 = vmul.f32 %v1629_v43, %v1623_v25  ;;  %v1631_v47 = vpop.eup %1630  ;;  %v1604_v25 = vld [vmem:[%s1938_s10] sm:$0xff]   ;;  %v1613_v43 = vld [vmem:[%s1940_s12 + $0x38] sm:$0xff]  }
 0x4e7   : > { %v996_v49 = vmul.f32 %v1631_v47, %v1621_v20 }
 0x4e8   : > { %v879_v46 = vpack.c.bf16 %v878_v44, %v878_v44  ;;  %v1435_v44 = vld [vmem:[%s1939_s11] ss:$0 sm:$0xff] }
 0x4e9   : > { %v997_v50 = vpack.c.bf16 %v996_v49, %v996_v49 }
 0x4ea   : > { %1525 = vmatmul.mubr.msk.bf16.vlgmr.msra.gmra.mrb[16].mxu0 %vm586_vm2, %v879_v46 }
 0x4eb   : > { %1535 = vmatpush3.bf16.msra.mxu0 %v1004_v48  ;;  %1536 = vmatprep.mubr.msk.bf16.mxu0 %vm1645_vm1, %v1644_v9 }
 0x4ec   : > { %1548 = vmatprep.subr.bf16.mxu0 %v1644_v9 }
 0x4f2   : > { %1537 = vmatmul.mubr.msk.bf16.vlgmr.msra.gmra.mrb[20].mxu0 %vm586_vm2, %v997_v50 }
 0x4f3   : > { %1552 = vmatprep.mubr.msk.bf16.mxu0 %vm1645_vm1, %v1644_v9  ;;  %1549 = vmatpush3.bf16.msra.mxu0 %v1604_v25 }
 0x4f4   : > { %1550 = vmatprep.subr.bf16.mxu0 %v1644_v9 }
 0x588   : > { %v691_v51 = vpop.f32.mrb[8].mxu0 }
 0x589   : > { %697 = vst.msk [vmem:[#allocation2] sm:$0xff] %vm586_vm2, %v691_v51  ;;  %v1502_v52 = vpop.f32.mrb[9].mxu0 }
 0x58a   : > { %v694_v53 = vpop.f32.mrb[10].mxu0 }
 0x58b   : > { %v1503_v54 = vpop.f32.mrb[11].mxu0 }
 0x595   : > { %v804_v55 = vpop.f32.mrb[12].mxu0 }
 0x596   : > { %811 = vrot.lane.b32.xlu0 %v804_v55, %s1657_s30  ;;  %v1514_v56 = vpop.f32.mrb[13].mxu0 }
 0x597   : > { %v807_v57 = vpop.f32.mrb[14].mxu0 }
 0x598   : > { %v1515_v58 = vpop.f32.mrb[15].mxu0 }
 0x5bd   : > { %v922_v61 = vpop.f32.mrb[16].mxu0 }
 0x5be   : > { %929 = vrot.lane.b32.xlu1 %v922_v61, %s1658_s20  ;;  %v1526_v62 = vpop.f32.mrb[17].mxu0 }
 0x5bf   : > { %v925_v63 = vpop.f32.mrb[18].mxu0 }
 0x5c0   : > { %v1527_v0 = vpop.f32.mrb[19].mxu0 }
 0x5c5   : > { %v1040_v2 = vpop.f32.mrb[20].mxu0 }
 0x5c6   : > { %1047 = vrot.lane.b32.xlu0 %v1040_v2, %s1659_s21  ;;  %v1538_v3 = vpop.f32.mrb[21].mxu0 }
 0x5c7   : > { %v1043_v4 = vpop.f32.mrb[22].mxu0 }
 0x5c8   : > { %v1539_v5 = vpop.f32.mrb[23].mxu0 }
 0x608   : > { %v812_v6 = vpop.permute.xlu0 %811 }
 0x609   : > { %815 = vst.msk [vmem:[#allocation2] sm:$0xff] %vm814_vm4, %v812_v6 }
 0x630   : > { %v930_v7 = vpop.permute.xlu1 %929 }
 0x631   : > { %933 = vst.msk [vmem:[#allocation2] sm:$0xff] %vm932_vm5, %v930_v7 }
 0x638   : > { %v1048_v8 = vpop.permute.xlu0 %1047 }
 0x639   : > { %1051 = vst.msk [vmem:[#allocation2] sm:$0xff] %vm1050_vm6, %v1048_v8 }
 0x640   : > { %v1052_v10 = vld [vmem:[#allocation2] sm:$0xff] }
 0x641   : > { %v1058_v11 = vpack.c.bf16 %v1052_v10, %v1052_v10 }
 0x643   : > { %1545 = vmatmul.mubr.msk.bf16.vlgmr.msra.gmra.mrb[12].mxu1 %vm486_vm0, %v1058_v11 }
 0x644   : > { %1572 = vmatprep.mubr.msk.bf16.mxu1 %vm1645_vm1, %v1644_v9  ;;  %1557 = vmatpush3.bf16.msra.mxu1 %v1606_v36 }
 0x645   : > { %1558 = vmatprep.subr.bf16.mxu1 %v1644_v9 }
 0x648   : > { %1559 = vmatpush3.bf16.msra.mxu1 %v1607_v37 }
 0x649   : > { %1560 = vmatprep.subr.bf16.mxu1 %v1644_v9 }
 0x64c   : > { %1561 = vmatpush3.bf16.msra.mxu1 %v1608_v38 }
 0x64d   : > { %1562 = vmatprep.subr.bf16.mxu1 %v1644_v9 }
 0x650   : > { %1563 = vmatpush3.bf16.msra.mxu1 %v1609_v39 }
 0x651   : > { %1564 = vmatprep.subr.bf16.mxu1 %v1644_v9 }
 0x654   : > { %1565 = vmatpush3.bf16.msra.mxu1 %v1610_v40 }
 0x655   : > { %1566 = vmatprep.subr.bf16.mxu1 %v1644_v9 }
 0x658   : > { %1567 = vmatpush3.bf16.msra.mxu1 %v1611_v41 }
 0x659   : > { %1568 = vmatprep.subr.bf16.mxu1 %v1644_v9 }
 0x65c   : > { %1569 = vmatpush3.bf16.msra.mxu1 %v1612_v42 }
 0x65d   : > { %1570 = vmatprep.subr.bf16.mxu1 %v1644_v9 }
 0x660   : > { %1571 = vmatpush3.bf16.msra.mxu1 %v1613_v43 }
 0x716   : > { %v1114_v13 = vpop.f32.mrb[12].mxu1 }
 0x717   : > { %v1115_v14 = vadd.f32 %v1429_v12, %v1114_v13  ;;  %v1546_v15 = vpop.f32.mrb[13].mxu1 }
 0x718   : > { %v1117_v16 = vpop.f32.mrb[14].mxu1 }
 0x719   : > { %v1863_v17 = vadd.f32 %v1115_v14, %v1749_v1  ;;  %v1547_v18 = vpop.f32.mrb[15].mxu1  ;;  %v1605_v1 = vld [vmem:[%s1938_s10 + $0x8] sm:$0xff]  }
 0x71a   : > { %1551 = vmatpush3.bf16.msra.mxu0 %v1605_v1 }
 0x71b   : > { %v1123_v19 = vsel %vm486_vm0, %v1863_v17, 0.0 }
 0x71c   : > { %1124 = vadd.xlane.f32.xlu1 %v1123_v19 }
 0x7a9   : > { %v1125_v20 = vpop.xlane.xlu1 %1124 }
 0x7aa   : > { %v1126_v21 = vmul.f32 0.03125, %v1125_v20 }
 0x7ac   : > { %v1127_v22 = vsub.f32 %v1863_v17, %v1126_v21 }
 0x7ae   : > { %v1128_v23 = vmul.f32 %v1127_v22, %v1127_v22 }
 0x7b0   : > { %v1129_v24 = vsel %vm486_vm0, %v1128_v23, 0.0 }
 0x7b1   : > { %1130 = vadd.xlane.f32.xlu0 %v1129_v24 }
 0x83e   : > { %v1131_v27 = vpop.xlane.xlu0 %1130 }
 0x83f   : > { %v1132_v28 = vmul.f32 0.03125, %v1131_v27 }
 0x841   : > { %v1133_v29 = vadd.f32 1e-05, %v1132_v28 }
 0x843   : > { %1632 = vrsqrt.f32 %v1133_v29 }
 0x84d   : > { %v1633_v30 = vpop.eup %1632 }
 0x84e   : > { %v1135_v32 = vmul.f32 %v1633_v30, %v1127_v22 }
 0x850   : > { %v1142_v34 = vmul.f32 %v1433_v31, %v1135_v32 }
 0x852   : > { %v1149_v26 = vadd.f32 %v1434_v33, %v1142_v34 }
 0x854   : > { %v1155_v35 = vpack.c.bf16 %v1149_v26, %v1149_v26 }
 0x856   : > { %1553 = vmatmul.mubr.msk.bf16.vlgmr.msra.gmra.mrb[24].mxu0 %vm486_vm0, %v1155_v35 }
 0x929   : > { %v1211_v45 = vpop.f32.mrb[24].mxu0 }
 0x92a   : > { %v1212_v46 = vadd.f32 %v1435_v44, %v1211_v45  ;;  %v1554_v47 = vpop.f32.mrb[25].mxu0 }
 0x92b   : > { %v1214_v48 = vpop.f32.mrb[26].mxu0 }
 0x92c   : > { %v1217_v49 = vmul.f32 %v1212_v46, %v1212_v46  ;;  %v1555_v50 = vpop.f32.mrb[27].mxu0 }
 0x92e   : > { %v1218_v51 = vmul.f32 %v1217_v49, %v1212_v46 }
 0x930   : > { %v1219_v52 = vmul.f32 0.044715, %v1218_v51 }
 0x932   : > { %v1220_v53 = vadd.f32 %v1219_v52, %v1212_v46 }
 0x934   : > { %v1221_v54 = vmul.f32 0.7978846, %v1220_v53 }
 0x936   : > { %1634 = vtanh.f32 %v1221_v54 }
 0x940   : > { %v1635_v55 = vpop.eup %1634 }
 0x941   : > { %v1223_v56 = vadd.f32 1.0, %v1635_v55 }
 0x943   : > { %v1224_v9 = vmul.f32 0.5, %v1223_v56 }
 0x945   : > { %v1225_v57 = vmul.f32 %v1224_v9, %v1212_v46 }
 0x947   : > { %v1243_v58 = vpack.c.bf16 %v1225_v57, %v1225_v57 }
 0x949   : > { %1573 = vmatmul.mubr.bf16.vlgmr.msra.gmra.mrb[16].mxu1 %v1243_v58 }
 0xa1c   : > { %v1332_v60 = vpop.f32.mrb[16].mxu1 }
 0xa1d   : > { %v1333_v61 = vadd.f32 %v1439_v59, %v1332_v60  ;;  %v1574_v62 = vpop.f32.mrb[17].mxu1 }
 0xa1e   : > { %v1335_v63 = vpop.f32.mrb[18].mxu1 }
 0xa1f   : > { %v1338_v0 = vadd.f32 %v1333_v61, %v1863_v17  ;;  %v1575_v2 = vpop.f32.mrb[19].mxu1 }
 0xa21   : > { %v1339_v3 = vpack.c.bf16 %v1338_v0, %v1338_v0 }
 0xa23   : > { %1341 = vst.msk [vmem:[%s479_s26] sm:$0xf] %vm1340_vm7, %v1339_v3 }
 0xa24 PF: > { %s24_s29 = sadd.s32 1, %s1642_s29  }
 0xa25   : > { %p21_p4 = scmp.ge.s32.totalorder %s24_s29, 4  }
 0xa27   :  { %23 = sbr.rel (!%p21_p4) target bundleno = 1 (0x1), region = 109 }

// kernel: seq2seq_forward.7
= control target key start
LH: loop header
LB: loop body
LE: loop exit
PB: predicated region body
PF: predicated region fallthrough
CT: control target
= control target key end

     0   :  { %s5908_s0 = inlined_call_operand.vmem [shape: bf16[2,8,32], index: 0, kind: input, shape index: {}]   ;;  %s5909_s1 = inlined_call_operand.vmem [shape: bf16[2,8,32], index: 1, kind: input, shape index: {}]   ;;  %s5910_s2 = inlined_call_operand.vmem [shape: bf16[32,96], index: 2, kind: input, shape index: {}]   ;;  %s5911_s3 = inlined_call_operand.vmem [shape: f32[1,96], index: 3, kind: input, shape index: {}]   ;;  %s5912_s4 = inlined_call_operand.vmem [shape: bf16[32,32], index: 4, kind: input, shape index: {}]   ;;  %s5913_s5 = inlined_call_operand.vmem [shape: f32[1,32], index: 5, kind: input, shape index: {}]   ;;  %s5914_s6 = inlined_call_operand.vmem [shape: f32[1,32], index: 6, kind: input, shape index: {}]   ;;  %s5915_s7 = inlined_call_operand.vmem [shape: f32[1,32], index: 7, kind: input, shape index: {}]   ;;  %s5916_s8 = inlined_call_operand.vmem [shape: bf16[32,32], index: 8, kind: input, shape index: {}]   ;;  %s5917_s9 = inlined_call_operand.vmem [shape: f32[1,32], index: 9, kind: input, shape index: {}]   ;;  %s5918_s10 = inlined_call_operand.vmem [shape: bf16[32,64], index: 10, kind: input, shape index: {}]   ;;  %s5919_s11 = inlined_call_operand.vmem [shape: f32[1,64], index: 11, kind: input, shape index: {}]   ;;  %s5920_s12 = inlined_call_operand.vmem [shape: bf16[32,32], index: 12, kind: input, shape index: {}]   ;;  %s5921_s13 = inlined_call_operand.vmem [shape: f32[1,32], index: 13, kind: input, shape index: {}]   ;;  %s5922_s14 = inlined_call_operand.vmem [shape: f32[1,32], index: 14, kind: input, shape index: {}]   ;;  %s5923_s15 = inlined_call_operand.vmem [shape: f32[1,32], index: 15, kind: input, shape index: {}]   ;;  %s5924_s16 = inlined_call_operand.vmem [shape: bf16[32,2048], index: 16, kind: input, shape index: {}]   ;;  %s5925_s17 = inlined_call_operand.vmem [shape: f32[1,2048], index: 17, kind: input, shape index: {}]   ;;  %s5926_s18 = inlined_call_operand.vmem [shape: bf16[2048,32], index: 18, kind: input, shape index: {}]   ;;  %s5927_s19 = inlined_call_operand.vmem [shape: f32[1,32], index: 19, kind: input, shape index: {}]   ;;  %s5928_s20 = inlined_call_operand.vmem [shape: f32[1,32], index: 20, kind: input, shape index: {}]   ;;  %s5929_s21 = inlined_call_operand.vmem [shape: f32[1,32], index: 21, kind: input, shape index: {}]   ;;  %s5930_s22 = inlined_call_operand.vmem [shape: bf16[2,8,32], index: 22, kind: output, shape index: {}]  }
   0x1   :  { %5940 = sst [smem:[#allocation3_spill]] %s5908_s0 }
   0x2   :  { %5941 = sst [smem:[#allocation4_spill]] %s5909_s1 }
   0x3   :  { %5942 = sst [smem:[#allocation5_spill]] %s5910_s2 }
   0x4   :  { %5943 = sst [smem:[#allocation6_spill]] %s5911_s3  ;;  %s5032_s3 = smov 0  }
   0x5   :  { %5944 = sst [smem:[#allocation7_spill]] %s5912_s4 }
   0x6   :  { %5945 = sst [smem:[#allocation8_spill]] %s5913_s5 }
   0x7   :  { %5946 = sst [smem:[#allocation9_spill]] %s5914_s6 }
   0x8 LB: > { %s4111_s28 = sadd.s32 4294967295, %s4898_s3   ;;  %p4115_p0 = scmp.ge.s32.totalorder %s4898_s3, 1  ;;  %s4898_s3 = sphi %s5032_s3, %s32_s3  }
   0x9   : > { %p620_p1 = scmp.lt.s32.totalorder %s4898_s3, 3 }
   0xb   : > { %p621_p2 = pnand %p4115_p0, %p620_p1 }
   0xc   : > { %s5947_s4 = sld [smem:[#allocation5_spill]] (!%p621_p2)  ;;  %v4900_v1 = vmov (!%p621_p2), 0.0   ;;  %vm4901_vm0 = vmmov (!%p621_p2), 0   ;;  %p684_p3 = scmp.lt.s32.totalorder (!%p621_p2), %s4111_s28, 1  ;;  %vm723_vm1 = vcmask (!%p621_p2), 261120   ;;  %vm771_vm2 = vcmask (!%p621_p2), 64512  }
   0xd   : > { %624 = sbr.rel (%p621_p2) target bundleno = 4432 (0x1150), region = 108  ;;  %4555 = vmatprep.subr.bf16.mxu0 (!%p621_p2), %v4900_v1  ;;  %4563 = vmatprep.subr.bf16.mxu1 (!%p621_p2), %v4900_v1  ;;  %s5948_s6 = sld [smem:[#allocation3_spill]] (!%p621_p2)  ;;  %vm836_vm3 = vcmask (!%p621_p2), 1043456   ;;  %vm996_vm4 = vcmask (!%p621_p2), 130112   ;;  %vm1113_vm5 = vcmask (!%p621_p2), 195712   ;;  %vm1230_vm6 = vcmask (!%p621_p2), 261312  }
   0xe   : > { %4559 = vmatprep.mubr.msk.bf16.mxu0 (!%p621_p2), %vm4901_vm0, %v4900_v1  ;;  %4565 = vmatprep.mubr.msk.bf16.mxu1 (!%p621_p2), %vm4901_vm0, %v4900_v1  ;;  %s5949_s27 = sld [smem:[#allocation6_spill]] (!%p621_p2)  ;;  %s5939_s29 = smov (!%p621_p2), 96   ;;  %vm4044_vm7 = vcmask (!%p621_p2), 257024  }
   0xf   : > { %s5938_s30 = smov (!%p621_p2), 80   ;;  %s5933_s0 = smov (!%p621_p2), 88  }
  0x10   : > { %s5934_s23 = smov (!%p621_p2), 72   ;;  %s4907_s5 = smov (!%p621_p2), 112  }
  0x11   : > { %s4908_s24 = smov (!%p621_p2), 104   ;;  %s4911_s26 = smov (!%p621_p2), 40  }
  0x12   : > { %v4716_v0 = vld [vmem:[%s5947_s4] sm:$0xff] (!%p621_p2)   ;;  %v4717_v2 = vld [vmem:[%s5947_s4 + $0x8] sm:$0xff] (!%p621_p2)   ;;  %s4912_s2 = smov (!%p621_p2), 48  }
  0x13   : > { %4556 = vmatpush3.bf16.msra.mxu0 (!%p621_p2), %v4716_v0 }
  0x14   : > { %4557 = vmatprep.subr.bf16.mxu0 %v4900_v1  ;;  %s5962_s28 = smov (!%p684_p3, %s4111_s28), 1  ;;  %v4119_v4 = vld [vmem:[%s5949_s27] ss:$0 sm:$0xff]  ;;  %s5937_s27 = smov 8  }
  0x15   : > { %s5053_s1 = sshll.u32 %s5962_s28, 2  ;;  %s4902_s28 = smov 120  }
  0x16   : > { %s687_s25 = scalar_lea.vmem %s5948_s6, %s5053_s1  ;;  %s4909_s6 = smov 56  }
  0x17   : > { %4558 = vmatpush3.bf16.msra.mxu0 %v4717_v2  ;;  %v5060_v3 = vld [vmem:[%s687_s25] sm:$0xf]  ;;  %s4910_s25 = smov 64  }
  0x18   : > { %4569 = vmatprep.subr.bf16.mxu0 %v4900_v1 }
  0x1a   : > { %4560 = vmatmul.mubr.msk.bf16.vlgmr.msra.gmra.mrb[0].mxu0 %vm723_vm1, %v5060_v3 }
  0x1b   : > { %4571 = vmatprep.mubr.msk.bf16.mxu0 %vm4901_vm0, %v4900_v1 }
  0xed   : > { %v761_v5 = vpop.f32.mrb[0].mxu0 }
  0xee   : > { %v762_v6 = vadd.f32 %v4119_v4, %v761_v5  ;;  %v4561_v7 = vpop.f32.mrb[1].mxu0 }
  0xef   : > { %v764_v8 = vpop.f32.mrb[2].mxu0 }
  0xf0   : > { %v5069_v9 = vpack.c.bf16 %v762_v6, %v762_v6  ;;  %v4562_v10 = vpop.f32.mrb[3].mxu0 }
  0xf2   : > { %881 = vrot.lane.b32.xlu1 %v5069_v9, %s4902_s28  ;;  %769 = vrot.lane.b32.xlu0 %v5069_v9, %s5939_s29 }
  0xf6   : > { %1000 = vrot.lane.b32.xlu1 %v5069_v9, %s5938_s30  ;;  %883 = vrot.lane.b32.xlu0 %v5069_v9, %s5933_s0  ;;  %s5952_s30 = sld [smem:[#allocation4_spill]] }
  0xfa   : > { %1117 = vrot.lane.b32.xlu1 %v5069_v9, %s5934_s23  ;;  %998 = vrot.lane.b32.xlu0 %v5069_v9, %s4907_s5  ;;  %s5936_s23 = smov 16  }
  0xfc   : > { %s691_s29 = scalar_lea.vmem %s5952_s30, %s5053_s1  ;;  %s5957_s30 = smov 88  }
  0xfe   : > { %1115 = vrot.lane.b32.xlu0 %v5069_v9, %s4908_s24 }
 0x164   : > { %v770_v11 = vpop.permute.xlu0 %769  ;;  %v882_v14 = vpop.permute.xlu1 %881 }
 0x165   : > { %v776_v12 = vsel %vm771_vm2, %v770_v11, 0 }
 0x166   : > { %4564 = vmatpush3.bf16.xpose.msra.mxu1 %v776_v12 }
 0x167   : > { %4575 = vmatprep.subr.bf16.mxu1 %v4900_v1 }
 0x168   : > { %v884_v13 = vpop.permute.xlu0 %883  ;;  %v1001_v16 = vpop.permute.xlu1 %1000 }
 0x169   : > { %v889_v15 = vsel %vm771_vm2, %v884_v13, 0  ;;  %v1006_v17 = vsel %vm771_vm2, %v1001_v16, 0 }
 0x16c   : > { %v1118_v18 = vpop.permute.xlu1 %1117  ;;  %v999_v19 = vpop.permute.xlu0 %998 }
 0x16d   : > { %4566 = vmatmul.mubr.msk.bf16.vlgmr.msra.gmra.mrb[0].mxu1 %vm771_vm2, %v5069_v9  ;;  %v1123_v20 = vsel %vm771_vm2, %v1118_v18, 0 }
 0x16e   : > { %4576 = vmatpush3.bf16.xpose.msra.mxu1 %v889_v15  ;;  %4577 = vmatprep.mubr.msk.bf16.mxu1 %vm4901_vm0, %v4900_v1 }
 0x16f   : > { %4587 = vmatprep.subr.bf16.mxu1 %v4900_v1 }
 0x170   : > { %v1116_v21 = vpop.permute.xlu0 %1115 }
 0x175   : > { %4578 = vmatmul.mubr.msk.bf16.vlgmr.msra.gmra.mrb[4].mxu1 %vm771_vm2, %v882_v14 }
 0x176   : > { %4588 = vmatpush3.bf16.xpose.msra.mxu1 %v1006_v17  ;;  %4589 = vmatprep.mubr.msk.bf16.mxu1 %vm4901_vm0, %v4900_v1 }
 0x177   : > { %4599 = vmatprep.subr.bf16.mxu1 %v4900_v1 }
 0x17d   : > { %4590 = vmatmul.mubr.msk.bf16.vlgmr.msra.gmra.mrb[8].mxu1 %vm771_vm2, %v999_v19 }
 0x17e   : > { %4600 = vmatpush3.bf16.xpose.msra.mxu1 %v1123_v20  ;;  %4601 = vmatprep.mubr.msk.bf16.mxu1 %vm4901_vm0, %v4900_v1 }
 0x17f   : > { %4611 = vmatprep.subr.bf16.mxu1 %v4900_v1 }
 0x185   : > { %4602 = vmatmul.mubr.msk.bf16.vlgmr.msra.gmra.mrb[12].mxu1 %vm771_vm2, %v1116_v21 }
 0x186   : > { %4615 = vmatprep.mubr.msk.bf16.mxu1 %vm4901_vm0, %v4900_v1 }
 0x240   : > { %v812_v22 = vpop.f32.mrb[0].mxu1 }
 0x241   : > { %v818_v23 = vmul.f32 0.35355338, %v812_v22  ;;  %v4567_v24 = vpop.f32.mrb[1].mxu1 }
 0x242   : > { %v815_v25 = vpop.f32.mrb[2].mxu1 }
 0x243   : > { %v4568_v26 = vpop.f32.mrb[3].mxu1  ;;  %v819_v27 = vsel %vm771_vm2, %v818_v23, -inf }
 0x244   : > { %820 = vmax.xlane.f32.xlu1 %v819_v27 }
 0x248   : > { %v925_v28 = vpop.f32.mrb[4].mxu1 }
 0x249   : > { %v931_v29 = vmul.f32 0.35355338, %v925_v28  ;;  %v4579_v30 = vpop.f32.mrb[5].mxu1 }
 0x24a   : > { %v928_v31 = vpop.f32.mrb[6].mxu1 }
 0x24b   : > { %v4580_v32 = vpop.f32.mrb[7].mxu1  ;;  %v932_v33 = vsel %vm771_vm2, %v931_v29, -inf }
 0x24c   : > { %933 = vmax.xlane.f32.xlu0 %v932_v33 }
 0x250   : > { %v1042_v34 = vpop.f32.mrb[8].mxu1 }
 0x251   : > { %v1048_v35 = vmul.f32 0.35355338, %v1042_v34  ;;  %v4591_v36 = vpop.f32.mrb[9].mxu1 }
 0x252   : > { %v1045_v37 = vpop.f32.mrb[10].mxu1 }
 0x253   : > { %v4592_v38 = vpop.f32.mrb[11].mxu1  ;;  %v1049_v39 = vsel %vm771_vm2, %v1048_v35, -inf }
 0x254   : > { %1050 = vmax.xlane.f32.xlu0 %v1049_v39 }
 0x258   : > { %v1159_v40 = vpop.f32.mrb[12].mxu1 }
 0x259   : > { %v1165_v41 = vmul.f32 0.35355338, %v1159_v40  ;;  %v4603_v42 = vpop.f32.mrb[13].mxu1 }
 0x25a   : > { %v1162_v43 = vpop.f32.mrb[14].mxu1 }
 0x25b   : > { %v4604_v44 = vpop.f32.mrb[15].mxu1  ;;  %v1166_v45 = vsel %vm771_vm2, %v1165_v41, -inf }
 0x25c   : > { %1167 = vmax.xlane.f32.xlu1 %v1166_v45 }
 0x2d1   : > { %v821_v46 = vpop.xlane.xlu1 %820 }
 0x2d2   : > { %v822_v47 = vsub.f32 %v818_v23, %v821_v46 }
 0x2d4   : > { %v823_v48 = vmul.f32 1.442695, %v822_v47 }
 0x2d6   : > { %4854 = vpow2.f32 %v823_v48 }
 0x2d9   : > { %v934_v49 = vpop.xlane.xlu0 %933 }
 0x2da   : > { %v935_v50 = vsub.f32 %v931_v29, %v934_v49 }
 0x2dc   : > { %v936_v51 = vmul.f32 1.442695, %v935_v50 }
 0x2de   : > { %4856 = vpow2.f32 %v936_v51 }
 0x2e0   : > { %v4855_v52 = vpop.eup %4854 }
 0x2e1   : > { %v1051_v53 = vpop.xlane.xlu0 %1050  ;;  %v825_v54 = vsel %vm771_vm2, %v4855_v52, 0.0 }
 0x2e2   : > { %v1052_v55 = vsub.f32 %v1048_v35, %v1051_v53  ;;  %826 = vadd.xlane.f32.xlu0 %v825_v54 }
 0x2e4   : > { %v1053_v56 = vmul.f32 1.442695, %v1052_v55 }
 0x2e6   : > { %4858 = vpow2.f32 %v1053_v56 }
 0x2e8   : > { %v4857_v57 = vpop.eup %4856 }
 0x2e9   : > { %v938_v58 = vsel %vm771_vm2, %v4857_v57, 0.0  ;;  %v1168_v61 = vpop.xlane.xlu1 %1167 }
 0x2ea   : > { %939 = vadd.xlane.f32.xlu1 %v938_v58  ;;  %v1169_v62 = vsub.f32 %v1165_v41, %v1168_v61 }
 0x2ec   : > { %v1170_v63 = vmul.f32 1.442695, %v1169_v62 }
 0x2ee   : > { %4860 = vpow2.f32 %v1170_v63 }
 0x2f0   : > { %v4859_v59 = vpop.eup %4858 }
 0x2f1   : > { %v1055_v60 = vsel %vm771_vm2, %v4859_v59, 0.0 }
 0x2f2   : > { %1056 = vadd.xlane.f32.xlu0 %v1055_v60 }
 0x2f8   : > { %v4861_v0 = vpop.eup %4860 }
 0x2f9   : > { %v1172_v2 = vsel %vm771_vm2, %v4861_v0, 0.0 }
 0x2fb   : > { %944 = vrot.lane.b32.xlu1 %v5069_v9, %s4909_s6  ;;  %s5935_s6 = smov 24  }
 0x308   : > { %831 = vrot.lane.b32.xlu0 %v5069_v9, %s4910_s25 }
 0x30c   : > { %1178 = vrot.lane.b32.xlu0 %v5069_v9, %s4911_s26  ;;  %s5950_s26 = sld [smem:[#allocation7_spill]] }
 0x312   : > { %v4718_v36 = vld [vmem:[%s5950_s26] sm:$0xff]   ;;  %v4719_v37 = vld [vmem:[%s5950_s26 + $0x8] sm:$0xff]  }
 0x313   : > { %4612 = vmatpush3.bf16.msra.mxu1 %v4718_v36 }
 0x314   : > { %4613 = vmatprep.subr.bf16.mxu1 %v4900_v1 }
 0x317   : > { %4614 = vmatpush3.bf16.msra.mxu1 %v4719_v37 }
 0x318   : > { %4627 = vmatprep.subr.bf16.mxu1 %v4900_v1 }
 0x31f   : > { %1173 = vadd.xlane.f32.xlu1 %v1172_v2  ;;  %v4721_v2 = vld [vmem:[%s5918_s10 + $0x8] sm:$0xff]  }
 0x330   : > { %1061 = vrot.lane.b32.xlu1 %v5069_v9, %s4912_s2  ;;  %s5951_s2 = sld [smem:[#allocation8_spill]] }
 0x336   : > { %v4131_v51 = vld [vmem:[%s5951_s2] ss:$0 sm:$0xff]  ;;  %s5959_s2 = smov 16  }
 0x36f   : > { %v827_v4 = vpop.xlane.xlu0 %826 }
 0x370   : > { %4862 = vrcp.f32 %v827_v4  ;;  %v699_v4 = vld [vmem:[%s691_s29] sm:$0xf]  ;;  %s5960_s29 = smov 24  }
 0x377   : > { %v940_v5 = vpop.xlane.xlu1 %939 }
 0x378   : > { %4864 = vrcp.f32 %v940_v5  ;;  %v4722_v5 = vld [vmem:[%s5916_s8] sm:$0xff]  }
 0x37a   : > { %v4863_v6 = vpop.eup %4862 }
 0x37b   : > { %v829_v8 = vmul.f32 %v4863_v6, %v4855_v52  ;;  %v945_v12 = vpop.permute.xlu1 %944  ;;  %v698_v52 = vunpack.c.l.bf16 %v5060_v3  ;;  %v4720_v3 = vld [vmem:[%s5918_s10] sm:$0xff]   ;;  %v4723_v6 = vld [vmem:[%s5916_s8 + $0x8] sm:$0xff]  }
 0x37c   : > { %v950_v15 = vsel %vm836_vm3, %v945_v12, 0 }
 0x37d   : > { %v830_v13 = vpack.c.bf16 %v829_v8, %v829_v8 }
 0x37f   : > { %v1057_v7 = vpop.xlane.xlu0 %1056 }
 0x380   : > { %4866 = vrcp.f32 %v1057_v7 }
 0x382   : > { %v4865_v14 = vpop.eup %4864 }
 0x383   : > { %v832_v10 = vpop.permute.xlu0 %831  ;;  %v942_v9 = vmul.f32 %v4865_v14, %v4857_v57  ;;  %v4136_v14 = vld [vmem:[%s5915_s7] ss:$0 sm:$0xff] }
 0x384   : > { %v838_v11 = vsel %vm836_vm3, %v832_v10, 0 }
 0x385   : > { %4570 = vmatpush3.bf16.msra.mxu0 %v838_v11  ;;  %v943_v16 = vpack.c.bf16 %v942_v9, %v942_v9 }
 0x386   : > { %4581 = vmatprep.subr.bf16.mxu0 %v4900_v1 }
 0x387   : > { %v1179_v22 = vpop.permute.xlu0 %1178 }
 0x388   : > { %4572 = vmatmul.mubr.msk.bf16.vlgmr.msra.gmra.mrb[4].mxu0 %vm771_vm2, %v830_v13  ;;  %v1184_v24 = vsel %vm836_vm3, %v1179_v22, 0 }
 0x389   : > { %4582 = vmatpush3.bf16.msra.mxu0 %v950_v15  ;;  %4583 = vmatprep.mubr.msk.bf16.mxu0 %vm4901_vm0, %v4900_v1 }
 0x38a   : > { %4593 = vmatprep.subr.bf16.mxu0 %v4900_v1  ;;  %v4867_v17 = vpop.eup %4866 }
 0x38b   : > { %v1059_v19 = vmul.f32 %v4867_v17, %v4859_v59  ;;  %v4141_v17 = vld [vmem:[%s5919_s11] ss:$0 sm:$0xff] }
 0x38d   : > { %v1060_v23 = vpack.c.bf16 %v1059_v19, %v1059_v19 }
 0x390   : > { %4584 = vmatmul.mubr.msk.bf16.vlgmr.msra.gmra.mrb[8].mxu0 %vm771_vm2, %v943_v16 }
 0x391   : > { %4595 = vmatprep.mubr.msk.bf16.mxu0 %vm4901_vm0, %v4900_v1 }
 0x3ac   : > { %v1174_v18 = vpop.xlane.xlu1 %1173 }
 0x3ad   : > { %4868 = vrcp.f32 %v1174_v18 }
 0x3b0   : > { %v1062_v20 = vpop.permute.xlu1 %1061 }
 0x3b1   : > { %v1067_v21 = vsel %vm836_vm3, %v1062_v20, 0 }
 0x3b2   : > { %4594 = vmatpush3.bf16.msra.mxu0 %v1067_v21 }
 0x3b3   : > { %4605 = vmatprep.subr.bf16.mxu0 %v4900_v1 }
 0x3b5   : > { %4596 = vmatmul.mubr.msk.bf16.vlgmr.msra.gmra.mrb[12].mxu0 %vm771_vm2, %v1060_v23 }
 0x3b6   : > { %4606 = vmatpush3.bf16.msra.mxu0 %v1184_v24  ;;  %4607 = vmatprep.mubr.msk.bf16.mxu0 %vm4901_vm0, %v4900_v1 }
 0x3b7   : > { %v4869_v25 = vpop.eup %4868  ;;  %4619 = vmatprep.subr.bf16.mxu0 %v4900_v1 }
 0x3b8   : > { %v1176_v26 = vmul.f32 %v4869_v25, %v4861_v0  ;;  %v4137_v25 = vld [vmem:[%s5917_s9] ss:$0 sm:$0xff] }
 0x3ba   : > { %v1177_v27 = vpack.c.bf16 %v1176_v26, %v1176_v26 }
 0x3bd   : > { %4608 = vmatmul.mubr.msk.bf16.vlgmr.msra.gmra.mrb[16].mxu0 %vm771_vm2, %v1177_v27 }
 0x3be   : > { %4623 = vmatprep.mubr.msk.bf16.mxu0 %vm4901_vm0, %v4900_v1  ;;  %4620 = vmatpush3.bf16.msra.mxu0 %v4722_v5 }
 0x3bf   : > { %4621 = vmatprep.subr.bf16.mxu0 %v4900_v1 }
 0x3c2   : > { %4622 = vmatpush3.bf16.msra.mxu0 %v4723_v6 }
 0x3c3   : > { %4635 = vmatprep.subr.bf16.mxu0 %v4900_v1 }
 0x45b   : > { %v874_v28 = vpop.f32.mrb[4].mxu0 }
 0x45c   : > { %880 = vst.msk [vmem:[#allocation2] sm:$0xff] %vm771_vm2, %v874_v28  ;;  %v4573_v29 = vpop.f32.mrb[5].mxu0 }
 0x45d   : > { %v877_v30 = vpop.f32.mrb[6].mxu0 }
 0x45e   : > { %v4574_v31 = vpop.f32.mrb[7].mxu0 }
 0x463   : > { %v986_v32 = vpop.f32.mrb[8].mxu0 }
 0x464   : > { %993 = vrot.lane.b32.xlu1 %v986_v32, %s5937_s27  ;;  %v4585_v33 = vpop.f32.mrb[9].mxu0 }
 0x465   : > { %v989_v34 = vpop.f32.mrb[10].mxu0 }
 0x466   : > { %v4586_v35 = vpop.f32.mrb[11].mxu0 }
 0x488   : > { %v1103_v38 = vpop.f32.mrb[12].mxu0 }
 0x489   : > { %1110 = vrot.lane.b32.xlu0 %v1103_v38, %s5936_s23  ;;  %v4597_v39 = vpop.f32.mrb[13].mxu0  ;;  %s5953_s23 = sld [smem:[#allocation9_spill]] }
 0x48a   : > { %v1106_v40 = vpop.f32.mrb[14].mxu0 }
 0x48b   : > { %v4598_v41 = vpop.f32.mrb[15].mxu0 }
 0x48f   : > { %v4135_v12 = vld [vmem:[%s5953_s23] ss:$0 sm:$0xff]  ;;  %s5958_s23 = smov 8  }
 0x490   : > { %v1220_v42 = vpop.f32.mrb[16].mxu0 }
 0x491   : > { %1227 = vrot.lane.b32.xlu1 %v1220_v42, %s5935_s6  ;;  %v4609_v43 = vpop.f32.mrb[17].mxu0  ;;  %s695_s6 = scalar_lea.vmem %s5930_s22, %s5053_s1 }
 0x492   : > { %v1223_v44 = vpop.f32.mrb[18].mxu0 }
 0x493   : > { %v4610_v45 = vpop.f32.mrb[19].mxu0 }
 0x4d6   : > { %v994_v46 = vpop.permute.xlu1 %993 }
 0x4d7   : > { %997 = vst.msk [vmem:[#allocation2] sm:$0xff] %vm996_vm4, %v994_v46 }
 0x4fb   : > { %v1111_v47 = vpop.permute.xlu0 %1110 }
 0x4fc   : > { %1114 = vst.msk [vmem:[#allocation2] sm:$0xff] %vm1113_vm5, %v1111_v47 }
 0x503   : > { %v1228_v48 = vpop.permute.xlu1 %1227 }
 0x504   : > { %1231 = vst.msk [vmem:[#allocation2] sm:$0xff] %vm1230_vm6, %v1228_v48 }
 0x50b   : > { %v1232_v49 = vld [vmem:[#allocation2] sm:$0xff] }
 0x50c   : > { %v1238_v50 = vpack.c.bf16 %v1232_v49, %v1232_v49 }
 0x50e   : > { %4616 = vmatmul.mubr.msk.bf16.vlgmr.msra.gmra.mrb[16].mxu1 %vm723_vm1, %v1238_v50 }
 0x50f   : > { %4631 = vmatprep.mubr.msk.bf16.mxu1 %vm4901_vm0, %v4900_v1  ;;  %4628 = vmatpush3.bf16.msra.mxu1 %v4720_v3 }
 0x510   : > { %4629 = vmatprep.subr.bf16.mxu1 %v4900_v1 }
 0x513   : > { %4630 = vmatpush3.bf16.msra.mxu1 %v4721_v2 }
 0x514   : > { %4641 = vmatprep.subr.bf16.mxu1 %v4900_v1 }
 0x516   : > { %4632 = vmatmul.mubr.msk.bf16.vlgmr.msra.gmra.mrb[20].mxu1 %vm723_vm1, %v699_v4 }
 0x517   : > { %4643 = vmatprep.mubr.msk.bf16.mxu1 %vm4901_vm0, %v4900_v1 }
 0x5e1   : > { %v1294_v53 = vpop.f32.mrb[16].mxu1 }
 0x5e2   : > { %v1295_v54 = vadd.f32 %v4131_v51, %v1294_v53  ;;  %v4617_v55 = vpop.f32.mrb[17].mxu1 }
 0x5e3   : > { %v1297_v56 = vpop.f32.mrb[18].mxu1 }
 0x5e4   : > { %v4618_v57 = vpop.f32.mrb[19].mxu1  ;;  %v1300_v58 = vadd.f32 %v1295_v54, %v698_v52 }
 0x5e6   : > { %v1303_v59 = vsel %vm723_vm1, %v1300_v58, 0.0 }
 0x5e7   : > { %1304 = vadd.xlane.f32.xlu0 %v1303_v59 }
 0x5e9   : > { %v1459_v18 = vpop.f32.mrb[20].mxu1 }
 0x5ea   : > { %v1460_v19 = vadd.f32 %v4141_v17, %v1459_v18  ;;  %v4633_v20 = vpop.f32.mrb[21].mxu1 }
 0x5eb   : > { %v1462_v21 = vpop.f32.mrb[22].mxu1 }
 0x5ec   : > { %v5201_v22 = vpack.c.bf16 %v1460_v19, %v1460_v19  ;;  %v4634_v23 = vpop.f32.mrb[23].mxu1 }
 0x5ee   : > { %v1470_v24 = vsel %vm771_vm2, %v5201_v22, 0 }
 0x5fd   : > { %1578 = vrot.lane.b32.xlu0 %v5201_v22, %s4902_s28 }
 0x601   : > { %1694 = vrot.lane.b32.xlu0 %v5201_v22, %s4907_s5 }
 0x605   : > { %1810 = vrot.lane.b32.xlu0 %v5201_v22, %s4908_s24 }
 0x674   : > { %v1305_v60 = vpop.xlane.xlu0 %1304 }
 0x675   : > { %v1307_v61 = vmul.f32 0.03125, %v1305_v60 }
 0x677   : > { %v1308_v62 = vsub.f32 %v1300_v58, %v1307_v61 }
 0x678   : > { %v1579_v30 = vpop.permute.xlu0 %1578 }
 0x679   : > { %v1309_v63 = vmul.f32 %v1308_v62, %v1308_v62  ;;  %v1584_v33 = vsel %vm771_vm2, %v1579_v30, 0 }
 0x67b   : > { %v1310_v0 = vsel %vm723_vm1, %v1309_v63, 0.0 }
 0x67c   : > { %1311 = vadd.xlane.f32.xlu1 %v1310_v0  ;;  %v1695_v34 = vpop.permute.xlu0 %1694 }
 0x67d   : > { %v1700_v36 = vsel %vm771_vm2, %v1695_v34, 0 }
 0x680   : > { %v1811_v37 = vpop.permute.xlu0 %1810 }
 0x681   : > { %v1816_v39 = vsel %vm771_vm2, %v1811_v37, 0 }
 0x709   : > { %v1312_v7 = vpop.xlane.xlu1 %1311 }
 0x70a   : > { %v1313_v8 = vmul.f32 0.03125, %v1312_v7 }
 0x70c   : > { %v1314_v10 = vadd.f32 1e-05, %v1313_v8 }
 0x70e   : > { %4870 = vrsqrt.f32 %v1314_v10 }
 0x718   : > { %v4871_v11 = vpop.eup %4870 }
 0x719   : > { %v1316_v13 = vmul.f32 %v4871_v11, %v1308_v62 }
 0x71b   : > { %v1323_v15 = vmul.f32 %v4135_v12, %v1316_v13 }
 0x71d   : > { %v5191_v9 = vadd.f32 %v4136_v14, %v1323_v15 }
 0x71f   : > { %v1336_v16 = vpack.c.bf16 %v5191_v9, %v5191_v9 }
 0x721   : > { %4624 = vmatmul.mubr.msk.bf16.vlgmr.msra.gmra.mrb[20].mxu0 %vm723_vm1, %v1336_v16 }
 0x722   : > { %4637 = vmatprep.mubr.msk.bf16.mxu0 %vm4901_vm0, %v4900_v1  ;;  %4636 = vmatpush3.bf16.xpose.msra.mxu0 %v1470_v24 }
 0x723   : > { %4647 = vmatprep.subr.bf16.mxu0 %v4900_v1 }
 0x7f4   : > { %v1392_v26 = vpop.f32.mrb[20].mxu0 }
 0x7f5   : > { %v1393_v27 = vadd.f32 %v4137_v25, %v1392_v26  ;;  %v4625_v28 = vpop.f32.mrb[21].mxu0 }
 0x7f6   : > { %v1395_v29 = vpop.f32.mrb[22].mxu0 }
 0x7f7   : > { %v1398_v31 = vpack.c.bf16 %v1393_v27, %v1393_v27  ;;  %v4626_v32 = vpop.f32.mrb[23].mxu0 }
 0x7f9   : > { %1576 = vrot.lane.b32.xlu1 %v1398_v31, %s4902_s28  ;;  %4638 = vmatmul.mubr.msk.bf16.vlgmr.msra.gmra.mrb[24].mxu0 %vm771_vm2, %v1398_v31  ;;  %s5954_s28 = smov 96  }
 0x7fa   : > { %4648 = vmatpush3.bf16.xpose.msra.mxu0 %v1584_v33  ;;  %4649 = vmatprep.mubr.msk.bf16.mxu0 %vm4901_vm0, %v4900_v1 }
 0x7fb   : > { %4659 = vmatprep.subr.bf16.mxu0 %v4900_v1 }
 0x7fd   : > { %1692 = vrot.lane.b32.xlu1 %v1398_v31, %s4907_s5  ;;  %s5955_s5 = smov 80  }
 0x801   : > { %1808 = vrot.lane.b32.xlu1 %v1398_v31, %s4908_s24  ;;  %s5956_s24 = smov 72  }
 0x86b   : > { %v1577_v35 = vpop.permute.xlu1 %1576 }
 0x86c   : > { %4650 = vmatmul.mubr.msk.bf16.vlgmr.msra.gmra.mrb[28].mxu0 %vm771_vm2, %v1577_v35 }
 0x86d   : > { %4660 = vmatpush3.bf16.xpose.msra.mxu0 %v1700_v36  ;;  %4661 = vmatprep.mubr.msk.bf16.mxu0 %vm4901_vm0, %v4900_v1 }
 0x86e   : > { %4671 = vmatprep.subr.bf16.mxu0 %v4900_v1 }
 0x86f   : > { %v1693_v38 = vpop.permute.xlu1 %1692 }
 0x873   : > { %v1809_v40 = vpop.permute.xlu1 %1808 }
 0x874   : > { %4662 = vmatmul.mubr.msk.bf16.vlgmr.msra.gmra.mrb[32].mxu0 %vm771_vm2, %v1693_v38 }
 0x875   : > { %4672 = vmatpush3.bf16.xpose.msra.mxu0 %v1816_v39  ;;  %4673 = vmatprep.mubr.msk.bf16.mxu0 %vm4901_vm0, %v4900_v1 }
 0x876   : > { %4683 = vmatprep.subr.bf16.mxu0 %v4900_v1 }
 0x87c   : > { %4674 = vmatmul.mubr.msk.bf16.vlgmr.msra.gmra.mrb[36].mxu0 %vm771_vm2, %v1809_v40 }
 0x87d   : > { %4687 = vmatprep.mubr.msk.bf16.mxu0 %vm4901_vm0, %v4900_v1 }
 0x8cc   : > { %v1506_v41 = vpop.f32.mrb[24].mxu0 }
 0x8cd   : > { %v1512_v42 = vmul.f32 0.35355338, %v1506_v41  ;;  %v4639_v43 = vpop.f32.mrb[25].mxu0 }
 0x8ce   : > { %v1509_v44 = vpop.f32.mrb[26].mxu0 }
 0x8cf   : > { %v4640_v45 = vpop.f32.mrb[27].mxu0  ;;  %v1513_v46 = vsel %vm771_vm2, %v1512_v42, -inf }
 0x8d0   : > { %1514 = vmax.xlane.f32.xlu0 %v1513_v46 }
 0x93f   : > { %v1620_v47 = vpop.f32.mrb[28].mxu0 }
 0x940   : > { %v1626_v48 = vmul.f32 0.35355338, %v1620_v47  ;;  %v4651_v49 = vpop.f32.mrb[29].mxu0 }
 0x941   : > { %v1623_v50 = vpop.f32.mrb[30].mxu0 }
 0x942   : > { %v4652_v51 = vpop.f32.mrb[31].mxu0  ;;  %v1627_v52 = vsel %vm771_vm2, %v1626_v48, -inf }
 0x943   : > { %1628 = vmax.xlane.f32.xlu1 %v1627_v52 }
 0x947   : > { %v1736_v53 = vpop.f32.mrb[32].mxu0 }
 0x948   : > { %v1742_v54 = vmul.f32 0.35355338, %v1736_v53  ;;  %v4663_v55 = vpop.f32.mrb[33].mxu0 }
 0x949   : > { %v1739_v56 = vpop.f32.mrb[34].mxu0  ;;  %v4724_v55 = vld [vmem:[%s5920_s12] sm:$0xff]  }
 0x94a   : > { %v4664_v57 = vpop.f32.mrb[35].mxu0  ;;  %v1743_v58 = vsel %vm771_vm2, %v1742_v54, -inf  ;;  %4684 = vmatpush3.bf16.msra.mxu0 %v4724_v55  ;;  %v4725_v56 = vld [vmem:[%s5920_s12 + $0x8] sm:$0xff]   ;;  %v2049_v55 = vld [vmem:[%s5924_s16 + $0xd8] sm:$0xff] }
 0x94b   : > { %1744 = vmax.xlane.f32.xlu0 %v1743_v58  ;;  %4685 = vmatprep.subr.bf16.mxu0 %v4900_v1 }
 0x94e   : > { %4686 = vmatpush3.bf16.msra.mxu0 %v4725_v56 }
 0x94f   : > { %v1852_v59 = vpop.f32.mrb[36].mxu0 }
 0x950   : > { %v1858_v60 = vmul.f32 0.35355338, %v1852_v59  ;;  %v4675_v61 = vpop.f32.mrb[37].mxu0 }
 0x951   : > { %v1855_v62 = vpop.f32.mrb[38].mxu0 }
 0x952   : > { %v4676_v63 = vpop.f32.mrb[39].mxu0  ;;  %v1859_v0 = vsel %vm771_vm2, %v1858_v60, -inf }
 0x953   : > { %1860 = vmax.xlane.f32.xlu0 %v1859_v0 }
 0x95d   : > { %v1515_v3 = vpop.xlane.xlu0 %1514 }
 0x95e   : > { %v1516_v2 = vsub.f32 %v1512_v42, %v1515_v3 }
 0x960   : > { %v1517_v4 = vmul.f32 1.442695, %v1516_v2 }
 0x962   : > { %4872 = vpow2.f32 %v1517_v4 }
 0x96c   : > { %v4873_v5 = vpop.eup %4872 }
 0x96d   : > { %v1519_v6 = vsel %vm771_vm2, %v4873_v5, 0.0 }
 0x96e   : > { %1520 = vadd.xlane.f32.xlu1 %v1519_v6  ;;  %v4153_v6 = vld [vmem:[%s5921_s13] ss:$0 sm:$0xff] }
 0x97f   : > { %1526 = vrot.lane.b32.xlu1 %v5201_v22, %s5954_s28 }
 0x9d0   : > { %v1629_v7 = vpop.xlane.xlu1 %1628 }
 0x9d1   : > { %v1630_v8 = vsub.f32 %v1626_v48, %v1629_v7 }
 0x9d3   : > { %v1631_v10 = vmul.f32 1.442695, %v1630_v8 }
 0x9d5   : > { %4874 = vpow2.f32 %v1631_v10 }
 0x9d8   : > { %v1745_v11 = vpop.xlane.xlu0 %1744 }
 0x9d9   : > { %v1746_v12 = vsub.f32 %v1742_v54, %v1745_v11 }
 0x9db   : > { %v1747_v13 = vmul.f32 1.442695, %v1746_v12 }
 0x9dd   : > { %4876 = vpow2.f32 %v1747_v13 }
 0x9df   : > { %v4875_v14 = vpop.eup %4874 }
 0x9e0   : > { %v1861_v15 = vpop.xlane.xlu0 %1860  ;;  %v1633_v16 = vsel %vm771_vm2, %v4875_v14, 0.0 }
 0x9e1   : > { %v1862_v17 = vsub.f32 %v1858_v60, %v1861_v15  ;;  %1634 = vadd.xlane.f32.xlu0 %v1633_v16 }
 0x9e3   : > { %v1863_v18 = vmul.f32 1.442695, %v1862_v17 }
 0x9e5   : > { %4878 = vpow2.f32 %v1863_v18 }
 0x9e7   : > { %v4877_v19 = vpop.eup %4876 }
 0x9e8   : > { %v1749_v20 = vsel %vm771_vm2, %v4877_v19, 0.0 }
 0x9e9   : > { %1750 = vadd.xlane.f32.xlu1 %v1749_v20  ;;  %v2022_v20 = vld [vmem:[%s5924_s16] sm:$0xff] }
 0x9ef   : > { %v4879_v21 = vpop.eup %4878 }
 0x9f0   : > { %v1865_v23 = vsel %vm771_vm2, %v4879_v21, 0.0 }
 0x9f1   : > { %1866 = vadd.xlane.f32.xlu0 %v1865_v23 }
 0x9fa   : > { %1755 = vrot.lane.b32.xlu1 %v5201_v22, %s5955_s5 }
 0x9fb   : > { %v1521_v24 = vpop.xlane.xlu1 %1520 }
 0x9fc   : > { %4880 = vrcp.f32 %v1521_v24  ;;  %v2031_v24 = vld [vmem:[%s5924_s16 + $0x48] sm:$0xff] }
 0x9fe   : > { %1871 = vrot.lane.b32.xlu1 %v5201_v22, %s5956_s24 }
 0x9ff   : > { %v1527_v25 = vpop.permute.xlu1 %1526 }
 0xa00   : > { %v1532_v26 = vsel %vm836_vm3, %v1527_v25, 0 }
 0xa01   : > { %4642 = vmatpush3.bf16.msra.mxu1 %v1532_v26 }
 0xa02   : > { %4653 = vmatprep.subr.bf16.mxu1 %v4900_v1 }
 0xa06   : > { %v4881_v27 = vpop.eup %4880 }
 0xa07   : > { %v1523_v28 = vmul.f32 %v4881_v27, %v4873_v5  ;;  %1639 = vrot.lane.b32.xlu0 %v5201_v22, %s5957_s30 }
 0xa09   : > { %v1524_v29 = vpack.c.bf16 %v1523_v28, %v1523_v28  ;;  %v2038_v28 = vld [vmem:[%s5924_s16 + $0x80] sm:$0xff] }
 0xa0b   : > { %4644 = vmatmul.mubr.msk.bf16.vlgmr.msra.gmra.mrb[24].mxu1 %vm771_vm2, %v1524_v29  ;;  %v2046_v29 = vld [vmem:[%s5924_s16 + $0xc0] sm:$0xff] }
 0xa0c   : > { %4655 = vmatprep.mubr.msk.bf16.mxu1 %vm4901_vm0, %v4900_v1 }
 0xa6e   : > { %v1635_v30 = vpop.xlane.xlu0 %1634 }
 0xa6f   : > { %4882 = vrcp.f32 %v1635_v30  ;;  %v2039_v30 = vld [vmem:[%s5924_s16 + $0x88] sm:$0xff] }
 0xa76   : > { %v1751_v31 = vpop.xlane.xlu1 %1750 }
 0xa77   : > { %4884 = vrcp.f32 %v1751_v31  ;;  %v4176_v31 = vcombine.high %v2038_v28, %v2046_v29 }
 0xa79   : > { %v4883_v32 = vpop.eup %4882 }
 0xa7a   : > { %v1637_v34 = vmul.f32 %v4883_v32, %v4875_v14  ;;  %v1756_v37 = vpop.permute.xlu1 %1755  ;;  %v2047_v32 = vld [vmem:[%s5924_s16 + $0xc8] sm:$0xff] }
 0xa7b   : > { %v1761_v39 = vsel %vm836_vm3, %v1756_v37, 0  ;;  %v2032_v37 = vld [vmem:[%s5924_s16 + $0x50] sm:$0xff] }
 0xa7c   : > { %v1638_v22 = vpack.c.bf16 %v1637_v34, %v1637_v34  ;;  %v4177_v34 = vcombine.low %v2039_v30, %v2047_v32 }
 0xa7e   : > { %v1867_v33 = vpop.xlane.xlu0 %1866  ;;  %v1872_v41 = vpop.permute.xlu1 %1871 }
 0xa7f   : > { %4886 = vrcp.f32 %v1867_v33  ;;  %v1877_v44 = vsel %vm836_vm3, %v1872_v41, 0  ;;  %v4175_v33 = vcombine.low %v2038_v28, %v2046_v29 }
 0xa81   : > { %v4885_v38 = vpop.eup %4884 }
 0xa82   : > { %v1640_v35 = vpop.permute.xlu0 %1639  ;;  %v1753_v40 = vmul.f32 %v4885_v38, %v4877_v19  ;;  %v4916_v38 = vmov 0  }
 0xa83   : > { %v1645_v36 = vsel %vm836_vm3, %v1640_v35, 0  ;;  %v4178_v35 = vcombine.high %v2039_v30, %v2047_v32  ;;  %v4727_v32 = vld [vmem:[%s5926_s18 + $0xc0] sm:$0xff]  }
 0xa84   : > { %4654 = vmatpush3.bf16.msra.mxu1 %v1645_v36  ;;  %v1754_v42 = vpack.c.bf16 %v1753_v40, %v1753_v40  ;;  %v2024_v36 = vld [vmem:[%s5924_s16 + $0x10] sm:$0xff]  ;;  %v2033_v40 = vld [vmem:[%s5924_s16 + $0x58] sm:$0xff] }
 0xa85   : > { %4665 = vmatprep.subr.bf16.mxu1 %v4900_v1  ;;  %v4163_v41 = vcombine.low %v2024_v36, %v2032_v37 }
 0xa87   : > { %4656 = vmatmul.mubr.msk.bf16.vlgmr.msra.gmra.mrb[28].mxu1 %vm771_vm2, %v1638_v22  ;;  %v2025_v22 = vld [vmem:[%s5924_s16 + $0x18] sm:$0xff] }
 0xa88   : > { %4666 = vmatpush3.bf16.msra.mxu1 %v1761_v39  ;;  %4667 = vmatprep.mubr.msk.bf16.mxu1 %vm4901_vm0, %v4900_v1  ;;  %v4164_v39 = vcombine.high %v2024_v36, %v2032_v37  ;;  %v4731_v36 = vld [vmem:[%s5926_s18 + $0xc8] sm:$0xff]  }
 0xa89   : > { %4677 = vmatprep.subr.bf16.mxu1 %v4900_v1  ;;  %v4887_v43 = vpop.eup %4886  ;;  %v4732_v37 = vld [vmem:[%s5926_s18 + $0x8] sm:$0xff]  }
 0xa8a   : > { %v1869_v45 = vmul.f32 %v4887_v43, %v4879_v21  ;;  %v2030_v21 = vld [vmem:[%s5924_s16 + $0x40] sm:$0xff]  ;;  %v4166_v43 = vcombine.high %v2025_v22, %v2033_v40 }
 0xa8b   : > { %v4160_v23 = vcombine.high %v2022_v20, %v2030_v21  ;;  %v4159_v25 = vcombine.low %v2022_v20, %v2030_v21  ;;  %v2044_v21 = vld [vmem:[%s5924_s16 + $0xb0] sm:$0xff] }
 0xa8c   : > { %v1870_v46 = vpack.c.bf16 %v1869_v45, %v1869_v45 }
 0xa8f   : > { %4668 = vmatmul.mubr.msk.bf16.vlgmr.msra.gmra.mrb[32].mxu1 %vm771_vm2, %v1754_v42  ;;  %v4165_v42 = vcombine.low %v2025_v22, %v2033_v40  ;;  %v4733_v22 = vld [vmem:[%s5926_s18 + $0x88] sm:$0xff]   ;;  %v4736_v40 = vld [vmem:[%s5926_s18 + $0x10] sm:$0xff]  }
 0xa90   : > { %4678 = vmatpush3.bf16.msra.mxu1 %v1877_v44  ;;  %4679 = vmatprep.mubr.msk.bf16.mxu1 %vm4901_vm0, %v4900_v1 }
 0xa91   : > { %2302 = vmatprep.subr.bf16.mxu1 %v4160_v23  ;;  %v2045_v23 = vld [vmem:[%s5924_s16 + $0xb8] sm:$0xff] }
 0xa97   : > { %4680 = vmatmul.mubr.msk.bf16.vlgmr.msra.gmra.mrb[36].mxu1 %vm771_vm2, %v1870_v46 }
 0xa98   : > { %2303 = vmatpush1.bf16.msra.mxu1 %v4159_v25  ;;  %2334 = vmatprep.mubr.bf16.mxu1 %v4916_v38 }
 0xa99   : > { %2304 = vmatprep.subr.bf16.mxu1 %v4176_v31  ;;  %v4726_v31 = vld [vmem:[%s5926_s18 + $0x40] sm:$0xff]  }
 0xa9c   : > { %2305 = vmatpush1.bf16.msra.mxu1 %v4175_v33  ;;  %v4728_v33 = vld [vmem:[%s5926_s18] sm:$0xff]  }
 0xa9d   : > { %2384 = vmatprep.subr.bf16.mxu1 %v4164_v39  ;;  %v4735_v39 = vld [vmem:[%s5926_s18 + $0xd0] sm:$0xff]  }
 0xade   : > { %v1568_v47 = vpop.f32.mrb[24].mxu1 }
 0xadf   : > { %1574 = vst.msk [vmem:[#allocation2] sm:$0xff] %vm771_vm2, %v1568_v47  ;;  %v4645_v48 = vpop.f32.mrb[25].mxu1 }
 0xae0   : > { %v1571_v49 = vpop.f32.mrb[26].mxu1  ;;  %v4157_v48 = vld [vmem:[%s5922_s14] ss:$0 sm:$0xff] }
 0xae1   : > { %v4646_v50 = vpop.f32.mrb[27].mxu1 }
 0xae2   : > { %v4158_v50 = vld [vmem:[%s5923_s15] ss:$0 sm:$0xff] }
 0xb5a   : > { %v1681_v51 = vpop.f32.mrb[28].mxu1 }
 0xb5b   : > { %1688 = vrot.lane.b32.xlu0 %v1681_v51, %s5958_s23  ;;  %v4657_v52 = vpop.f32.mrb[29].mxu1 }
 0xb5c   : > { %v1684_v53 = vpop.f32.mrb[30].mxu1  ;;  %v2040_v52 = vld [vmem:[%s5924_s16 + $0x90] sm:$0xff] }
 0xb5d   : > { %v4658_v54 = vpop.f32.mrb[31].mxu1  ;;  %v2048_v53 = vld [vmem:[%s5924_s16 + $0xd0] sm:$0xff] }
 0xb5e   : > { %v2041_v54 = vld [vmem:[%s5924_s16 + $0x98] sm:$0xff] }
 0xb62   : > { %v1797_v57 = vpop.f32.mrb[32].mxu1 }
 0xb63   : > { %1804 = vrot.lane.b32.xlu1 %v1797_v57, %s5959_s2  ;;  %v4669_v58 = vpop.f32.mrb[33].mxu1 }
 0xb64   : > { %v1800_v59 = vpop.f32.mrb[34].mxu1  ;;  %v4180_v58 = vcombine.high %v2040_v52, %v2048_v53 }
 0xb65   : > { %v4670_v60 = vpop.f32.mrb[35].mxu1  ;;  %v4182_v59 = vcombine.high %v2041_v54, %v2049_v55 }
 0xb66   : > { %v2026_v60 = vld [vmem:[%s5924_s16 + $0x20] sm:$0xff] }
 0xb6a   : > { %v1913_v61 = vpop.f32.mrb[36].mxu1 }
 0xb6b   : > { %1920 = vrot.lane.b32.xlu0 %v1913_v61, %s5960_s29  ;;  %v4681_v62 = vpop.f32.mrb[37].mxu1  ;;  %v2034_v61 = vld [vmem:[%s5924_s16 + $0x60] sm:$0xff] }
 0xb6c   : > { %v1916_v63 = vpop.f32.mrb[38].mxu1  ;;  %v2027_v62 = vld [vmem:[%s5924_s16 + $0x28] sm:$0xff] }
 0xb6d   : > { %v4682_v0 = vpop.f32.mrb[39].mxu1  ;;  %v2035_v63 = vld [vmem:[%s5924_s16 + $0x68] sm:$0xff] }
 0xb6e   : > { %v4179_v0 = vcombine.low %v2040_v52, %v2048_v53  ;;  %v4748_v52 = vld [vmem:[%s5926_s18 + $0x28] sm:$0xff]  }
 0xb6f   : > { %v4749_v53 = vld [vmem:[%s5926_s18 + $0xa8] sm:$0xff]  }
 0xbcd   : > { %v1689_v3 = vpop.permute.xlu0 %1688 }
 0xbce   : > { %1691 = vst.msk [vmem:[#allocation2] sm:$0xff] %vm996_vm4, %v1689_v3  ;;  %v4181_v3 = vcombine.low %v2041_v54, %v2049_v55  ;;  %v4750_v54 = vld [vmem:[%s5926_s18 + $0x70] sm:$0xff]  }
 0xbcf   : > { %v4751_v55 = vld [vmem:[%s5926_s18 + $0xf0] sm:$0xff]  }
 0xbd5   : > { %v1805_v2 = vpop.permute.xlu1 %1804 }
 0xbd6   : > { %1807 = vst.msk [vmem:[#allocation2] sm:$0xff] %vm1113_vm5, %v1805_v2  ;;  %v4168_v2 = vcombine.high %v2026_v60, %v2034_v61 }
 0xbdd   : > { %v1921_v1 = vpop.permute.xlu0 %1920 }
 0xbde   : > { %1923 = vst.msk [vmem:[#allocation2] sm:$0xff] %vm1230_vm6, %v1921_v1  ;;  %v4170_v1 = vcombine.high %v2027_v62, %v2035_v63 }
 0xbe5   : > { %v1924_v4 = vld [vmem:[#allocation2] sm:$0xff] }
 0xbe6   : > { %v1930_v5 = vpack.c.bf16 %v1924_v4, %v1924_v4  ;;  %v2042_v4 = vld [vmem:[%s5924_s16 + $0xa0] sm:$0xff] }
 0xbe8   : > { %4688 = vmatmul.mubr.msk.bf16.vlgmr.msra.gmra.mrb[40].mxu0 %vm723_vm1, %v1930_v5  ;;  %v2050_v5 = vld [vmem:[%s5924_s16 + $0xe0] sm:$0xff] }
 0xbe9   : > { %2375 = vmatprep.mubr.bf16.mxu0 %v4916_v38 }
 0xcbb   : > { %v1986_v7 = vpop.f32.mrb[40].mxu0 }
 0xcbc   : > { %v1987_v8 = vadd.f32 %v4153_v6, %v1986_v7  ;;  %v4689_v10 = vpop.f32.mrb[41].mxu0  ;;  %v2043_v6 = vld [vmem:[%s5924_s16 + $0xa8] sm:$0xff] }
 0xcbd   : > { %v1989_v11 = vpop.f32.mrb[42].mxu0  ;;  %v2051_v7 = vld [vmem:[%s5924_s16 + $0xe8] sm:$0xff]  ;;  %v4169_v10 = vcombine.low %v2027_v62, %v2035_v63  ;;  %v4757_v62 = vld [vmem:[%s5926_s18 + $0xb8] sm:$0xff]   ;;  %v4758_v63 = vld [vmem:[%s5926_s18 + $0x140] sm:$0xff]  }
 0xcbe   : > { %v4690_v12 = vpop.f32.mrb[43].mxu0  ;;  %v1992_v13 = vadd.f32 %v1987_v8, %v5191_v9  ;;  %v2023_v9 = vld [vmem:[%s5924_s16 + $0x8] sm:$0xff]  ;;  %v4167_v8 = vcombine.low %v2026_v60, %v2034_v61  ;;  %v4184_v11 = vcombine.high %v2042_v4, %v2050_v5  ;;  %v4755_v60 = vld [vmem:[%s5926_s18 + $0xf8] sm:$0xff]  }
 0xcbf   : > { %v4161_v26 = vcombine.low %v2023_v9, %v2031_v24  ;;  %v4162_v27 = vcombine.high %v2023_v9, %v2031_v24  ;;  %v4186_v12 = vcombine.high %v2043_v6, %v2051_v7  ;;  %v2052_v9 = vld [vmem:[%s5924_s16 + $0xf0] sm:$0xff]  ;;  %v2053_v24 = vld [vmem:[%s5924_s16 + $0xf8] sm:$0xff] }
 0xcc0   : > { %v1995_v14 = vsel %vm723_vm1, %v1992_v13, 0.0  ;;  %v4190_v28 = vcombine.high %v2045_v23, %v2053_v24  ;;  %v4187_v29 = vcombine.low %v2044_v21, %v2052_v9  ;;  %v4189_v30 = vcombine.low %v2045_v23, %v2053_v24  ;;  %v4756_v61 = vld [vmem:[%s5926_s18 + $0x38] sm:$0xff]  }
 0xcc1   : > { %1996 = vadd.xlane.f32.xlu1 %v1995_v14  ;;  %2343 = vmatprep.subr.bf16.mxu0 %v4162_v27  ;;  %v2036_v14 = vld [vmem:[%s5924_s16 + $0x70] sm:$0xff]  ;;  %v4188_v27 = vcombine.high %v2044_v21, %v2052_v9 }
 0xcc2   : > { %2344 = vmatpush1.bf16.msra.mxu0 %v4161_v26 }
 0xcc3   : > { %2345 = vmatprep.subr.bf16.mxu0 %v4178_v35  ;;  %v4730_v35 = vld [vmem:[%s5926_s18 + $0x48] sm:$0xff]  }
 0xcc6   : > { %2346 = vmatpush1.bf16.msra.mxu0 %v4177_v34  ;;  %v4729_v34 = vld [vmem:[%s5926_s18 + $0x80] sm:$0xff]  }
 0xcc7   : > { %2425 = vmatprep.subr.bf16.mxu0 %v4166_v43  ;;  %v4739_v43 = vld [vmem:[%s5926_s18 + $0xd8] sm:$0xff]  }
 0xd4e   : > { %v1997_v15 = vpop.xlane.xlu1 %1996 }
 0xd4f   : > { %v1998_v16 = vmul.f32 0.03125, %v1997_v15  ;;  %v2029_v15 = vld [vmem:[%s5924_s16 + $0x38] sm:$0xff] }
 0xd51   : > { %v1999_v17 = vsub.f32 %v1992_v13, %v1998_v16  ;;  %v2028_v13 = vld [vmem:[%s5924_s16 + $0x30] sm:$0xff]  ;;  %v2037_v16 = vld [vmem:[%s5924_s16 + $0x78] sm:$0xff] }
 0xd52   : > { %v4174_v20 = vcombine.high %v2029_v15, %v2037_v16  ;;  %v4171_v25 = vcombine.low %v2028_v13, %v2036_v14  ;;  %v4173_v26 = vcombine.low %v2029_v15, %v2037_v16 }
 0xd53   : > { %v2000_v18 = vmul.f32 %v1999_v17, %v1999_v17 }
 0xd55   : > { %v2001_v19 = vsel %vm723_vm1, %v2000_v18, 0.0  ;;  %v4185_v18 = vcombine.low %v2043_v6, %v2051_v7 }
 0xd56   : > { %2002 = vadd.xlane.f32.xlu0 %v2001_v19  ;;  %v4172_v19 = vcombine.high %v2028_v13, %v2036_v14 }
 0xde3   : > { %v2003_v44 = vpop.xlane.xlu0 %2002 }
 0xde4   : > { %v2004_v45 = vmul.f32 0.03125, %v2003_v44  ;;  %v4740_v44 = vld [vmem:[%s5926_s18 + $0x18] sm:$0xff]  }
 0xde6   : > { %v2005_v46 = vadd.f32 1e-05, %v2004_v45  ;;  %v4741_v45 = vld [vmem:[%s5926_s18 + $0x98] sm:$0xff]  }
 0xde8   : > { %4888 = vrsqrt.f32 %v2005_v46  ;;  %v4742_v46 = vld [vmem:[%s5926_s18 + $0x60] sm:$0xff]  }
 0xdf2   : > { %v4889_v47 = vpop.eup %4888 }
 0xdf3   : > { %v2007_v49 = vmul.f32 %v4889_v47, %v1999_v17  ;;  %v4183_v17 = vcombine.low %v2042_v4, %v2050_v5  ;;  %v4743_v47 = vld [vmem:[%s5926_s18 + $0xe0] sm:$0xff]   ;;  %v5530_v4 = vld [vmem:[%s5925_s17 + $0x8] sm:$0xff] }
 0xdf5   : > { %v2014_v51 = vmul.f32 %v4157_v48, %v2007_v49  ;;  %v4744_v48 = vld [vmem:[%s5926_s18 + $0x20] sm:$0xff]  }
 0xdf6   : > { %v4745_v49 = vld [vmem:[%s5926_s18 + $0xa0] sm:$0xff]  }
 0xdf7   : > { %v5346_v56 = vadd.f32 %v4158_v50, %v2014_v51  ;;  %v4746_v50 = vld [vmem:[%s5926_s18 + $0x68] sm:$0xff]  }
 0xdf8   : > { %v4747_v51 = vld [vmem:[%s5926_s18 + $0xe8] sm:$0xff]  }
 0xdf9   : > { %v5350_v57 = vpack.c.bf16 %v5346_v56, %v5346_v56 }
 0xdfb   : > { %4191 = vmatmul.mubr.msk.bf16.vlgmr.msra.gmra.mrb[40].mxu1 %vm723_vm1, %v5350_v57  ;;  %4192 = vmatmul.mubr.msk.bf16.vlgmr.msra.gmra.mrb[44].mxu0 %vm723_vm1, %v5350_v57 }
 0xdfc   : > { %2385 = vmatpush1.bf16.msra.mxu1 %v4163_v41  ;;  %2426 = vmatpush1.bf16.msra.mxu0 %v4165_v42  ;;  %v4737_v41 = vld [vmem:[%s5926_s18 + $0x90] sm:$0xff]   ;;  %v4738_v42 = vld [vmem:[%s5926_s18 + $0x58] sm:$0xff]  }
 0xdfd   : > { %2386 = vmatprep.subr.bf16.mxu1 %v4180_v58  ;;  %2427 = vmatprep.subr.bf16.mxu0 %v4182_v59  ;;  %v4753_v58 = vld [vmem:[%s5926_s18 + $0xb0] sm:$0xff]   ;;  %v4754_v59 = vld [vmem:[%s5926_s18 + $0x78] sm:$0xff]  }
 0xdfe   : > { %2416 = vmatprep.mubr.bf16.mxu1 %v4916_v38  ;;  %2457 = vmatprep.mubr.bf16.mxu0 %v4916_v38 }
 0xe00   : > { %2387 = vmatpush1.bf16.msra.mxu1 %v4179_v0  ;;  %2428 = vmatpush1.bf16.msra.mxu0 %v4181_v3  ;;  %v4759_v0 = vld [vmem:[%s5926_s18 + $0x1c0] sm:$0xff]   ;;  %v2059_v3 = vlaneseq }
 0xe01   : > { %2466 = vmatprep.subr.bf16.mxu1 %v4168_v2  ;;  %2507 = vmatprep.subr.bf16.mxu0 %v4170_v1 }
 0xe02   : > { %v5524_v2 = vshrl.u32 %v2059_v3, 7  ;;  %v4769_v3 = vld [vmem:[%s5926_s18 + $0x190] sm:$0xff]  }
 0xe03   : > { %4193 = vmatmul.mubr.msk.bf16.vlgmr.msra.gmra.mrb[44].mxu1 %vm723_vm1, %v5350_v57  ;;  %4194 = vmatmul.mubr.msk.bf16.vlgmr.msra.gmra.mrb[48].mxu0 %vm723_vm1, %v5350_v57 }
 0xe04   : > { %2467 = vmatpush1.bf16.msra.mxu1 %v4167_v8  ;;  %2508 = vmatpush1.bf16.msra.mxu0 %v4169_v10  ;;  %v2085_v1 = vsub.s32 6, %v5524_v2  ;;  %v2061_v6 = vsub.s32 0, %v5524_v2  ;;  %v2069_v7 = vsub.s32 2, %v5524_v2  ;;  %v5542_v8 = vld [vmem:[%s5925_s17] sm:$0xff]  ;;  %v2065_v10 = vsub.s32 1, %v5524_v2 }
 0xe05   : > { %2468 = vmatprep.subr.bf16.mxu1 %v4184_v11  ;;  %2509 = vmatprep.subr.bf16.mxu0 %v4186_v12  ;;  %v2073_v11 = vsub.s32 3, %v5524_v2 }
 0xe06   : > { %2498 = vmatprep.mubr.bf16.mxu1 %v4916_v38  ;;  %2539 = vmatprep.mubr.bf16.mxu0 %v4916_v38  ;;  %v5535_v5 = vrot.slane %v5530_v4, %v2085_v1  ;;  %v2062_v12 = vrot.slane %v5542_v8, %v2061_v6  ;;  %v2070_v13 = vrot.slane %v5542_v8, %v2069_v7 }
 0xe07   : > { %v2066_v14 = vrot.slane %v5542_v8, %v2065_v10  ;;  %v2074_v15 = vrot.slane %v5542_v8, %v2073_v11 }
 0xe08   : > { %2469 = vmatpush1.bf16.msra.mxu1 %v4183_v17  ;;  %2510 = vmatpush1.bf16.msra.mxu0 %v4185_v18 }
 0xe09   : > { %2548 = vmatprep.subr.bf16.mxu1 %v4172_v19  ;;  %2589 = vmatprep.subr.bf16.mxu0 %v4174_v20 }
 0xe0b   : > { %4195 = vmatmul.mubr.msk.bf16.vlgmr.msra.gmra.mrb[48].mxu1 %vm723_vm1, %v5350_v57  ;;  %4196 = vmatmul.mubr.msk.bf16.vlgmr.msra.gmra.mrb[52].mxu0 %vm723_vm1, %v5350_v57 }
 0xe0c   : > { %2549 = vmatpush1.bf16.msra.mxu1 %v4171_v25  ;;  %2590 = vmatpush1.bf16.msra.mxu0 %v4173_v26  ;;  %v2081_v26 = vsub.s32 5, %v5524_v2 }
 0xe0d   : > { %2550 = vmatprep.subr.bf16.mxu1 %v4188_v27  ;;  %2591 = vmatprep.subr.bf16.mxu0 %v4190_v28  ;;  %v2089_v27 = vsub.s32 7, %v5524_v2 }
 0xe0e   : > { %2580 = vmatprep.mubr.bf16.mxu1 %v4916_v38  ;;  %2621 = vmatprep.mubr.bf16.mxu0 %v4916_v38  ;;  %v4734_v38 = vld [vmem:[%s5926_s18 + $0x50] sm:$0xff]  }
 0xe10   : > { %2551 = vmatpush1.bf16.msra.mxu1 %v4187_v29  ;;  %2592 = vmatpush1.bf16.msra.mxu0 %v4189_v30 }
 0xe11   : > { %4379 = vmatprep.subr.bf16.mxu1 %v4726_v31  ;;  %4401 = vmatprep.subr.bf16.mxu0 %v4727_v32 }
 0xe13   : > { %4197 = vmatmul.mubr.msk.bf16.vlgmr.msra.gmra.mrb[52].mxu1 %vm723_vm1, %v5350_v57  ;;  %4198 = vmatmul.mubr.msk.bf16.vlgmr.msra.gmra.mrb[56].mxu0 %vm723_vm1, %v5350_v57  ;;  %v4752_v57 = vld [vmem:[%s5926_s18 + $0x30] sm:$0xff]  }
 0xe14   : > { %4380 = vmatpush3.bf16.msra.mxu1 %v4728_v33  ;;  %4402 = vmatpush3.bf16.msra.mxu0 %v4729_v34 }
 0xe15   : > { %4381 = vmatprep.subr.bf16.mxu1 %v4730_v35  ;;  %4403 = vmatprep.subr.bf16.mxu0 %v4731_v36  ;;  %v2082_v36 = vrot.slane %v5542_v8, %v2081_v26 }
 0xe18   : > { %4382 = vmatpush3.bf16.msra.mxu1 %v4732_v37  ;;  %4404 = vmatpush3.bf16.msra.mxu0 %v4733_v22  ;;  %v2090_v37 = vrot.slane %v5542_v8, %v2089_v27  ;;  %v4760_v22 = vld [vmem:[%s5926_s18 + $0x100] sm:$0xff]  }
 0xe19   : > { %4383 = vmatprep.subr.bf16.mxu1 %v4734_v38  ;;  %4405 = vmatprep.subr.bf16.mxu0 %v4735_v39  ;;  %v4761_v38 = vld [vmem:[%s5926_s18 + $0x180] sm:$0xff]  }
 0xe1c   : > { %4384 = vmatpush3.bf16.msra.mxu1 %v4736_v40  ;;  %4406 = vmatpush3.bf16.msra.mxu0 %v4737_v41  ;;  %v4762_v41 = vld [vmem:[%s5926_s18 + $0x148] sm:$0xff]  }
 0xe1d   : > { %4385 = vmatprep.subr.bf16.mxu1 %v4738_v42  ;;  %4407 = vmatprep.subr.bf16.mxu0 %v4739_v43  ;;  %v4763_v42 = vld [vmem:[%s5926_s18 + $0x1c8] sm:$0xff]  }
 0xe20   : > { %4386 = vmatpush3.bf16.msra.mxu1 %v4740_v44  ;;  %4408 = vmatpush3.bf16.msra.mxu0 %v4741_v45 }
 0xe21   : > { %4387 = vmatprep.subr.bf16.mxu1 %v4742_v46  ;;  %4409 = vmatprep.subr.bf16.mxu0 %v4743_v47 }
 0xe24   : > { %4388 = vmatpush3.bf16.msra.mxu1 %v4744_v48  ;;  %4410 = vmatpush3.bf16.msra.mxu0 %v4745_v49 }
 0xe25   : > { %4389 = vmatprep.subr.bf16.mxu1 %v4746_v50  ;;  %4411 = vmatprep.subr.bf16.mxu0 %v4747_v51  ;;  %v4764_v51 = vld [vmem:[%s5926_s18 + $0x108] sm:$0xff]  }
 0xe28   : > { %4390 = vmatpush3.bf16.msra.mxu1 %v4748_v52  ;;  %4412 = vmatpush3.bf16.msra.mxu0 %v4749_v53  ;;  %v4765_v52 = vld [vmem:[%s5926_s18 + $0x188] sm:$0xff]  }
 0xe29   : > { %4391 = vmatprep.subr.bf16.mxu1 %v4750_v54  ;;  %4413 = vmatprep.subr.bf16.mxu0 %v4751_v55  ;;  %v4766_v55 = vld [vmem:[%s5926_s18 + $0x150] sm:$0xff]  }
 0xe2c   : > { %4392 = vmatpush3.bf16.msra.mxu1 %v4752_v57  ;;  %4414 = vmatpush3.bf16.msra.mxu0 %v4753_v58  ;;  %v4767_v57 = vld [vmem:[%s5926_s18 + $0x1d0] sm:$0xff]  }
 0xe2d   : > { %4393 = vmatprep.subr.bf16.mxu1 %v4754_v59  ;;  %4415 = vmatprep.subr.bf16.mxu0 %v4755_v60  ;;  %v2094_v60 = vrot.slane %v5530_v4, %v2061_v6  ;;  %v4770_v6 = vld [vmem:[%s5926_s18 + $0x158] sm:$0xff]  }
 0xe30   : > { %4394 = vmatpush3.bf16.msra.mxu1 %v4756_v61  ;;  %4416 = vmatpush3.bf16.msra.mxu0 %v4757_v62  ;;  %v2102_v61 = vrot.slane %v5530_v4, %v2069_v7  ;;  %v4771_v7 = vld [vmem:[%s5926_s18 + $0x1d8] sm:$0xff]  }
 0xe31   : > { %4423 = vmatprep.subr.bf16.mxu1 %v4758_v63  ;;  %4445 = vmatprep.subr.bf16.mxu0 %v4759_v0  ;;  %v4768_v0 = vld [vmem:[%s5926_s18 + $0x110] sm:$0xff]  }
 0xece   : > { %v2336_v16 = vpop.f32.mrb[40].mxu1  ;;  %v2377_v17 = vpop.f32.mrb[44].mxu0 }
 0xecf   : > { %v2337_v18 = vadd.f32 %v2336_v16, %v2062_v12  ;;  %v2378_v19 = vadd.f32 %v2377_v17, %v2070_v13  ;;  %v2338_v20 = vpop.f32.mrb[41].mxu1  ;;  %v2379_v21 = vpop.f32.mrb[45].mxu0 }
 0xed0   : > { %v2339_v9 = vadd.f32 %v2338_v20, %v2066_v14  ;;  %v2380_v23 = vadd.f32 %v2379_v21, %v2074_v15  ;;  %v2340_v24 = vpop.f32.mrb[42].mxu1  ;;  %v2381_v25 = vpop.f32.mrb[46].mxu0  ;;  %v4772_v20 = vld [vmem:[%s5926_s18 + $0x118] sm:$0xff]  }
 0xed1   : > { %v2630_v28 = vmax.f32 %v2337_v18, 0.0  ;;  %v2632_v29 = vmax.f32 %v2378_v19, 0.0  ;;  %v2341_v30 = vpop.f32.mrb[43].mxu1  ;;  %v2382_v31 = vpop.f32.mrb[47].mxu0  ;;  %v4773_v21 = vld [vmem:[%s5926_s18 + $0x198] sm:$0xff]   ;;  %v4774_v25 = vld [vmem:[%s5926_s18 + $0x160] sm:$0xff]  }
 0xed2   : > { %v2631_v32 = vmax.f32 %v2339_v9, 0.0  ;;  %v2633_v33 = vmax.f32 %v2380_v23, 0.0  ;;  %v2077_v9 = vsub.s32 4, %v5524_v2  ;;  %v4776_v30 = vld [vmem:[%s5926_s18 + $0x120] sm:$0xff]   ;;  %v4819_v2 = vld [vmem:[%s5926_s18 + $0x2f8] sm:$0xff]  }
 0xed3   : > { %v2903_v39 = vpack.c.bf16 %v2630_v28, %v2630_v28  ;;  %v2905_v40 = vpack.c.bf16 %v2632_v29, %v2632_v29  ;;  %v4775_v28 = vld [vmem:[%s5926_s18 + $0x1e0] sm:$0xff]  }
 0xed4   : > { %v2904_v34 = vpack.c.bf16 %v2631_v32, %v2631_v32  ;;  %v2906_v35 = vpack.c.bf16 %v2633_v33, %v2633_v33  ;;  %v2110_v29 = vrot.slane %v5530_v4, %v2077_v9  ;;  %v4777_v31 = vld [vmem:[%s5926_s18 + $0x1a0] sm:$0xff]   ;;  %v4778_v32 = vld [vmem:[%s5926_s18 + $0x168] sm:$0xff]  }
 0xed5   : > { %v4779_v33 = vld [vmem:[%s5926_s18 + $0x1e8] sm:$0xff]  }
 0xed6   : > { %v5574_v43 = vpop.f32.mrb[44].mxu1  ;;  %v5576_v44 = vpop.f32.mrb[48].mxu0  ;;  %3725 = vmatprep.mubr.bf16.mxu1 %v2904_v34  ;;  %3765 = vmatprep.mubr.bf16.mxu0 %v2906_v35 }
 0xed7   : > { %v2420_v45 = vpop.f32.mrb[45].mxu1  ;;  %v2461_v46 = vpop.f32.mrb[49].mxu0  ;;  %3726 = vmatmul.mubr.bf16.vlgmr.msra.gmra.mrb[56].mxu1 %v2903_v39  ;;  %3766 = vmatmul.mubr.bf16.vlgmr.msra.gmra.mrb[60].mxu0 %v2905_v40 }
 0xed8   : > { %v2421_v47 = vadd.f32 %v2420_v45, %v2082_v36  ;;  %v2462_v48 = vadd.f32 %v2461_v46, %v2090_v37  ;;  %4424 = vmatpush3.bf16.msra.mxu1 %v4760_v22  ;;  %4446 = vmatpush3.bf16.msra.mxu0 %v4761_v38  ;;  %v2422_v49 = vpop.f32.mrb[46].mxu1  ;;  %v2463_v50 = vpop.f32.mrb[50].mxu0  ;;  %v2078_v45 = vrot.slane %v5542_v8, %v2077_v9  ;;  %v4801_v9 = vld [vmem:[%s5926_s18 + $0x290] sm:$0xff]  }
 0xed9   : > { %v2423_v53 = vpop.f32.mrb[47].mxu1  ;;  %v2464_v54 = vpop.f32.mrb[51].mxu0  ;;  %4425 = vmatprep.subr.bf16.mxu1 %v4762_v41  ;;  %4447 = vmatprep.subr.bf16.mxu0 %v4763_v42  ;;  %v4780_v41 = vld [vmem:[%s5926_s18 + $0x128] sm:$0xff]   ;;  %v4783_v49 = vld [vmem:[%s5926_s18 + $0x1f0] sm:$0xff]   ;;  %v2098_v50 = vrot.slane %v5530_v4, %v2065_v10  ;;  %v4786_v10 = vld [vmem:[%s5926_s18 + $0x178] sm:$0xff]  }
 0xeda   : > { %v2635_v58 = vmax.f32 %v2421_v47, 0.0  ;;  %v2637_v59 = vmax.f32 %v2462_v48, 0.0  ;;  %v4781_v42 = vld [vmem:[%s5926_s18 + $0x1a8] sm:$0xff]   ;;  %v4782_v48 = vld [vmem:[%s5926_s18 + $0x170] sm:$0xff]  }
 0xedc   : > { %v2908_v62 = vpack.c.bf16 %v2635_v58, %v2635_v58  ;;  %v2910_v63 = vpack.c.bf16 %v2637_v59, %v2637_v59  ;;  %4426 = vmatpush3.bf16.msra.mxu1 %v4764_v51  ;;  %4448 = vmatpush3.bf16.msra.mxu0 %v4765_v52  ;;  %v4785_v51 = vld [vmem:[%s5926_s18 + $0x1b0] sm:$0xff]   ;;  %v2419_v52 = vadd.f32 %v5574_v43, %v2078_v45  ;;  %v4788_v43 = vld [vmem:[%s5926_s18 + $0x138] sm:$0xff]   ;;  %v4790_v59 = vld [vmem:[%s5926_s18 + $0x240] sm:$0xff]  }
 0xedd   : > { %4427 = vmatprep.subr.bf16.mxu1 %v4766_v55  ;;  %4449 = vmatprep.subr.bf16.mxu0 %v4767_v57  ;;  %v2122_v45 = vrot.slane %v5530_v4, %v2089_v27  ;;  %v4820_v27 = vld [vmem:[%s5926_s18 + $0x238] sm:$0xff]  }
 0xede   : > { %v2500_v12 = vpop.f32.mrb[48].mxu1  ;;  %v2541_v13 = vpop.f32.mrb[52].mxu0  ;;  %3805 = vmatprep.mubr.bf16.mxu1 %v2908_v62  ;;  %3845 = vmatprep.mubr.bf16.mxu0 %v2910_v63  ;;  %v2634_v57 = vmax.f32 %v2419_v52, 0.0  ;;  %v4792_v63 = vld [vmem:[%s5926_s18 + $0x200] sm:$0xff]  }
 0xedf   : > { %v5604_v14 = vadd.f32 %v2500_v12, %v2094_v60  ;;  %v5606_v15 = vadd.f32 %v2541_v13, %v2102_v61  ;;  %v2502_v16 = vpop.f32.mrb[49].mxu1  ;;  %v2543_v17 = vpop.f32.mrb[53].mxu0  ;;  %v4791_v60 = vld [vmem:[%s5926_s18 + $0x2c0] sm:$0xff]   ;;  %v4794_v12 = vld [vmem:[%s5926_s18 + $0x248] sm:$0xff]  }
 0xee0   : > { %4428 = vmatpush3.bf16.msra.mxu1 %v4768_v0  ;;  %4450 = vmatpush3.bf16.msra.mxu0 %v4769_v3  ;;  %v2504_v18 = vpop.f32.mrb[50].mxu1  ;;  %v2545_v19 = vpop.f32.mrb[54].mxu0  ;;  %v2503_v54 = vadd.f32 %v2502_v16, %v2098_v50  ;;  %v2907_v0 = vpack.c.bf16 %v2634_v57, %v2634_v57  ;;  %v4795_v13 = vld [vmem:[%s5926_s18 + $0x2c8] sm:$0xff]   ;;  %v4822_v50 = vld [vmem:[%s5926_s18 + $0x340] sm:$0xff]   ;;  %v4831_v57 = vld [vmem:[%s5926_s18 + $0x3d0] sm:$0xff]  }
 0xee1   : > { %v2505_v23 = vpop.f32.mrb[51].mxu1  ;;  %v2546_v24 = vpop.f32.mrb[55].mxu0  ;;  %4429 = vmatprep.subr.bf16.mxu1 %v4770_v6  ;;  %4451 = vmatprep.subr.bf16.mxu0 %v4771_v7  ;;  %v4793_v6 = vld [vmem:[%s5926_s18 + $0x280] sm:$0xff]   ;;  %v4797_v18 = vld [vmem:[%s5926_s18 + $0x288] sm:$0xff]   ;;  %v4798_v19 = vld [vmem:[%s5926_s18 + $0x250] sm:$0xff]  }
 0xee2   : > { %v2639_v61 = vmax.f32 %v2503_v54, 0.0  ;;  %v4802_v23 = vld [vmem:[%s5926_s18 + $0x258] sm:$0xff]   ;;  %v4825_v52 = vld [vmem:[%s5926_s18 + $0x380] sm:$0xff]  }
 0xee3   : > { %v4803_v24 = vld [vmem:[%s5926_s18 + $0x2d8] sm:$0xff]  }
 0xee4   : > { %4430 = vmatpush3.bf16.msra.mxu1 %v4772_v20  ;;  %4452 = vmatpush3.bf16.msra.mxu0 %v4773_v21  ;;  %v2912_v7 = vpack.c.bf16 %v2639_v61, %v2639_v61  ;;  %v4799_v20 = vld [vmem:[%s5926_s18 + $0x2d0] sm:$0xff]   ;;  %v4835_v61 = vld [vmem:[%s5926_s18 + $0x3d8] sm:$0xff]  }
 0xee5   : > { %4431 = vmatprep.subr.bf16.mxu1 %v4774_v25  ;;  %4453 = vmatprep.subr.bf16.mxu0 %v4775_v28  ;;  %v4800_v21 = vld [vmem:[%s5926_s18 + $0x210] sm:$0xff]   ;;  %v4804_v25 = vld [vmem:[%s5926_s18 + $0x218] sm:$0xff]  }
 0xee6   : > { %v2582_v34 = vpop.f32.mrb[52].mxu1  ;;  %v2623_v35 = vpop.f32.mrb[56].mxu0  ;;  %v4805_v28 = vld [vmem:[%s5926_s18 + $0x298] sm:$0xff]  }
 0xee7   : > { %v5634_v36 = vadd.f32 %v2582_v34, %v2110_v29  ;;  %v5637_v37 = vadd.f32 %v2623_v35, %v5535_v5  ;;  %v5639_v22 = vpop.f32.mrb[53].mxu1  ;;  %v5641_v38 = vpop.f32.mrb[57].mxu0  ;;  %v2086_v5 = vrot.slane %v5542_v8, %v2085_v1  ;;  %v2106_v1 = vrot.slane %v5530_v4, %v2073_v11  ;;  %v4784_v8 = vld [vmem:[%s5926_s18 + $0x130] sm:$0xff]   ;;  %v4787_v11 = vld [vmem:[%s5926_s18 + $0x1f8] sm:$0xff]   ;;  %v4806_v29 = vld [vmem:[%s5926_s18 + $0x260] sm:$0xff]  }
 0xee8   : > { %4432 = vmatpush3.bf16.msra.mxu1 %v4776_v30  ;;  %4454 = vmatpush3.bf16.msra.mxu0 %v4777_v31  ;;  %v2586_v39 = vpop.f32.mrb[54].mxu1  ;;  %v2627_v40 = vpop.f32.mrb[58].mxu0  ;;  %v4807_v30 = vld [vmem:[%s5926_s18 + $0x2e0] sm:$0xff]   ;;  %v4811_v34 = vld [vmem:[%s5926_s18 + $0x2e8] sm:$0xff]  }
 0xee9   : > { %v2587_v46 = vpop.f32.mrb[55].mxu1  ;;  %v2628_v47 = vpop.f32.mrb[59].mxu0  ;;  %4433 = vmatprep.subr.bf16.mxu1 %v4778_v32  ;;  %4455 = vmatprep.subr.bf16.mxu0 %v4779_v33  ;;  %v2460_v53 = vadd.f32 %v5576_v44, %v2086_v5  ;;  %v2544_v55 = vadd.f32 %v2543_v17, %v2106_v1  ;;  %v4789_v44 = vld [vmem:[%s5926_s18 + $0x1b8] sm:$0xff]   ;;  %v4796_v17 = vld [vmem:[%s5926_s18 + $0x208] sm:$0xff]   ;;  %v4808_v31 = vld [vmem:[%s5926_s18 + $0x220] sm:$0xff]  }
 0xeea   : > { %v4809_v32 = vld [vmem:[%s5926_s18 + $0x2a0] sm:$0xff]   ;;  %v4810_v33 = vld [vmem:[%s5926_s18 + $0x268] sm:$0xff]   ;;  %v4814_v40 = vld [vmem:[%s5926_s18 + $0x270] sm:$0xff]  }
 0xeeb   : > { %v2636_v58 = vmax.f32 %v2460_v53, 0.0  ;;  %v2641_v62 = vmax.f32 %v2544_v55, 0.0  ;;  %v4812_v35 = vld [vmem:[%s5926_s18 + $0x228] sm:$0xff]   ;;  %v4816_v5 = vld [vmem:[%s5926_s18 + $0x230] sm:$0xff]   ;;  %v4818_v47 = vld [vmem:[%s5926_s18 + $0x278] sm:$0xff]  }
 0xeec   : > { %4434 = vmatpush3.bf16.msra.mxu1 %v4780_v41  ;;  %4456 = vmatpush3.bf16.msra.mxu0 %v4781_v42  ;;  %v4813_v39 = vld [vmem:[%s5926_s18 + $0x2a8] sm:$0xff]   ;;  %v4815_v41 = vld [vmem:[%s5926_s18 + $0x2f0] sm:$0xff]   ;;  %v2114_v42 = vrot.slane %v5530_v4, %v2081_v26  ;;  %v2626_v26 = vadd.f32 %v5641_v38, %v2122_v45  ;;  %v4823_v38 = vld [vmem:[%s5926_s18 + $0x3c0] sm:$0xff]  }
 0xeed   : > { %4435 = vmatprep.subr.bf16.mxu1 %v4782_v48  ;;  %4457 = vmatprep.subr.bf16.mxu0 %v4783_v49  ;;  %v2909_v3 = vpack.c.bf16 %v2636_v58, %v2636_v58  ;;  %v2914_v16 = vpack.c.bf16 %v2641_v62, %v2641_v62  ;;  %v4817_v46 = vld [vmem:[%s5926_s18 + $0x2b0] sm:$0xff]   ;;  %v2638_v48 = vmax.f32 %v5604_v14, 0.0  ;;  %v4821_v49 = vld [vmem:[%s5926_s18 + $0x2b8] sm:$0xff]   ;;  %v4824_v14 = vld [vmem:[%s5926_s18 + $0x300] sm:$0xff]  }
 0xeee   : > { %v2585_v4 = vadd.f32 %v5639_v22, %v2114_v42  ;;  %v2640_v22 = vmax.f32 %v5606_v15, 0.0  ;;  %v4826_v53 = vld [vmem:[%s5926_s18 + $0x348] sm:$0xff]   ;;  %v4832_v58 = vld [vmem:[%s5926_s18 + $0x310] sm:$0xff]   ;;  %v4836_v62 = vld [vmem:[%s5926_s18 + $0x318] sm:$0xff]  }
 0xeef   : > { %v4828_v55 = vld [vmem:[%s5926_s18 + $0x308] sm:$0xff]  }
 0xef0   : > { %4436 = vmatpush3.bf16.msra.mxu1 %v4784_v8  ;;  %4458 = vmatpush3.bf16.msra.mxu0 %v4785_v51  ;;  %v2643_v1 = vmax.f32 %v2585_v4, 0.0  ;;  %v2645_v8 = vmax.f32 %v2626_v26, 0.0  ;;  %v2911_v51 = vpack.c.bf16 %v2638_v48, %v2638_v48  ;;  %v2913_v15 = vpack.c.bf16 %v2640_v22, %v2640_v22 }
 0xef1   : > { %4437 = vmatprep.subr.bf16.mxu1 %v4786_v10  ;;  %4459 = vmatprep.subr.bf16.mxu0 %v4787_v11  ;;  %v4827_v11 = vld [vmem:[%s5926_s18 + $0x3c8] sm:$0xff]  }
 0xef2   : > { %v2916_v10 = vpack.c.bf16 %v2643_v1, %v2643_v1  ;;  %v2918_v54 = vpack.c.bf16 %v2645_v8, %v2645_v8 }
 0xef4   : > { %4438 = vmatpush3.bf16.msra.mxu1 %v4788_v43  ;;  %4460 = vmatpush3.bf16.msra.mxu0 %v4789_v44  ;;  %v4829_v43 = vld [vmem:[%s5926_s18 + $0x388] sm:$0xff]   ;;  %v4830_v44 = vld [vmem:[%s5926_s18 + $0x350] sm:$0xff]  }
 0xef5   : > { %4467 = vmatprep.subr.bf16.mxu1 %v4790_v59  ;;  %4489 = vmatprep.subr.bf16.mxu0 %v4791_v60  ;;  %v4833_v59 = vld [vmem:[%s5926_s18 + $0x390] sm:$0xff]   ;;  %v4834_v60 = vld [vmem:[%s5926_s18 + $0x358] sm:$0xff]  }
 0xef7   : > { %3806 = vmatmul.mubr.bf16.vlgmr.msra.gmra.mrb[60].mxu1 %v2907_v0  ;;  %3846 = vmatmul.mubr.bf16.vlgmr.msra.gmra.mrb[64].mxu0 %v2909_v3  ;;  %v4838_v0 = vld [vmem:[%s5926_s18 + $0x360] sm:$0xff]  }
 0xef8   : > { %4468 = vmatpush3.bf16.msra.mxu1 %v4792_v63  ;;  %3885 = vmatprep.mubr.bf16.mxu1 %v2912_v7  ;;  %v4837_v63 = vld [vmem:[%s5926_s18 + $0x398] sm:$0xff]   ;;  %v4839_v3 = vld [vmem:[%s5926_s18 + $0x3e0] sm:$0xff]  }
 0xef9   : > { %4490 = vmatpush3.bf16.msra.mxu0 %v4793_v6  ;;  %3925 = vmatprep.mubr.bf16.mxu0 %v2914_v16  ;;  %v4840_v6 = vld [vmem:[%s5926_s18 + $0x320] sm:$0xff]   ;;  %v4844_v16 = vld [vmem:[%s5926_s18 + $0x328] sm:$0xff]  }
 0xefa   : > { %4469 = vmatprep.subr.bf16.mxu1 %v4794_v12  ;;  %4491 = vmatprep.subr.bf16.mxu0 %v4795_v13  ;;  %v4841_v7 = vld [vmem:[%s5926_s18 + $0x3a0] sm:$0xff]   ;;  %v4842_v12 = vld [vmem:[%s5926_s18 + $0x368] sm:$0xff]  }
 0xefb   : > { %v4843_v13 = vld [vmem:[%s5926_s18 + $0x3e8] sm:$0xff]  }
 0xefc   : > { %4470 = vmatpush3.bf16.msra.mxu1 %v4796_v17  ;;  %v4845_v17 = vld [vmem:[%s5926_s18 + $0x3a8] sm:$0xff]  }
 0xefd   : > { %4492 = vmatpush3.bf16.msra.mxu0 %v4797_v18  ;;  %4471 = vmatprep.subr.bf16.mxu1 %v4798_v19  ;;  %v4846_v18 = vld [vmem:[%s5926_s18 + $0x370] sm:$0xff]  }
 0xefe   : > { %4493 = vmatprep.subr.bf16.mxu0 %v4799_v20  ;;  %v4847_v19 = vld [vmem:[%s5926_s18 + $0x3f0] sm:$0xff]  }
 0xeff   : > { %v4848_v20 = vld [vmem:[%s5926_s18 + $0x330] sm:$0xff]  }
 0xf00   : > { %4472 = vmatpush3.bf16.msra.mxu1 %v4800_v21  ;;  %v4849_v21 = vld [vmem:[%s5926_s18 + $0x3b0] sm:$0xff]  }
 0xf01   : > { %4494 = vmatpush3.bf16.msra.mxu0 %v4801_v9  ;;  %4473 = vmatprep.subr.bf16.mxu1 %v4802_v23  ;;  %v4850_v9 = vld [vmem:[%s5926_s18 + $0x378] sm:$0xff]  }
 0xf02   : > { %4495 = vmatprep.subr.bf16.mxu0 %v4803_v24  ;;  %v4851_v23 = vld [vmem:[%s5926_s18 + $0x3f8] sm:$0xff]  }
 0xf03   : > { %v4852_v24 = vld [vmem:[%s5926_s18 + $0x338] sm:$0xff]  }
 0xf04   : > { %4474 = vmatpush3.bf16.msra.mxu1 %v4804_v25  ;;  %v2642_v25 = vmax.f32 %v5634_v36, 0.0  ;;  %v4199_v36 = vld [vmem:[%s5927_s19] ss:$0 sm:$0xff] }
 0xf05   : > { %4496 = vmatpush3.bf16.msra.mxu0 %v4805_v28  ;;  %4475 = vmatprep.subr.bf16.mxu1 %v4806_v29  ;;  %v4853_v28 = vld [vmem:[%s5926_s18 + $0x3b8] sm:$0xff]   ;;  %v2644_v29 = vmax.f32 %v5637_v37, 0.0 }
 0xf06   : > { %4497 = vmatprep.subr.bf16.mxu0 %v4807_v30  ;;  %v2915_v30 = vpack.c.bf16 %v2642_v25, %v2642_v25 }
 0xf08   : > { %4476 = vmatpush3.bf16.msra.mxu1 %v4808_v31  ;;  %v2917_v31 = vpack.c.bf16 %v2644_v29, %v2644_v29 }
 0xf09   : > { %4498 = vmatpush3.bf16.msra.mxu0 %v4809_v32  ;;  %4477 = vmatprep.subr.bf16.mxu1 %v4810_v33 }
 0xf0a   : > { %4499 = vmatprep.subr.bf16.mxu0 %v4811_v34 }
 0xf0c   : > { %4478 = vmatpush3.bf16.msra.mxu1 %v4812_v35 }
 0xf0d   : > { %4500 = vmatpush3.bf16.msra.mxu0 %v4813_v39  ;;  %4479 = vmatprep.subr.bf16.mxu1 %v4814_v40 }
 0xf0e   : > { %4501 = vmatprep.subr.bf16.mxu0 %v4815_v41 }
 0xf10   : > { %4480 = vmatpush3.bf16.msra.mxu1 %v4816_v5 }
 0xf11   : > { %4502 = vmatpush3.bf16.msra.mxu0 %v4817_v46  ;;  %4481 = vmatprep.subr.bf16.mxu1 %v4818_v47 }
 0xf12   : > { %4503 = vmatprep.subr.bf16.mxu0 %v4819_v2 }
 0xf14   : > { %4482 = vmatpush3.bf16.msra.mxu1 %v4820_v27 }
 0xf15   : > { %4504 = vmatpush3.bf16.msra.mxu0 %v4821_v49  ;;  %4511 = vmatprep.subr.bf16.mxu1 %v4822_v50 }
 0xf16   : > { %4533 = vmatprep.subr.bf16.mxu0 %v4823_v38 }
 0xf17   : > { %3886 = vmatmul.mubr.bf16.vlgmr.msra.gmra.mrb[64].mxu1 %v2911_v51 }
 0xf18   : > { %3926 = vmatmul.mubr.bf16.vlgmr.msra.gmra.mrb[68].mxu0 %v2913_v15  ;;  %4512 = vmatpush3.bf16.msra.mxu1 %v4824_v14 }
 0xf19   : > { %3965 = vmatprep.mubr.bf16.mxu1 %v2916_v10  ;;  %4534 = vmatpush3.bf16.msra.mxu0 %v4825_v52 }
 0xf1a   : > { %4005 = vmatprep.mubr.bf16.mxu0 %v2918_v54  ;;  %4513 = vmatprep.subr.bf16.mxu1 %v4826_v53 }
 0xf1b   : > { %4535 = vmatprep.subr.bf16.mxu0 %v4827_v11 }
 0xf1c   : > { %4514 = vmatpush3.bf16.msra.mxu1 %v4828_v55 }
 0xf1d   : > { %4536 = vmatpush3.bf16.msra.mxu0 %v4829_v43  ;;  %4515 = vmatprep.subr.bf16.mxu1 %v4830_v44 }
 0xf1e   : > { %4537 = vmatprep.subr.bf16.mxu0 %v4831_v57 }
 0xf20   : > { %4516 = vmatpush3.bf16.msra.mxu1 %v4832_v58 }
 0xf21   : > { %4538 = vmatpush3.bf16.msra.mxu0 %v4833_v59  ;;  %4517 = vmatprep.subr.bf16.mxu1 %v4834_v60 }
 0xf22   : > { %4539 = vmatprep.subr.bf16.mxu0 %v4835_v61 }
 0xf24   : > { %4518 = vmatpush3.bf16.msra.mxu1 %v4836_v62 }
 0xf25   : > { %4540 = vmatpush3.bf16.msra.mxu0 %v4837_v63  ;;  %4519 = vmatprep.subr.bf16.mxu1 %v4838_v0 }
 0xf26   : > { %4541 = vmatprep.subr.bf16.mxu0 %v4839_v3 }
 0xf28   : > { %4520 = vmatpush3.bf16.msra.mxu1 %v4840_v6 }
 0xf29   : > { %4542 = vmatpush3.bf16.msra.mxu0 %v4841_v7  ;;  %4521 = vmatprep.subr.bf16.mxu1 %v4842_v12 }
 0xf2a   : > { %4543 = vmatprep.subr.bf16.mxu0 %v4843_v13 }
 0xf2c   : > { %4522 = vmatpush3.bf16.msra.mxu1 %v4844_v16 }
 0xf2d   : > { %4544 = vmatpush3.bf16.msra.mxu0 %v4845_v17  ;;  %4523 = vmatprep.subr.bf16.mxu1 %v4846_v18 }
 0xf2e   : > { %4545 = vmatprep.subr.bf16.mxu0 %v4847_v19 }
 0xf30   : > { %4524 = vmatpush3.bf16.msra.mxu1 %v4848_v20 }
 0xf31   : > { %4546 = vmatpush3.bf16.msra.mxu0 %v4849_v21  ;;  %4525 = vmatprep.subr.bf16.mxu1 %v4850_v9 }
 0xf32   : > { %4547 = vmatprep.subr.bf16.mxu0 %v4851_v23 }
 0xf34   : > { %4526 = vmatpush3.bf16.msra.mxu1 %v4852_v24 }
 0xf35   : > { %4548 = vmatpush3.bf16.msra.mxu0 %v4853_v28 }
 0xf37   : > { %3966 = vmatmul.mubr.bf16.vlgmr.msra.gmra.mrb[68].mxu1 %v2915_v30  ;;  %v4329_v30 = vld [vmem:[%s5929_s21] ss:$0 sm:$0xff] }
 0xf38   : > { %4006 = vmatmul.mubr.bf16.vlgmr.msra.gmra.mrb[72].mxu0 %v2917_v31 }
 0xfaa   : > { %v4395_v32 = vpop.f32.mrb[56].mxu1  ;;  %v4417_v33 = vpop.f32.mrb[60].mxu0 }
 0xfab   : > { %v4396_v34 = vpop.f32.mrb[57].mxu1  ;;  %v4418_v35 = vpop.f32.mrb[61].mxu0 }
 0xfac   : > { %v4397_v39 = vadd.f32 %v4396_v34, %v4395_v32  ;;  %v4419_v40 = vadd.f32 %v4418_v35, %v4417_v33  ;;  %v4398_v41 = vpop.f32.mrb[58].mxu1  ;;  %v4420_v42 = vpop.f32.mrb[62].mxu0 }
 0xfad   : > { %v4399_v37 = vpop.f32.mrb[59].mxu1  ;;  %v4421_v45 = vpop.f32.mrb[63].mxu0 }
 0xfae   : > { %v3728_v5 = vadd.f32 %v4397_v39, %v4199_v36 }
 0xfb0   : > { %v3768_v46 = vadd.f32 %v4419_v40, %v3728_v5 }
 0xfca   : > { %v4439_v47 = vpop.f32.mrb[60].mxu1  ;;  %v4461_v2 = vpop.f32.mrb[64].mxu0 }
 0xfcb   : > { %v4440_v4 = vpop.f32.mrb[61].mxu1  ;;  %v4462_v26 = vpop.f32.mrb[65].mxu0 }
 0xfcc   : > { %v4441_v27 = vadd.f32 %v4440_v4, %v4439_v47  ;;  %v4463_v48 = vadd.f32 %v4462_v26, %v4461_v2  ;;  %v4442_v49 = vpop.f32.mrb[62].mxu1  ;;  %v4464_v50 = vpop.f32.mrb[66].mxu0 }
 0xfcd   : > { %v4443_v22 = vpop.f32.mrb[63].mxu1  ;;  %v4465_v38 = vpop.f32.mrb[67].mxu0 }
 0xfce   : > { %v3808_v1 = vadd.f32 %v4441_v27, %v3768_v46 }
 0xfd0   : > { %v3848_v8 = vadd.f32 %v4463_v48, %v3808_v1 }
 0xfea   : > { %v4483_v14 = vpop.f32.mrb[64].mxu1 }
 0xfeb   : > { %v4505_v51 = vpop.f32.mrb[68].mxu0  ;;  %v4484_v52 = vpop.f32.mrb[65].mxu1 }
 0xfec   : > { %v4485_v15 = vadd.f32 %v4484_v52, %v4483_v14  ;;  %v4506_v53 = vpop.f32.mrb[69].mxu0  ;;  %v4486_v10 = vpop.f32.mrb[66].mxu1 }
 0xfed   : > { %v4507_v11 = vadd.f32 %v4506_v53, %v4505_v51  ;;  %v4508_v54 = vpop.f32.mrb[70].mxu0  ;;  %v4487_v55 = vpop.f32.mrb[67].mxu1 }
 0xfee   : > { %v3888_v43 = vadd.f32 %v4485_v15, %v3848_v8  ;;  %v4509_v44 = vpop.f32.mrb[71].mxu0 }
 0xff0   : > { %v3928_v57 = vadd.f32 %v4507_v11, %v3888_v43 }
0x100a   : > { %v4527_v58 = vpop.f32.mrb[68].mxu1 }
0x100b   : > { %v4549_v59 = vpop.f32.mrb[72].mxu0  ;;  %v4528_v60 = vpop.f32.mrb[69].mxu1 }
0x100c   : > { %v4529_v61 = vadd.f32 %v4528_v60, %v4527_v58  ;;  %v4550_v62 = vpop.f32.mrb[73].mxu0  ;;  %v4530_v63 = vpop.f32.mrb[70].mxu1 }
0x100d   : > { %v4551_v0 = vadd.f32 %v4550_v62, %v4549_v59  ;;  %v4552_v3 = vpop.f32.mrb[74].mxu0  ;;  %v4531_v6 = vpop.f32.mrb[71].mxu1 }
0x100e   : > { %v3968_v7 = vadd.f32 %v4529_v61, %v3928_v57  ;;  %v4553_v12 = vpop.f32.mrb[75].mxu0 }
0x1010   : > { %v4008_v13 = vadd.f32 %v4551_v0, %v3968_v7 }
0x1012   : > { %v4013_v16 = vadd.f32 %v4008_v13, %v5346_v56  ;;  %v4328_v56 = vld [vmem:[%s5928_s20] ss:$0 sm:$0xff] }
0x1014   : > { %v4016_v17 = vsel %vm723_vm1, %v4013_v16, 0.0 }
0x1015   : > { %4017 = vadd.xlane.f32.xlu0 %v4016_v17 }
0x10a2   : > { %v4018_v18 = vpop.xlane.xlu0 %4017 }
0x10a3   : > { %v4019_v19 = vmul.f32 0.03125, %v4018_v18 }
0x10a5   : > { %v4020_v20 = vsub.f32 %v4013_v16, %v4019_v19 }
0x10a7   : > { %v4021_v21 = vmul.f32 %v4020_v20, %v4020_v20 }
0x10a9   : > { %v4022_v9 = vsel %vm723_vm1, %v4021_v21, 0.0 }
0x10aa   : > { %4023 = vadd.xlane.f32.xlu1 %v4022_v9 }
0x1137   : > { %v4024_v23 = vpop.xlane.xlu1 %4023 }
0x1138   : > { %v4025_v24 = vmul.f32 0.03125, %v4024_v23 }
0x113a   : > { %v4026_v25 = vadd.f32 1e-05, %v4025_v24 }
0x113c   : > { %4890 = vrsqrt.f32 %v4026_v25 }
0x1146   : > { %v4891_v28 = vpop.eup %4890 }
0x1147   : > { %v4028_v29 = vmul.f32 %v4891_v28, %v4020_v20 }
0x1149   : > { %v4035_v31 = vmul.f32 %v4328_v56, %v4028_v29 }
0x114b   : > { %v4042_v32 = vadd.f32 %v4329_v30, %v4035_v31 }
0x114d   : > { %v4043_v33 = vpack.c.bf16 %v4042_v32, %v4042_v32 }
0x114f   : > { %4045 = vst.msk [vmem:[%s695_s6] sm:$0xf] %vm4044_vm7, %v4043_v33 }
0x1150 PF: > { %s32_s3 = sadd.s32 1, %s4898_s3  }
0x1151   : > { %p29_p4 = scmp.ge.s32.totalorder %s32_s3, 4  }
0x1153   :  { %31 = sbr.rel (!%p29_p4) target bundleno = 8 (0x8), region = 141 }

</bundles_post_ra>
